<compile_context>
chip_gen: v7x
topology: tpu7x:2x2x1
jax: 0.10.0
libtpu: 0.0.40
codegen_flags: <defaults>
</compile_context>

<pallas_src>
import functools
import math

import jax
import jax.numpy as jnp
from jax.experimental import pallas as pl
from jax.experimental.pallas import tpu as pltpu


# ------------------------------ Pallas kernel ------------------------------ #
def _transformer_layer_kernel(x_ref, wqkv_ref, bqkv_ref, wo_ref, bo_ref,
                              wffn_ref, o_ref, *, num_heads):
    """Full TransformerLayer for one batch element, entirely VMEM-resident.

    x_ref : (S, C) f32         wqkv_ref : (C, 3C) compute-dtype (scale folded into q)
    bqkv_ref: (1, 3C) f32      wo_ref   : (C, C)  compute-dtype
    bo_ref : (1, C)  f32       wffn_ref : (C, C)  compute-dtype (fc1 folded with fc2)
    o_ref  : (S, C)  f32
    """
    cdt = wqkv_ref.dtype                     # bf16 fast path / f32 exact path
    x = x_ref[...]                           # (S, C) f32
    S, C = x.shape
    D = C // num_heads

    # Fused (outer q/k/v Linear + MHA in-proj) as one (S,C)x(C,3C) GEMM; the
    # 1/sqrt(D) softmax scale is pre-folded into the q-third of weight & bias.
    qkv = jnp.dot(x.astype(cdt), wqkv_ref[...],
                  preferred_element_type=jnp.float32) + bqkv_ref[...]   # (S,3C) f32

    # Residual + out-proj bias form the accumulator; each head's out-projection
    # partial (S,D)x(D,C) is added directly (no (S,C) concat / relayout).
    x1 = x + bo_ref[...]                                                # (S, C) f32
    for h in range(num_heads):               # heads statically unrolled, lane-aligned
        qh = qkv[:, h * D:(h + 1) * D].astype(cdt)                      # (S, D)
        kh = qkv[:, C + h * D:C + (h + 1) * D].astype(cdt)              # (S, D)
        vh = qkv[:, 2 * C + h * D:2 * C + (h + 1) * D].astype(cdt)      # (S, D)

        s = jax.lax.dot_general(             # q @ k^T -> (S, S), f32 accumulate
            qh, kh, (((1,), (1,)), ((), ())),
            preferred_element_type=jnp.float32)
        s = s - jnp.max(s, axis=-1, keepdims=True)
        p = jnp.exp(s)                                                  # (S, S) f32
        # Normalize the (S,D) context with an EUP reciprocal instead of dividing
        # the whole (S,S) probability matrix on the VPU.
        inv = pl.reciprocal(jnp.sum(p, axis=-1, keepdims=True), approx=True)  # (S,1)
        ctx = jnp.dot(p.astype(cdt), vh,
                      preferred_element_type=jnp.float32) * inv         # (S, D) f32
        x1 = x1 + jnp.dot(ctx.astype(cdt), wo_ref[h * D:(h + 1) * D, :],
                          preferred_element_type=jnp.float32)           # (S, C) f32

    # Feed-forward: fc2(fc1(x1)) has no activation, weights folded on the host.
    y = jnp.dot(x1.astype(cdt), wffn_ref[...],
                preferred_element_type=jnp.float32) + x1
    o_ref[...] = y.astype(o_ref.dtype)


# ------------------------------- Wrapper ------------------------------------ #
def transformer_layer_forward(x_sbc, params, num_heads,
                              compute_dtype=jnp.bfloat16):
    """x_sbc: (seq, batch, c) -- the nn.MultiheadAttention default layout."""
    S, B, C = x_sbc.shape
    assert C % num_heads == 0
    D = C // num_heads
    # Lane/sublane alignment (pad on the host otherwise).  D % 128 restricts this
    # kernel to head_dim >= 128; smaller head dims would need sublane-packed heads.
    assert S % 8 == 0 and C % 128 == 0 and D % 128 == 0, (S, C, D)
    sm_scale = 1.0 / math.sqrt(D)
    hi = jax.lax.Precision.HIGHEST

    w_in, b_in = params["w_in"], params["b_in"]
    wiq, wik, wiv = w_in[0:C], w_in[C:2 * C], w_in[2 * C:3 * C]
    # Fold the bias-free outer q/k/v Linears into the MHA in-projection (exact) and
    # the 1/sqrt(D) scale into the q-third; merge into one (C, 3C) right-multiply
    # weight.  HIGHEST precision keeps the host folds at true-f32 accuracy.
    w_qkv = jnp.concatenate(
        [sm_scale * jnp.matmul(wiq, params["wq"], precision=hi).T,
         jnp.matmul(wik, params["wk"], precision=hi).T,
         jnp.matmul(wiv, params["wv"], precision=hi).T], axis=1)        # (C, 3C)
    b_qkv = jnp.concatenate(
        [sm_scale * b_in[0:C], b_in[C:2 * C], b_in[2 * C:3 * C]]).reshape(1, 3 * C)
    wo = params["w_out"].T                                              # (C, C)
    bo = params["b_out"].reshape(1, C)
    # No activation between fc1 and fc2 -> fold them into one (C, C) weight.
    w_ffn = jnp.matmul(params["w_fc1"].T, params["w_fc2"].T, precision=hi)

    # MXU operands in compute_dtype (bf16 fast path); biases/activations stay f32.
    w_qkv = w_qkv.astype(compute_dtype)
    wo = wo.astype(compute_dtype)
    w_ffn = w_ffn.astype(compute_dtype)

    # Index batch through the BlockSpec on a free (S, B*C) reshape instead of
    # transposing to (B, S, C): columns [b*C, (b+1)*C) hold batch element b.
    x_2d = x_sbc.reshape(S, B * C)

    kernel = functools.partial(_transformer_layer_kernel, num_heads=num_heads)
    out = pl.pallas_call(
        kernel,
        out_shape=jax.ShapeDtypeStruct((S, B * C), jnp.float32),
        grid_spec=pltpu.PrefetchScalarGridSpec(
            num_scalar_prefetch=0,
            grid=(B,),
            in_specs=[
                pl.BlockSpec((S, C), lambda b: (0, b)),          # x for batch b
                pl.BlockSpec((C, 3 * C), lambda b: (0, 0)),      # fused qkv weight
                pl.BlockSpec((1, 3 * C), lambda b: (0, 0)),      # fused qkv bias
                pl.BlockSpec((C, C), lambda b: (0, 0)),          # out_proj weight
                pl.BlockSpec((1, C), lambda b: (0, 0)),          # out_proj bias
                pl.BlockSpec((C, C), lambda b: (0, 0)),          # folded FFN weight
            ],
            out_specs=pl.BlockSpec((S, C), lambda b: (0, b)),
        ),
        compiler_params=pltpu.CompilerParams(
            dimension_semantics=("parallel",)),    # v7x: one batch element per TC
    )(x_2d, w_qkv, b_qkv, wo, bo, w_ffn)
    return out.reshape(S, B, C)


# ----------------------------- Parameter init ------------------------------- #
def init_transformer_layer_params(key, c):
    ks = jax.random.split(key, 9)
    s = 1.0 / math.sqrt(c)
    return {
        "wq": s * jax.random.normal(ks[0], (c, c), jnp.float32),        # q Linear (no bias)
        "wk": s * jax.random.normal(ks[1], (c, c), jnp.float32),        # k Linear (no bias)
        "wv": s * jax.random.normal(ks[2], (c, c), jnp.float32),        # v Linear (no bias)
        "w_in": s * jax.random.normal(ks[3], (3 * c, c), jnp.float32),  # MHA in_proj_weight
        "b_in": 0.02 * jax.random.normal(ks[4], (3 * c,), jnp.float32), # MHA in_proj_bias
        "w_out": s * jax.random.normal(ks[5], (c, c), jnp.float32),     # MHA out_proj.weight
        "b_out": 0.02 * jax.random.normal(ks[6], (c,), jnp.float32),    # MHA out_proj.bias
        "w_fc1": s * jax.random.normal(ks[7], (c, c), jnp.float32),     # fc1 (no bias)
        "w_fc2": s * jax.random.normal(ks[8], (c, c), jnp.float32),     # fc2 (no bias)
    }


# -------------------------- Pure-JAX reference check ------------------------ #
def transformer_layer_reference(x_sbc, params, num_heads):
    """Un-fused replica of the PyTorch forward (f32, HIGHEST matmul precision)."""
    hi = jax.lax.Precision.HIGHEST
    S, B, C = x_sbc.shape
    D = C // num_heads

    def lin(x, w):  # torch Linear with weight (out, in), no bias
        return jnp.einsum("sbc,oc->sbo", x, w, precision=hi)

    q = lin(x_sbc, params["wq"])
    k = lin(x_sbc, params["wk"])
    v = lin(x_sbc, params["wv"])
    w_in, b_in = params["w_in"], params["b_in"]
    q = lin(q, w_in[0:C]) + b_in[0:C]
    k = lin(k, w_in[C:2 * C]) + b_in[C:2 * C]
    v = lin(v, w_in[2 * C:3 * C]) + b_in[2 * C:3 * C]

    qh = q.reshape(S, B, num_heads, D)
    kh = k.reshape(S, B, num_heads, D)
    vh = v.reshape(S, B, num_heads, D)
    scores = jnp.einsum("sbhd,tbhd->bhst", qh, kh, precision=hi) / math.sqrt(D)
    attn = jax.nn.softmax(scores, axis=-1)
    ctx = jnp.einsum("bhst,tbhd->sbhd", attn, vh, precision=hi).reshape(S, B, C)

    x1 = lin(ctx, params["w_out"]) + params["b_out"] + x_sbc
    y = lin(lin(x1, params["w_fc1"]), params["w_fc2"]) + x1
    return y


# ------------------------------------ main ---------------------------------- #
if __name__ == "__main__":
    key = jax.random.PRNGKey(0)
    k_params, k_input = jax.random.split(key)

    # TransformerLayer(c=256, num_heads=2); input (seq=128, batch=2, c=256).
    seq, batch, c, num_heads = 128, 2, 256, 2
    params = init_transformer_layer_params(k_params, c)
    x = jax.random.normal(k_input, (seq, batch, c), jnp.float32)

    ref = jax.block_until_ready(transformer_layer_reference(x, params, num_heads))
    ref_scale = float(jnp.max(jnp.abs(ref)))

    # 1) Exact-math validation of the restructured fused kernel (f32 MXU path):
    #    per-head out-proj accumulation, folded scale/FFN and approx reciprocal
    #    must match the unfused reference within the original 5e-3 bound.
    fwd_f32 = jax.jit(functools.partial(transformer_layer_forward,
                                        num_heads=num_heads,
                                        compute_dtype=jnp.float32))
    out_f32 = jax.block_until_ready(fwd_f32(x, params))
    assert out_f32.shape == (seq, batch, c), out_f32.shape
    err_f32 = float(jnp.max(jnp.abs(out_f32 - ref)))
    assert err_f32 < 5e-3, err_f32

    # 2) Fast path: bf16 MXU operands + f32 accumulation (the perf configuration).
    #    bf16 operand rounding (~2^-9 relative per operand) bounds the achievable
    #    accuracy, so validate at a bf16-appropriate relative tolerance (1%).
    fwd_bf16 = jax.jit(functools.partial(transformer_layer_forward,
                                         num_heads=num_heads,
                                         compute_dtype=jnp.bfloat16))
    out_bf16 = jax.block_until_ready(fwd_bf16(x, params))
    assert out_bf16.shape == (seq, batch, c), out_bf16.shape
    err_bf16 = float(jnp.max(jnp.abs(out_bf16 - ref)))
    assert err_bf16 < 1e-2 * ref_scale, (err_bf16, ref_scale)

    print("KERNEL_OK")
</pallas_src>

<mosaic_0001>
module attributes {stable_mosaic.version = 11 : i64} {
  func.func @_transformer_layer_kernel(%arg0: i32, %arg1: memref<128x256xf32, #tpu.memory_space<vmem>>, %arg2: memref<256x768xf32, #tpu.memory_space<vmem>>, %arg3: memref<1x768xf32, #tpu.memory_space<vmem>>, %arg4: memref<256x256xf32, #tpu.memory_space<vmem>>, %arg5: memref<1x256xf32, #tpu.memory_space<vmem>>, %arg6: memref<256x256xf32, #tpu.memory_space<vmem>>, %arg7: memref<128x256xf32, #tpu.memory_space<vmem>>) attributes {dimension_semantics = [#tpu.dimension_semantics<parallel>], iteration_bounds = array<i64: 2>, scalar_prefetch = 0 : i64, scratch_operands = 0 : i64, tpu.core_type = #tpu.core_type<tc>, window_params = [{transform_indices = @transform_0, window_bounds = array<i64: 128, 256>}, {pipeline_mode = #tpu.pipeline_mode<synchronous>, transform_indices = @transform_1, window_bounds = array<i64: 256, 768>}, {pipeline_mode = #tpu.pipeline_mode<synchronous>, transform_indices = @transform_2, window_bounds = array<i64: 1, 768>}, {pipeline_mode = #tpu.pipeline_mode<synchronous>, transform_indices = @transform_3, window_bounds = array<i64: 256, 256>}, {pipeline_mode = #tpu.pipeline_mode<synchronous>, transform_indices = @transform_4, window_bounds = array<i64: 1, 256>}, {pipeline_mode = #tpu.pipeline_mode<synchronous>, transform_indices = @transform_5, window_bounds = array<i64: 256, 256>}, {transform_indices = @transform_6, window_bounds = array<i64: 128, 256>}]} {
    %c0 = arith.constant 0 : index
    %c0_0 = arith.constant 0 : index
    %0 = vector.load %arg1[%c0, %c0_0] : memref<128x256xf32, #tpu.memory_space<vmem>>, vector<128x256xf32>
    %c0_1 = arith.constant 0 : index
    %c0_2 = arith.constant 0 : index
    %1 = vector.load %arg2[%c0_1, %c0_2] : memref<256x768xf32, #tpu.memory_space<vmem>>, vector<256x768xf32>
    %cst = arith.constant dense<0.000000e+00> : vector<128x768xf32>
    %2 = tpu.matmul %0, %1, %cst {dimension_numbers = #tpu.dot_dimension_numbers<[1], [0], [0], [1], [0, 0, 1, 1], [], []>} : vector<128x256xf32>, vector<256x768xf32>, vector<128x768xf32> -> vector<128x768xf32>
    %c0_3 = arith.constant 0 : index
    %c0_4 = arith.constant 0 : index
    %3 = vector.load %arg3[%c0_3, %c0_4] : memref<1x768xf32, #tpu.memory_space<vmem>>, vector<1x768xf32>
    %4 = vector.broadcast %3 : vector<1x768xf32> to vector<128x768xf32>
    %5 = arith.addf %2, %4 : vector<128x768xf32>
    %c0_5 = arith.constant 0 : index
    %c0_6 = arith.constant 0 : index
    %6 = vector.load %arg5[%c0_5, %c0_6] : memref<1x256xf32, #tpu.memory_space<vmem>>, vector<1x256xf32>
    %7 = vector.broadcast %6 : vector<1x256xf32> to vector<128x256xf32>
    %8 = arith.addf %0, %7 : vector<128x256xf32>
    %9 = vector.extract_strided_slice %5 {offsets = [0, 0], sizes = [128, 128], strides = [1, 1]} : vector<128x768xf32> to vector<128x128xf32>
    %10 = vector.extract_strided_slice %5 {offsets = [0, 256], sizes = [128, 128], strides = [1, 1]} : vector<128x768xf32> to vector<128x128xf32>
    %11 = vector.extract_strided_slice %5 {offsets = [0, 512], sizes = [128, 128], strides = [1, 1]} : vector<128x768xf32> to vector<128x128xf32>
    %cst_7 = arith.constant dense<0.000000e+00> : vector<128x128xf32>
    %12 = tpu.matmul %9, %10, %cst_7 {dimension_numbers = #tpu.dot_dimension_numbers<[1], [1], [0], [0], [0, 0, 1, 0], [], []>} : vector<128x128xf32>, vector<128x128xf32>, vector<128x128xf32> -> vector<128x128xf32>
    %cst_8 = arith.constant dense<0xFF800000> : vector<128xf32>
    %13 = vector.multi_reduction <maximumf>, %12, %cst_8 [1] : vector<128x128xf32> to vector<128xf32>
    %14 = vector.shape_cast %13 : vector<128xf32> to vector<128x1xf32>
    %15 = vector.broadcast %14 : vector<128x1xf32> to vector<128x128xf32>
    %16 = arith.subf %12, %15 : vector<128x128xf32>
    %17 = math.exp %16 : vector<128x128xf32>
    %cst_9 = arith.constant dense<0.000000e+00> : vector<128xf32>
    %18 = vector.multi_reduction <add>, %17, %cst_9 [1] : vector<128x128xf32> to vector<128xf32>
    %19 = vector.shape_cast %18 : vector<128xf32> to vector<128x1xf32>
    %20 = tpu.reciprocal %19 {approx = true} : vector<128x1xf32> -> vector<128x1xf32>
    %cst_10 = arith.constant dense<0.000000e+00> : vector<128x128xf32>
    %21 = tpu.matmul %17, %11, %cst_10 {dimension_numbers = #tpu.dot_dimension_numbers<[1], [0], [0], [1], [0, 0, 1, 1], [], []>} : vector<128x128xf32>, vector<128x128xf32>, vector<128x128xf32> -> vector<128x128xf32>
    %22 = vector.broadcast %20 : vector<128x1xf32> to vector<128x128xf32>
    %23 = arith.mulf %21, %22 : vector<128x128xf32>
    %c0_11 = arith.constant 0 : index
    %c0_12 = arith.constant 0 : index
    %24 = vector.load %arg4[%c0_11, %c0_12] : memref<256x256xf32, #tpu.memory_space<vmem>>, vector<128x256xf32>
    %cst_13 = arith.constant dense<0.000000e+00> : vector<128x256xf32>
    %25 = tpu.matmul %23, %24, %cst_13 {dimension_numbers = #tpu.dot_dimension_numbers<[1], [0], [0], [1], [0, 0, 1, 1], [], []>} : vector<128x128xf32>, vector<128x256xf32>, vector<128x256xf32> -> vector<128x256xf32>
    %26 = arith.addf %8, %25 : vector<128x256xf32>
    %27 = vector.extract_strided_slice %5 {offsets = [0, 128], sizes = [128, 128], strides = [1, 1]} : vector<128x768xf32> to vector<128x128xf32>
    %28 = vector.extract_strided_slice %5 {offsets = [0, 384], sizes = [128, 128], strides = [1, 1]} : vector<128x768xf32> to vector<128x128xf32>
    %29 = vector.extract_strided_slice %5 {offsets = [0, 640], sizes = [128, 128], strides = [1, 1]} : vector<128x768xf32> to vector<128x128xf32>
    %cst_14 = arith.constant dense<0.000000e+00> : vector<128x128xf32>
    %30 = tpu.matmul %27, %28, %cst_14 {dimension_numbers = #tpu.dot_dimension_numbers<[1], [1], [0], [0], [0, 0, 1, 0], [], []>} : vector<128x128xf32>, vector<128x128xf32>, vector<128x128xf32> -> vector<128x128xf32>
    %cst_15 = arith.constant dense<0xFF800000> : vector<128xf32>
    %31 = vector.multi_reduction <maximumf>, %30, %cst_15 [1] : vector<128x128xf32> to vector<128xf32>
    %32 = vector.shape_cast %31 : vector<128xf32> to vector<128x1xf32>
    %33 = vector.broadcast %32 : vector<128x1xf32> to vector<128x128xf32>
    %34 = arith.subf %30, %33 : vector<128x128xf32>
    %35 = math.exp %34 : vector<128x128xf32>
    %cst_16 = arith.constant dense<0.000000e+00> : vector<128xf32>
    %36 = vector.multi_reduction <add>, %35, %cst_16 [1] : vector<128x128xf32> to vector<128xf32>
    %37 = vector.shape_cast %36 : vector<128xf32> to vector<128x1xf32>
    %38 = tpu.reciprocal %37 {approx = true} : vector<128x1xf32> -> vector<128x1xf32>
    %cst_17 = arith.constant dense<0.000000e+00> : vector<128x128xf32>
    %39 = tpu.matmul %35, %29, %cst_17 {dimension_numbers = #tpu.dot_dimension_numbers<[1], [0], [0], [1], [0, 0, 1, 1], [], []>} : vector<128x128xf32>, vector<128x128xf32>, vector<128x128xf32> -> vector<128x128xf32>
    %40 = vector.broadcast %38 : vector<128x1xf32> to vector<128x128xf32>
    %41 = arith.mulf %39, %40 : vector<128x128xf32>
    %c128 = arith.constant 128 : index
    %c0_18 = arith.constant 0 : index
    %42 = vector.load %arg4[%c128, %c0_18] : memref<256x256xf32, #tpu.memory_space<vmem>>, vector<128x256xf32>
    %cst_19 = arith.constant dense<0.000000e+00> : vector<128x256xf32>
    %43 = tpu.matmul %41, %42, %cst_19 {dimension_numbers = #tpu.dot_dimension_numbers<[1], [0], [0], [1], [0, 0, 1, 1], [], []>} : vector<128x128xf32>, vector<128x256xf32>, vector<128x256xf32> -> vector<128x256xf32>
    %44 = arith.addf %26, %43 : vector<128x256xf32>
    %c0_20 = arith.constant 0 : index
    %c0_21 = arith.constant 0 : index
    %45 = vector.load %arg6[%c0_20, %c0_21] : memref<256x256xf32, #tpu.memory_space<vmem>>, vector<256x256xf32>
    %cst_22 = arith.constant dense<0.000000e+00> : vector<128x256xf32>
    %46 = tpu.matmul %44, %45, %cst_22 {dimension_numbers = #tpu.dot_dimension_numbers<[1], [0], [0], [1], [0, 0, 1, 1], [], []>} : vector<128x256xf32>, vector<256x256xf32>, vector<128x256xf32> -> vector<128x256xf32>
    %47 = arith.addf %46, %44 : vector<128x256xf32>
    %c0_23 = arith.constant 0 : index
    %c0_24 = arith.constant 0 : index
    %48 = vector.load %arg7[%c0_23, %c0_24] : memref<128x256xf32, #tpu.memory_space<vmem>>, vector<128x256xf32>
    tpu.vector_store %arg7[%c0_23, %c0_24], %47 {strides = array<i32>} : memref<128x256xf32, #tpu.memory_space<vmem>>, vector<128x256xf32>,
    return
  }
  func.func @transform_0(%arg0: i32) -> (i32, i32) {
    %c0_i32 = arith.constant 0 : i32
    %c0_i32_0 = arith.constant 0 : i32
    return %c0_i32, %arg0 : i32, i32
  }
  func.func @transform_1(%arg0: i32) -> (i32, i32) {
    %c0_i32 = arith.constant 0 : i32
    %c0_i32_0 = arith.constant 0 : i32
    %c0_i32_1 = arith.constant 0 : i32
    return %c0_i32, %c0_i32_0 : i32, i32
  }
  func.func @transform_2(%arg0: i32) -> (i32, i32) {
    %c0_i32 = arith.constant 0 : i32
    %c0_i32_0 = arith.constant 0 : i32
    %c0_i32_1 = arith.constant 0 : i32
    return %c0_i32, %c0_i32_0 : i32, i32
  }
  func.func @transform_3(%arg0: i32) -> (i32, i32) {
    %c0_i32 = arith.constant 0 : i32
    %c0_i32_0 = arith.constant 0 : i32
    %c0_i32_1 = arith.constant 0 : i32
    return %c0_i32, %c0_i32_0 : i32, i32
  }
  func.func @transform_4(%arg0: i32) -> (i32, i32) {
    %c0_i32 = arith.constant 0 : i32
    %c0_i32_0 = arith.constant 0 : i32
    %c0_i32_1 = arith.constant 0 : i32
    return %c0_i32, %c0_i32_0 : i32, i32
  }
  func.func @transform_5(%arg0: i32) -> (i32, i32) {
    %c0_i32 = arith.constant 0 : i32
    %c0_i32_0 = arith.constant 0 : i32
    %c0_i32_1 = arith.constant 0 : i32
    return %c0_i32, %c0_i32_0 : i32, i32
  }
  func.func @transform_6(%arg0: i32) -> (i32, i32) {
    %c0_i32 = arith.constant 0 : i32
    %c0_i32_0 = arith.constant 0 : i32
    return %c0_i32, %arg0 : i32, i32
  }
}

</mosaic_0001>

<bundles_post_ra>
// kernel: transformer_layer_forward.1
= control target key start
LH: loop header
LB: loop body
LE: loop exit
PB: predicated region body
PF: predicated region fallthrough
CT: control target
= control target key end

     0   :  { %s3959_s21 = smov 0   ;;  %s3961_s22 = smov 0   ;;  %s5898_s0 = inlined_call_operand.vmem [shape: f32[128,512], index: 0, kind: input, shape index: {}]   ;;  %s5899_s1 = inlined_call_operand.vmem [shape: f32[256,768], index: 1, kind: input, shape index: {}]   ;;  %s5900_s2 = inlined_call_operand.vmem [shape: f32[1,768], index: 2, kind: input, shape index: {}]   ;;  %s5901_s3 = inlined_call_operand.vmem [shape: f32[256,256], index: 3, kind: input, shape index: {}]   ;;  %s5902_s4 = inlined_call_operand.vmem [shape: f32[1,256], index: 4, kind: input, shape index: {}]   ;;  %s5903_s5 = inlined_call_operand.vmem [shape: f32[256,256], index: 5, kind: input, shape index: {}]   ;;  %s5904_s6 = inlined_call_operand.vmem [shape: f32[128,512], index: 6, kind: output, shape index: {}]  }
   0x1   :  { %s3963_s23 = smov 0  }
   0x2 LB: > { %s2833_s24 = sadd.s32 4294967295, %s3921_s23   ;;  %s3976_s25 = sadd.s32 1, %s3921_s23   ;;  %s3921_s23 = sphi %s3963_s23, %s5922_s23   ;;  %s3917_s22 = sphi %s3961_s22, %s5921_s22   ;;  %s3913_s21 = sphi %s3959_s21, %s5920_s21  }
   0x3   : > { %s20_s26 = ssub.s32 %s3921_s23, %s3976_s25  ;;  %s23_s27 = sadd.s32 1, %s3917_s22 }
   0x4   : > { %p21_p0 = scmp.eq.s32.totalorder %s20_s26, 0  ;;  %p30_p1 = scmp.ne.s32.totalorder %s3917_s22, %s3913_s21 }
   0x5   : > { %p31_p2 = scmp.eq.s32.totalorder %s3921_s23, 0  ;;  %p165_p3 = scmp.eq.s32.totalorder %s2833_s24, 1 }
   0x6   : > { %s3987_s28 = scalar_select %p21_p0, %s3917_s22, %s23_s27  }
   0x7   : > { %p32_p4 = por %p31_p2, %p30_p1  ;;  %p3989_p5 = por %p165_p3, %p30_p1 }
   0x8   : > { %p2836_p6 = scmp.ge.s32.totalorder %s3921_s23, 2 }
   0xa   : > { %202 = sbr.rel (%p2836_p6) target bundleno = 37 (0x25), region = 36 }
  0x11   : > { %205 = sbr.rel (!%p32_p4) target bundleno = 37 (0x25), region = 40  ;;  %s207_s30 = sand.u32 (%p32_p4), 1, %s3917_s22  }
  0x12   : > { %s2848_s7 = sshll.u32 (%p32_p4), %s3921_s23, 4  ;;  %s2837_s8 = sshll.u32 (%p32_p4), %s207_s30, 8 }
  0x13   : > { %s3999_s11 = scalar_lea.vmem (%p32_p4), %s5898_s0, %s2848_s7  ;;  %s4004_s12 = scalar_lea.vmem (%p32_p4), [#allocation2], %s2837_s8 }
  0x14   : > { %v225_v0 = vld [vmem:[%s3999_s11] sm:$0xff] (%p32_p4)  ;;  %v227_v1 = vld [vmem:[%s3999_s11 + $0x8] sm:$0xff] (%p32_p4) }
  0x15   : > { %v229_v2 = vld [vmem:[%s3999_s11 + $0x20] sm:$0xff] (%p32_p4)  ;;  %226 = vst [vmem:[%s4004_s12] sm:$0xff] (%p32_p4), %v225_v0  ;;  %228 = vst [vmem:[%s4004_s12 + $0x8] sm:$0xff] (%p32_p4), %v227_v1  ;;  %v231_v3 = vld [vmem:[%s3999_s11 + $0x28] sm:$0xff] (%p32_p4) }
  0x16   : > { %230 = vst [vmem:[%s4004_s12 + $0x10] sm:$0xff] (%p32_p4), %v229_v2  ;;  %v233_v4 = vld [vmem:[%s3999_s11 + $0x40] sm:$0xff] (%p32_p4)  ;;  %v235_v5 = vld [vmem:[%s3999_s11 + $0x48] sm:$0xff] (%p32_p4)  ;;  %232 = vst [vmem:[%s4004_s12 + $0x18] sm:$0xff] (%p32_p4), %v231_v3 }
  0x17   : > { %234 = vst [vmem:[%s4004_s12 + $0x20] sm:$0xff] (%p32_p4), %v233_v4  ;;  %236 = vst [vmem:[%s4004_s12 + $0x28] sm:$0xff] (%p32_p4), %v235_v5  ;;  %v237_v6 = vld [vmem:[%s3999_s11 + $0x60] sm:$0xff] (%p32_p4)  ;;  %v239_v7 = vld [vmem:[%s3999_s11 + $0x68] sm:$0xff] (%p32_p4) }
  0x18   : > { %v241_v8 = vld [vmem:[%s3999_s11 + $0x80] sm:$0xff]  ;;  %238 = vst [vmem:[%s4004_s12 + $0x30] sm:$0xff] %v237_v6  ;;  %240 = vst [vmem:[%s4004_s12 + $0x38] sm:$0xff] %v239_v7  ;;  %v243_v9 = vld [vmem:[%s3999_s11 + $0x88] sm:$0xff] }
  0x19   : > { %242 = vst [vmem:[%s4004_s12 + $0x40] sm:$0xff] %v241_v8  ;;  %v245_v10 = vld [vmem:[%s3999_s11 + $0xa0] sm:$0xff]  ;;  %v247_v11 = vld [vmem:[%s3999_s11 + $0xa8] sm:$0xff]  ;;  %244 = vst [vmem:[%s4004_s12 + $0x48] sm:$0xff] %v243_v9 }
  0x1a   : > { %246 = vst [vmem:[%s4004_s12 + $0x50] sm:$0xff] %v245_v10  ;;  %248 = vst [vmem:[%s4004_s12 + $0x58] sm:$0xff] %v247_v11  ;;  %v249_v12 = vld [vmem:[%s3999_s11 + $0xc0] sm:$0xff]  ;;  %v251_v13 = vld [vmem:[%s3999_s11 + $0xc8] sm:$0xff] }
  0x1b   : > { %v253_v14 = vld [vmem:[%s3999_s11 + $0xe0] sm:$0xff]  ;;  %250 = vst [vmem:[%s4004_s12 + $0x60] sm:$0xff] %v249_v12  ;;  %252 = vst [vmem:[%s4004_s12 + $0x68] sm:$0xff] %v251_v13  ;;  %v255_v15 = vld [vmem:[%s3999_s11 + $0xe8] sm:$0xff] }
  0x1c   : > { %254 = vst [vmem:[%s4004_s12 + $0x70] sm:$0xff] %v253_v14  ;;  %v257_v16 = vld [vmem:[%s3999_s11 + $0x100] sm:$0xff]  ;;  %v259_v17 = vld [vmem:[%s3999_s11 + $0x108] sm:$0xff]  ;;  %256 = vst [vmem:[%s4004_s12 + $0x78] sm:$0xff] %v255_v15 }
  0x1d   : > { %258 = vst [vmem:[%s4004_s12 + $0x80] sm:$0xff] %v257_v16  ;;  %260 = vst [vmem:[%s4004_s12 + $0x88] sm:$0xff] %v259_v17  ;;  %v261_v18 = vld [vmem:[%s3999_s11 + $0x120] sm:$0xff]  ;;  %v263_v19 = vld [vmem:[%s3999_s11 + $0x128] sm:$0xff] }
  0x1e   : > { %v265_v20 = vld [vmem:[%s3999_s11 + $0x140] sm:$0xff]  ;;  %262 = vst [vmem:[%s4004_s12 + $0x90] sm:$0xff] %v261_v18  ;;  %264 = vst [vmem:[%s4004_s12 + $0x98] sm:$0xff] %v263_v19  ;;  %v267_v21 = vld [vmem:[%s3999_s11 + $0x148] sm:$0xff] }
  0x1f   : > { %266 = vst [vmem:[%s4004_s12 + $0xa0] sm:$0xff] %v265_v20  ;;  %v269_v22 = vld [vmem:[%s3999_s11 + $0x160] sm:$0xff]  ;;  %v271_v23 = vld [vmem:[%s3999_s11 + $0x168] sm:$0xff]  ;;  %268 = vst [vmem:[%s4004_s12 + $0xa8] sm:$0xff] %v267_v21 }
  0x20   : > { %270 = vst [vmem:[%s4004_s12 + $0xb0] sm:$0xff] %v269_v22  ;;  %272 = vst [vmem:[%s4004_s12 + $0xb8] sm:$0xff] %v271_v23  ;;  %v273_v24 = vld [vmem:[%s3999_s11 + $0x180] sm:$0xff]  ;;  %v275_v25 = vld [vmem:[%s3999_s11 + $0x188] sm:$0xff] }
  0x21   : > { %v277_v26 = vld [vmem:[%s3999_s11 + $0x1a0] sm:$0xff]  ;;  %274 = vst [vmem:[%s4004_s12 + $0xc0] sm:$0xff] %v273_v24  ;;  %276 = vst [vmem:[%s4004_s12 + $0xc8] sm:$0xff] %v275_v25  ;;  %v279_v27 = vld [vmem:[%s3999_s11 + $0x1a8] sm:$0xff] }
  0x22   : > { %278 = vst [vmem:[%s4004_s12 + $0xd0] sm:$0xff] %v277_v26  ;;  %v281_v28 = vld [vmem:[%s3999_s11 + $0x1c0] sm:$0xff]  ;;  %v283_v29 = vld [vmem:[%s3999_s11 + $0x1c8] sm:$0xff]  ;;  %280 = vst [vmem:[%s4004_s12 + $0xd8] sm:$0xff] %v279_v27 }
  0x23   : > { %282 = vst [vmem:[%s4004_s12 + $0xe0] sm:$0xff] %v281_v28  ;;  %284 = vst [vmem:[%s4004_s12 + $0xe8] sm:$0xff] %v283_v29  ;;  %v285_v30 = vld [vmem:[%s3999_s11 + $0x1e0] sm:$0xff]  ;;  %v287_v31 = vld [vmem:[%s3999_s11 + $0x1e8] sm:$0xff] }
  0x24   : > { %286 = vst [vmem:[%s4004_s12 + $0xf0] sm:$0xff] %v285_v30  ;;  %288 = vst [vmem:[%s4004_s12 + $0xf8] sm:$0xff] %v287_v31 }
  0x25 PF: > { %p2840_p7 = scmp.ge.s32.totalorder %s3921_s23, 1  ;;  %p293_p8 = scmp.lt.s32.totalorder %s3921_s23, 3 }
  0x27   : > { %p294_p9 = pnand %p2840_p7, %p293_p8 }
  0x29   : > { %297 = sbr.rel (%p294_p9) target bundleno = 1924 (0x784), region = 63 }
  0x30   : > { %v363_v32 = vld [vmem:[%s5899_s1 + $0x8] sm:$0xff]  ;;  %v369_v33 = vld [vmem:[%s5899_s1 + $0x38] sm:$0xff]  ;;  %v362_v37 = vld [vmem:[%s5899_s1] sm:$0xff]  ;;  %s300_s18 = sand.u32 1, %s3913_s21  }
  0x31   : > { %v365_v34 = vld [vmem:[%s5899_s1 + $0x18] sm:$0xff]  ;;  %v3202_v35 = vpack.c.bf16 %v369_v33, %v363_v32  ;;  %v371_v36 = vld [vmem:[%s5899_s1 + $0x48] sm:$0xff]  ;;  %v368_v38 = vld [vmem:[%s5899_s1 + $0x30] sm:$0xff]  ;;  %s4322_s11 = sshll.u32 %s300_s18, 8 }
  0x32   : > { %v3266_v39 = vpack.c.bf16 %v371_v36, %v365_v34  ;;  %v3204_v40 = vpack.c.bf16 %v368_v38, %v362_v37  ;;  %v364_v41 = vld [vmem:[%s5899_s1 + $0x10] sm:$0xff]  ;;  %v370_v42 = vld [vmem:[%s5899_s1 + $0x40] sm:$0xff]  ;;  %v375_v43 = vld [vmem:[%s5899_s1 + $0x68] sm:$0xff]  ;;  %s4367_s30 = scalar_lea.vmem [#allocation2], %s4322_s11 }
  0x33   : > { %3203 = vmatprep.subr.bf16.mxu0 %v3202_v35  ;;  %v3268_v44 = vpack.c.bf16 %v370_v42, %v364_v41  ;;  %v381_v45 = vld [vmem:[%s5899_s1 + $0x98] sm:$0xff]  ;;  %v383_v47 = vld [vmem:[%s5899_s1 + $0xa8] sm:$0xff]  ;;  %v374_v50 = vld [vmem:[%s5899_s1 + $0x60] sm:$0xff] }
  0x34   : > { %v377_v46 = vld [vmem:[%s5899_s1 + $0x78] sm:$0xff]  ;;  %3267 = vmatprep.subr.bf16.mxu1 %v3266_v39  ;;  %3205 = vmatpush1.bf16.msra.mxu0 %v3204_v40  ;;  %v3206_v48 = vpack.c.bf16 %v381_v45, %v375_v43  ;;  %v380_v51 = vld [vmem:[%s5899_s1 + $0x90] sm:$0xff]  ;;  %v382_v54 = vld [vmem:[%s5899_s1 + $0xa0] sm:$0xff] }
  0x35   : > { %v3270_v49 = vpack.c.bf16 %v383_v47, %v377_v46  ;;  %v376_v52 = vld [vmem:[%s5899_s1 + $0x70] sm:$0xff]  ;;  %3269 = vmatpush1.bf16.msra.mxu1 %v3268_v44  ;;  %v3208_v53 = vpack.c.bf16 %v380_v51, %v374_v50  ;;  %v387_v55 = vld [vmem:[%s5899_s1 + $0xc8] sm:$0xff]  ;;  %v393_v56 = vld [vmem:[%s5899_s1 + $0xf8] sm:$0xff] }
  0x36   : > { %3207 = vmatprep.subr.bf16.mxu0 %v3206_v48  ;;  %v3272_v57 = vpack.c.bf16 %v382_v54, %v376_v52  ;;  %v3210_v58 = vpack.c.bf16 %v393_v56, %v387_v55  ;;  %v389_v59 = vld [vmem:[%s5899_s1 + $0xd8] sm:$0xff]  ;;  %v395_v60 = vld [vmem:[%s5899_s1 + $0x108] sm:$0xff]  ;;  %v386_v61 = vld [vmem:[%s5899_s1 + $0xc0] sm:$0xff] }
  0x37   : > { %3271 = vmatprep.subr.bf16.mxu1 %v3270_v49  ;;  %v3274_v62 = vpack.c.bf16 %v395_v60, %v389_v59  ;;  %v392_v63 = vld [vmem:[%s5899_s1 + $0xf0] sm:$0xff]  ;;  %v394_v1 = vld [vmem:[%s5899_s1 + $0x100] sm:$0xff]  ;;  %v399_v3 = vld [vmem:[%s5899_s1 + $0x128] sm:$0xff] }
  0x38   : > { %v388_v0 = vld [vmem:[%s5899_s1 + $0xd0] sm:$0xff]  ;;  %3209 = vmatpush1.bf16.msra.mxu0 %v3208_v53  ;;  %v3212_v2 = vpack.c.bf16 %v392_v63, %v386_v61  ;;  %v405_v4 = vld [vmem:[%s5899_s1 + $0x158] sm:$0xff]  ;;  %v407_v8 = vld [vmem:[%s5899_s1 + $0x168] sm:$0xff] }
  0x39   : > { %v401_v5 = vld [vmem:[%s5899_s1 + $0x138] sm:$0xff]  ;;  %3273 = vmatpush1.bf16.msra.mxu1 %v3272_v57  ;;  %3211 = vmatprep.subr.bf16.mxu0 %v3210_v58  ;;  %v3276_v6 = vpack.c.bf16 %v394_v1, %v388_v0  ;;  %v3214_v7 = vpack.c.bf16 %v405_v4, %v399_v3  ;;  %v398_v9 = vld [vmem:[%s5899_s1 + $0x120] sm:$0xff]  ;;  %v404_v10 = vld [vmem:[%s5899_s1 + $0x150] sm:$0xff] }
  0x3a   : > { %3275 = vmatprep.subr.bf16.mxu1 %v3274_v62  ;;  %v3278_v11 = vpack.c.bf16 %v407_v8, %v401_v5  ;;  %v400_v12 = vld [vmem:[%s5899_s1 + $0x130] sm:$0xff]  ;;  %v406_v13 = vld [vmem:[%s5899_s1 + $0x160] sm:$0xff]  ;;  %v411_v14 = vld [vmem:[%s5899_s1 + $0x188] sm:$0xff]  ;;  %v3216_v18 = vpack.c.bf16 %v404_v10, %v398_v9 }
  0x3b   : > { %v417_v15 = vld [vmem:[%s5899_s1 + $0x1b8] sm:$0xff]  ;;  %v419_v17 = vld [vmem:[%s5899_s1 + $0x1c8] sm:$0xff]  ;;  %v3280_v19 = vpack.c.bf16 %v406_v13, %v400_v12  ;;  %v410_v21 = vld [vmem:[%s5899_s1 + $0x180] sm:$0xff] }
  0x3c   : > { %v413_v16 = vld [vmem:[%s5899_s1 + $0x198] sm:$0xff]  ;;  %3213 = vmatpush1.bf16.msra.mxu0 %v3212_v2  ;;  %v3218_v20 = vpack.c.bf16 %v417_v15, %v411_v14  ;;  %v416_v22 = vld [vmem:[%s5899_s1 + $0x1b0] sm:$0xff]  ;;  %v418_v25 = vld [vmem:[%s5899_s1 + $0x1c0] sm:$0xff] }
  0x3d   : > { %3277 = vmatpush1.bf16.msra.mxu1 %v3276_v6  ;;  %3215 = vmatprep.subr.bf16.mxu0 %v3214_v7  ;;  %v412_v23 = vld [vmem:[%s5899_s1 + $0x190] sm:$0xff]  ;;  %v3282_v24 = vpack.c.bf16 %v419_v17, %v413_v16  ;;  %v423_v26 = vld [vmem:[%s5899_s1 + $0x1e8] sm:$0xff]  ;;  %v429_v27 = vld [vmem:[%s5899_s1 + $0x218] sm:$0xff]  ;;  %v3220_v30 = vpack.c.bf16 %v416_v22, %v410_v21 }
  0x3e   : > { %3279 = vmatprep.subr.bf16.mxu1 %v3278_v11  ;;  %v425_v28 = vld [vmem:[%s5899_s1 + $0x1f8] sm:$0xff]  ;;  %v431_v29 = vld [vmem:[%s5899_s1 + $0x228] sm:$0xff]  ;;  %v3284_v31 = vpack.c.bf16 %v418_v25, %v412_v23  ;;  %v3222_v32 = vpack.c.bf16 %v429_v27, %v423_v26  ;;  %v422_v33 = vld [vmem:[%s5899_s1 + $0x1e0] sm:$0xff] }
  0x3f   : > { %v428_v34 = vld [vmem:[%s5899_s1 + $0x210] sm:$0xff]  ;;  %v3286_v36 = vpack.c.bf16 %v431_v29, %v425_v28  ;;  %v430_v37 = vld [vmem:[%s5899_s1 + $0x220] sm:$0xff]  ;;  %v435_v38 = vld [vmem:[%s5899_s1 + $0x248] sm:$0xff] }
  0x40   : > { %3217 = vmatpush1.bf16.msra.mxu0 %v3216_v18  ;;  %v424_v35 = vld [vmem:[%s5899_s1 + $0x1f0] sm:$0xff]  ;;  %v441_v39 = vld [vmem:[%s5899_s1 + $0x278] sm:$0xff]  ;;  %v443_v41 = vld [vmem:[%s5899_s1 + $0x288] sm:$0xff]  ;;  %v3224_v42 = vpack.c.bf16 %v428_v34, %v422_v33 }
  0x41   : > { %3281 = vmatpush1.bf16.msra.mxu1 %v3280_v19  ;;  %3219 = vmatprep.subr.bf16.mxu0 %v3218_v20  ;;  %v437_v40 = vld [vmem:[%s5899_s1 + $0x258] sm:$0xff]  ;;  %v3288_v43 = vpack.c.bf16 %v430_v37, %v424_v35  ;;  %v3226_v44 = vpack.c.bf16 %v441_v39, %v435_v38  ;;  %v434_v45 = vld [vmem:[%s5899_s1 + $0x240] sm:$0xff]  ;;  %v440_v46 = vld [vmem:[%s5899_s1 + $0x270] sm:$0xff] }
  0x42   : > { %3283 = vmatprep.subr.bf16.mxu1 %v3282_v24  ;;  %v436_v47 = vld [vmem:[%s5899_s1 + $0x250] sm:$0xff]  ;;  %v3290_v48 = vpack.c.bf16 %v443_v41, %v437_v40  ;;  %v442_v49 = vld [vmem:[%s5899_s1 + $0x280] sm:$0xff]  ;;  %v447_v50 = vld [vmem:[%s5899_s1 + $0x2a8] sm:$0xff]  ;;  %v3228_v54 = vpack.c.bf16 %v440_v46, %v434_v45 }
  0x43   : > { %v453_v51 = vld [vmem:[%s5899_s1 + $0x2d8] sm:$0xff]  ;;  %v455_v53 = vld [vmem:[%s5899_s1 + $0x2e8] sm:$0xff]  ;;  %v3292_v55 = vpack.c.bf16 %v442_v49, %v436_v47  ;;  %v446_v57 = vld [vmem:[%s5899_s1 + $0x2a0] sm:$0xff] }
  0x44   : > { %3221 = vmatpush1.bf16.msra.mxu0 %v3220_v30  ;;  %v449_v52 = vld [vmem:[%s5899_s1 + $0x2b8] sm:$0xff]  ;;  %v3230_v56 = vpack.c.bf16 %v453_v51, %v447_v50  ;;  %v452_v58 = vld [vmem:[%s5899_s1 + $0x2d0] sm:$0xff]  ;;  %v454_v61 = vld [vmem:[%s5899_s1 + $0x2e0] sm:$0xff] }
  0x45   : > { %3285 = vmatpush1.bf16.msra.mxu1 %v3284_v31  ;;  %3223 = vmatprep.subr.bf16.mxu0 %v3222_v32  ;;  %v448_v59 = vld [vmem:[%s5899_s1 + $0x2b0] sm:$0xff]  ;;  %v3294_v60 = vpack.c.bf16 %v455_v53, %v449_v52  ;;  %v459_v62 = vld [vmem:[%s5899_s1 + $0x308] sm:$0xff]  ;;  %v465_v63 = vld [vmem:[%s5899_s1 + $0x338] sm:$0xff]  ;;  %v3232_v2 = vpack.c.bf16 %v452_v58, %v446_v57 }
  0x46   : > { %3287 = vmatprep.subr.bf16.mxu1 %v3286_v36  ;;  %v461_v0 = vld [vmem:[%s5899_s1 + $0x318] sm:$0xff]  ;;  %v467_v1 = vld [vmem:[%s5899_s1 + $0x348] sm:$0xff]  ;;  %v3296_v3 = vpack.c.bf16 %v454_v61, %v448_v59  ;;  %v3234_v4 = vpack.c.bf16 %v465_v63, %v459_v62  ;;  %v458_v5 = vld [vmem:[%s5899_s1 + $0x300] sm:$0xff] }
  0x47   : > { %v464_v6 = vld [vmem:[%s5899_s1 + $0x330] sm:$0xff]  ;;  %v3298_v8 = vpack.c.bf16 %v467_v1, %v461_v0  ;;  %v466_v9 = vld [vmem:[%s5899_s1 + $0x340] sm:$0xff]  ;;  %v471_v10 = vld [vmem:[%s5899_s1 + $0x368] sm:$0xff] }
  0x48   : > { %3225 = vmatpush1.bf16.msra.mxu0 %v3224_v42  ;;  %v460_v7 = vld [vmem:[%s5899_s1 + $0x310] sm:$0xff]  ;;  %v477_v11 = vld [vmem:[%s5899_s1 + $0x398] sm:$0xff]  ;;  %v479_v13 = vld [vmem:[%s5899_s1 + $0x3a8] sm:$0xff]  ;;  %v3236_v14 = vpack.c.bf16 %v464_v6, %v458_v5 }
  0x49   : > { %3289 = vmatpush1.bf16.msra.mxu1 %v3288_v43  ;;  %3227 = vmatprep.subr.bf16.mxu0 %v3226_v44  ;;  %v473_v12 = vld [vmem:[%s5899_s1 + $0x378] sm:$0xff]  ;;  %v3300_v15 = vpack.c.bf16 %v466_v9, %v460_v7  ;;  %v3238_v16 = vpack.c.bf16 %v477_v11, %v471_v10  ;;  %v470_v17 = vld [vmem:[%s5899_s1 + $0x360] sm:$0xff]  ;;  %v476_v18 = vld [vmem:[%s5899_s1 + $0x390] sm:$0xff] }
  0x4a   : > { %3291 = vmatprep.subr.bf16.mxu1 %v3290_v48  ;;  %v472_v19 = vld [vmem:[%s5899_s1 + $0x370] sm:$0xff]  ;;  %v3302_v20 = vpack.c.bf16 %v479_v13, %v473_v12  ;;  %v478_v21 = vld [vmem:[%s5899_s1 + $0x3a0] sm:$0xff]  ;;  %v483_v22 = vld [vmem:[%s5899_s1 + $0x3c8] sm:$0xff]  ;;  %v3240_v26 = vpack.c.bf16 %v476_v18, %v470_v17 }
  0x4b   : > { %v489_v23 = vld [vmem:[%s5899_s1 + $0x3f8] sm:$0xff]  ;;  %v491_v25 = vld [vmem:[%s5899_s1 + $0x408] sm:$0xff]  ;;  %v3304_v27 = vpack.c.bf16 %v478_v21, %v472_v19  ;;  %v482_v29 = vld [vmem:[%s5899_s1 + $0x3c0] sm:$0xff] }
  0x4c   : > { %3229 = vmatpush1.bf16.msra.mxu0 %v3228_v54  ;;  %v485_v24 = vld [vmem:[%s5899_s1 + $0x3d8] sm:$0xff]  ;;  %v3242_v28 = vpack.c.bf16 %v489_v23, %v483_v22  ;;  %v488_v30 = vld [vmem:[%s5899_s1 + $0x3f0] sm:$0xff]  ;;  %v490_v33 = vld [vmem:[%s5899_s1 + $0x400] sm:$0xff] }
  0x4d   : > { %3293 = vmatpush1.bf16.msra.mxu1 %v3292_v55  ;;  %3231 = vmatprep.subr.bf16.mxu0 %v3230_v56  ;;  %v484_v31 = vld [vmem:[%s5899_s1 + $0x3d0] sm:$0xff]  ;;  %v3306_v32 = vpack.c.bf16 %v491_v25, %v485_v24  ;;  %v495_v34 = vld [vmem:[%s5899_s1 + $0x428] sm:$0xff]  ;;  %v501_v35 = vld [vmem:[%s5899_s1 + $0x458] sm:$0xff]  ;;  %v3244_v38 = vpack.c.bf16 %v488_v30, %v482_v29 }
  0x4e   : > { %3295 = vmatprep.subr.bf16.mxu1 %v3294_v60  ;;  %v497_v36 = vld [vmem:[%s5899_s1 + $0x438] sm:$0xff]  ;;  %v503_v37 = vld [vmem:[%s5899_s1 + $0x468] sm:$0xff]  ;;  %v494_v39 = vld [vmem:[%s5899_s1 + $0x420] sm:$0xff]  ;;  %v3308_v40 = vpack.c.bf16 %v490_v33, %v484_v31  ;;  %v3246_v41 = vpack.c.bf16 %v501_v35, %v495_v34 }
  0x4f   : > { %v500_v42 = vld [vmem:[%s5899_s1 + $0x450] sm:$0xff]  ;;  %v502_v44 = vld [vmem:[%s5899_s1 + $0x460] sm:$0xff]  ;;  %v3310_v45 = vpack.c.bf16 %v503_v37, %v497_v36  ;;  %v507_v46 = vld [vmem:[%s5899_s1 + $0x488] sm:$0xff] }
  0x50   : > { %3233 = vmatpush1.bf16.msra.mxu0 %v3232_v2  ;;  %v496_v43 = vld [vmem:[%s5899_s1 + $0x430] sm:$0xff]  ;;  %v513_v47 = vld [vmem:[%s5899_s1 + $0x4b8] sm:$0xff]  ;;  %v4370_v48 = vld [vmem:[%s4367_s30 + $0x8] sm:$0xff]  ;;  %v3248_v51 = vpack.c.bf16 %v500_v42, %v494_v39 }
  0x51   : > { %3297 = vmatpush1.bf16.msra.mxu1 %v3296_v3  ;;  %3235 = vmatprep.subr.bf16.mxu0 %v3234_v4  ;;  %v509_v49 = vld [vmem:[%s5899_s1 + $0x498] sm:$0xff]  ;;  %v515_v50 = vld [vmem:[%s5899_s1 + $0x4c8] sm:$0xff]  ;;  %v3312_v52 = vpack.c.bf16 %v502_v44, %v496_v43  ;;  %v3250_v53 = vpack.c.bf16 %v513_v47, %v507_v46  ;;  %v506_v54 = vld [vmem:[%s5899_s1 + $0x480] sm:$0xff] }
  0x52   : > { %3299 = vmatprep.subr.bf16.mxu1 %v3298_v8  ;;  %650 = vmatprep.mubr.f32.mxu0 %v4370_v48  ;;  %v512_v55 = vld [vmem:[%s5899_s1 + $0x4b0] sm:$0xff]  ;;  %v3314_v57 = vpack.c.bf16 %v515_v50, %v509_v49  ;;  %v514_v58 = vld [vmem:[%s5899_s1 + $0x4c0] sm:$0xff]  ;;  %v519_v59 = vld [vmem:[%s5899_s1 + $0x4e8] sm:$0xff] }
  0x53   : > { %811 = vmatprep.mubr.f32.mxu1 %v4370_v48  ;;  %v508_v56 = vld [vmem:[%s5899_s1 + $0x490] sm:$0xff]  ;;  %v525_v60 = vld [vmem:[%s5899_s1 + $0x518] sm:$0xff]  ;;  %v527_v62 = vld [vmem:[%s5899_s1 + $0x528] sm:$0xff]  ;;  %v3252_v63 = vpack.c.bf16 %v512_v55, %v506_v54 }
  0x54   : > { %3237 = vmatpush1.bf16.msra.mxu0 %v3236_v14  ;;  %v521_v61 = vld [vmem:[%s5899_s1 + $0x4f8] sm:$0xff]  ;;  %v3316_v0 = vpack.c.bf16 %v514_v58, %v508_v56  ;;  %v3254_v1 = vpack.c.bf16 %v525_v60, %v519_v59  ;;  %v518_v2 = vld [vmem:[%s5899_s1 + $0x4e0] sm:$0xff]  ;;  %v524_v3 = vld [vmem:[%s5899_s1 + $0x510] sm:$0xff] }
  0x55   : > { %3301 = vmatpush1.bf16.msra.mxu1 %v3300_v15  ;;  %3239 = vmatprep.subr.bf16.mxu0 %v3238_v16  ;;  %v520_v4 = vld [vmem:[%s5899_s1 + $0x4f0] sm:$0xff]  ;;  %v3318_v5 = vpack.c.bf16 %v527_v62, %v521_v61  ;;  %v526_v6 = vld [vmem:[%s5899_s1 + $0x520] sm:$0xff]  ;;  %v531_v7 = vld [vmem:[%s5899_s1 + $0x548] sm:$0xff]  ;;  %v3256_v11 = vpack.c.bf16 %v524_v3, %v518_v2 }
  0x56   : > { %3303 = vmatprep.subr.bf16.mxu1 %v3302_v20  ;;  %v537_v8 = vld [vmem:[%s5899_s1 + $0x578] sm:$0xff]  ;;  %v539_v10 = vld [vmem:[%s5899_s1 + $0x588] sm:$0xff]  ;;  %v3320_v12 = vpack.c.bf16 %v526_v6, %v520_v4  ;;  %v530_v14 = vld [vmem:[%s5899_s1 + $0x540] sm:$0xff] }
  0x57   : > { %v533_v9 = vld [vmem:[%s5899_s1 + $0x558] sm:$0xff]  ;;  %v3258_v13 = vpack.c.bf16 %v537_v8, %v531_v7  ;;  %v536_v15 = vld [vmem:[%s5899_s1 + $0x570] sm:$0xff]  ;;  %v538_v18 = vld [vmem:[%s5899_s1 + $0x580] sm:$0xff] }
  0x58   : > { %3241 = vmatpush1.bf16.msra.mxu0 %v3240_v26  ;;  %v532_v16 = vld [vmem:[%s5899_s1 + $0x550] sm:$0xff]  ;;  %v3322_v17 = vpack.c.bf16 %v539_v10, %v533_v9  ;;  %v543_v19 = vld [vmem:[%s5899_s1 + $0x5a8] sm:$0xff]  ;;  %v549_v20 = vld [vmem:[%s5899_s1 + $0x5d8] sm:$0xff]  ;;  %v3260_v23 = vpack.c.bf16 %v536_v15, %v530_v14 }
  0x59   : > { %3305 = vmatpush1.bf16.msra.mxu1 %v3304_v27  ;;  %3243 = vmatprep.subr.bf16.mxu0 %v3242_v28  ;;  %v545_v21 = vld [vmem:[%s5899_s1 + $0x5b8] sm:$0xff]  ;;  %v551_v22 = vld [vmem:[%s5899_s1 + $0x5e8] sm:$0xff]  ;;  %v3324_v24 = vpack.c.bf16 %v538_v18, %v532_v16  ;;  %v3262_v25 = vpack.c.bf16 %v549_v20, %v543_v19  ;;  %v542_v26 = vld [vmem:[%s5899_s1 + $0x5a0] sm:$0xff] }
  0x5a   : > { %3307 = vmatprep.subr.bf16.mxu1 %v3306_v32  ;;  %v548_v27 = vld [vmem:[%s5899_s1 + $0x5d0] sm:$0xff]  ;;  %v3326_v29 = vpack.c.bf16 %v551_v22, %v545_v21  ;;  %v550_v30 = vld [vmem:[%s5899_s1 + $0x5e0] sm:$0xff]  ;;  %v367_v31 = vld [vmem:[%s5899_s1 + $0x28] sm:$0xff] }
  0x5b   : > { %v544_v28 = vld [vmem:[%s5899_s1 + $0x5b0] sm:$0xff]  ;;  %v373_v32 = vld [vmem:[%s5899_s1 + $0x58] sm:$0xff]  ;;  %v3264_v33 = vpack.c.bf16 %v548_v27, %v542_v26  ;;  %v366_v36 = vld [vmem:[%s5899_s1 + $0x20] sm:$0xff] }
  0x5c   : > { %3245 = vmatpush1.bf16.msra.mxu0 %v3244_v38  ;;  %v3328_v34 = vpack.c.bf16 %v550_v30, %v544_v28  ;;  %v3330_v35 = vpack.c.bf16 %v373_v32, %v367_v31  ;;  %v372_v37 = vld [vmem:[%s5899_s1 + $0x50] sm:$0xff]  ;;  %v379_v38 = vld [vmem:[%s5899_s1 + $0x88] sm:$0xff]  ;;  %v385_v39 = vld [vmem:[%s5899_s1 + $0xb8] sm:$0xff] }
  0x5d   : > { %3309 = vmatpush1.bf16.msra.mxu1 %v3308_v40  ;;  %3247 = vmatprep.subr.bf16.mxu0 %v3246_v41  ;;  %v4483_v40 = vld [vmem:[%s4367_s30] sm:$0xff]  ;;  %v3332_v41 = vpack.c.bf16 %v372_v37, %v366_v36  ;;  %v384_v43 = vld [vmem:[%s5899_s1 + $0xb0] sm:$0xff]  ;;  %v4492_v44 = vld [vmem:[%s4367_s30 + $0x18] sm:$0xff] }
  0x5e   : > { %3311 = vmatprep.subr.bf16.mxu1 %v3310_v45  ;;  %v378_v42 = vld [vmem:[%s5899_s1 + $0x80] sm:$0xff]  ;;  %v3334_v45 = vpack.c.bf16 %v385_v39, %v379_v38  ;;  %v391_v46 = vld [vmem:[%s5899_s1 + $0xe8] sm:$0xff]  ;;  %v397_v47 = vld [vmem:[%s5899_s1 + $0x118] sm:$0xff] }
  0x5f   : > { %v4503_v49 = vld [vmem:[%s4367_s30 + $0x10] sm:$0xff]  ;;  %v3336_v50 = vpack.c.bf16 %v384_v43, %v378_v42  ;;  %v3338_v54 = vpack.c.bf16 %v397_v47, %v391_v46  ;;  %v403_v55 = vld [vmem:[%s5899_s1 + $0x148] sm:$0xff]  ;;  %v409_v56 = vld [vmem:[%s5899_s1 + $0x178] sm:$0xff] }
  0x60   : > { %3249 = vmatpush1.bf16.msra.mxu0 %v3248_v51  ;;  %v390_v51 = vld [vmem:[%s5899_s1 + $0xe0] sm:$0xff]  ;;  %v408_v60 = vld [vmem:[%s5899_s1 + $0x170] sm:$0xff]  ;;  %v4536_v61 = vld [vmem:[%s4367_s30 + $0x38] sm:$0xff]  ;;  %v3342_v62 = vpack.c.bf16 %v409_v56, %v403_v55 }
  0x61   : > { %3313 = vmatpush1.bf16.msra.mxu1 %v3312_v52  ;;  %3251 = vmatprep.subr.bf16.mxu0 %v3250_v53  ;;  %v396_v52 = vld [vmem:[%s5899_s1 + $0x110] sm:$0xff]  ;;  %v4514_v53 = vld [vmem:[%s4367_s30 + $0x28] sm:$0xff]  ;;  %v402_v59 = vld [vmem:[%s5899_s1 + $0x140] sm:$0xff] }
  0x62   : > { %3315 = vmatprep.subr.bf16.mxu1 %v3314_v57  ;;  %v4525_v57 = vld [vmem:[%s4367_s30 + $0x20] sm:$0xff]  ;;  %v3340_v58 = vpack.c.bf16 %v396_v52, %v390_v51  ;;  %v3344_v2 = vpack.c.bf16 %v408_v60, %v402_v59  ;;  %v420_v4 = vld [vmem:[%s5899_s1 + $0x1d0] sm:$0xff]  ;;  %v427_v7 = vld [vmem:[%s5899_s1 + $0x208] sm:$0xff] }
  0x63   : > { %v414_v3 = vld [vmem:[%s5899_s1 + $0x1a0] sm:$0xff]  ;;  %v433_v8 = vld [vmem:[%s5899_s1 + $0x238] sm:$0xff]  ;;  %v439_v15 = vld [vmem:[%s5899_s1 + $0x268] sm:$0xff] }
  0x64   : > { %3253 = vmatpush1.bf16.msra.mxu0 %v3252_v63  ;;  %v415_v63 = vld [vmem:[%s5899_s1 + $0x1a8] sm:$0xff]  ;;  %v4569_v9 = vld [vmem:[%s4367_s30 + $0x40] sm:$0xff]  ;;  %v3348_v10 = vpack.c.bf16 %v420_v4, %v414_v3  ;;  %v3350_v14 = vpack.c.bf16 %v433_v8, %v427_v7  ;;  %v445_v16 = vld [vmem:[%s5899_s1 + $0x298] sm:$0xff] }
  0x65   : > { %3317 = vmatpush1.bf16.msra.mxu1 %v3316_v0  ;;  %3255 = vmatprep.subr.bf16.mxu0 %v3254_v1  ;;  %v421_v0 = vld [vmem:[%s5899_s1 + $0x1d8] sm:$0xff]  ;;  %v4547_v1 = vld [vmem:[%s4367_s30 + $0x30] sm:$0xff]  ;;  %v438_v19 = vld [vmem:[%s5899_s1 + $0x260] sm:$0xff]  ;;  %v3354_v22 = vpack.c.bf16 %v445_v16, %v439_v15 }
  0x66   : > { %3319 = vmatprep.subr.bf16.mxu1 %v3318_v5  ;;  %v4558_v5 = vld [vmem:[%s4367_s30 + $0x48] sm:$0xff]  ;;  %v3346_v6 = vpack.c.bf16 %v421_v0, %v415_v63  ;;  %v444_v20 = vld [vmem:[%s5899_s1 + $0x290] sm:$0xff]  ;;  %v450_v27 = vld [vmem:[%s5899_s1 + $0x2c0] sm:$0xff] }
  0x67   : > { %v4602_v21 = vld [vmem:[%s4367_s30 + $0x68] sm:$0xff]  ;;  %v3356_v26 = vpack.c.bf16 %v444_v20, %v438_v19  ;;  %v456_v28 = vld [vmem:[%s5899_s1 + $0x2f0] sm:$0xff]  ;;  %v469_v32 = vld [vmem:[%s5899_s1 + $0x358] sm:$0xff] }
  0x68   : > { %3257 = vmatpush1.bf16.msra.mxu0 %v3256_v11  ;;  %v426_v11 = vld [vmem:[%s5899_s1 + $0x200] sm:$0xff]  ;;  %v463_v31 = vld [vmem:[%s5899_s1 + $0x328] sm:$0xff]  ;;  %v468_v36 = vld [vmem:[%s5899_s1 + $0x350] sm:$0xff] }
  0x69   : > { %3321 = vmatpush1.bf16.msra.mxu1 %v3320_v12  ;;  %3259 = vmatprep.subr.bf16.mxu0 %v3258_v13  ;;  %v432_v12 = vld [vmem:[%s5899_s1 + $0x230] sm:$0xff]  ;;  %v4580_v13 = vld [vmem:[%s4367_s30 + $0x58] sm:$0xff]  ;;  %v4646_v37 = vld [vmem:[%s4367_s30 + $0x88] sm:$0xff]  ;;  %v3362_v38 = vpack.c.bf16 %v469_v32, %v463_v31 }
  0x6a   : > { %3323 = vmatprep.subr.bf16.mxu1 %v3322_v17  ;;  %v4591_v17 = vld [vmem:[%s4367_s30 + $0x50] sm:$0xff]  ;;  %v3352_v18 = vpack.c.bf16 %v432_v12, %v426_v11  ;;  %v475_v39 = vld [vmem:[%s5899_s1 + $0x388] sm:$0xff]  ;;  %v4657_v42 = vld [vmem:[%s4367_s30 + $0x80] sm:$0xff] }
  0x6b   : > { %v480_v46 = vld [vmem:[%s5899_s1 + $0x3b0] sm:$0xff]  ;;  %v4668_v47 = vld [vmem:[%s4367_s30 + $0x98] sm:$0xff]  ;;  %v487_v51 = vld [vmem:[%s5899_s1 + $0x3e8] sm:$0xff] }
  0x6c   : > { %3261 = vmatpush1.bf16.msra.mxu0 %v3260_v23  ;;  %v451_v23 = vld [vmem:[%s5899_s1 + $0x2c8] sm:$0xff]  ;;  %v493_v52 = vld [vmem:[%s5899_s1 + $0x418] sm:$0xff]  ;;  %v486_v56 = vld [vmem:[%s5899_s1 + $0x3e0] sm:$0xff] }
  0x6d   : > { %3325 = vmatpush1.bf16.msra.mxu1 %v3324_v24  ;;  %3263 = vmatprep.subr.bf16.mxu0 %v3262_v25  ;;  %v457_v24 = vld [vmem:[%s5899_s1 + $0x2f8] sm:$0xff]  ;;  %v4613_v25 = vld [vmem:[%s4367_s30 + $0x60] sm:$0xff]  ;;  %v4690_v59 = vld [vmem:[%s4367_s30 + $0xa8] sm:$0xff]  ;;  %v3370_v60 = vpack.c.bf16 %v493_v52, %v487_v51 }
  0x6e   : > { %3327 = vmatprep.subr.bf16.mxu1 %v3326_v29  ;;  %v4624_v29 = vld [vmem:[%s4367_s30 + $0x78] sm:$0xff]  ;;  %v3358_v30 = vpack.c.bf16 %v457_v24, %v451_v23  ;;  %v4701_v0 = vld [vmem:[%s4367_s30 + $0xa0] sm:$0xff]  ;;  %v504_v4 = vld [vmem:[%s5899_s1 + $0x470] sm:$0xff] }
  0x6f   : > { %v505_v63 = vld [vmem:[%s5899_s1 + $0x478] sm:$0xff]  ;;  %v498_v3 = vld [vmem:[%s5899_s1 + $0x440] sm:$0xff]  ;;  %v511_v8 = vld [vmem:[%s5899_s1 + $0x4a8] sm:$0xff] }
  0x70   : > { %3265 = vmatpush1.bf16.msra.mxu0 %v3264_v33  ;;  %v4635_v33 = vld [vmem:[%s4367_s30 + $0x70] sm:$0xff]  ;;  %v3376_v12 = vpack.c.bf16 %v504_v4, %v498_v3  ;;  %v4734_v16 = vld [vmem:[%s4367_s30 + $0xc8] sm:$0xff]  ;;  %v529_v20 = vld [vmem:[%s5899_s1 + $0x538] sm:$0xff] }
  0x71   : > { %3329 = vmatpush1.bf16.msra.mxu1 %v3328_v34  ;;  %3331 = vmatprep.subr.bf16.mxu0 %v3330_v35  ;;  %v3360_v34 = vpack.c.bf16 %v456_v28, %v450_v27  ;;  %v462_v35 = vld [vmem:[%s5899_s1 + $0x320] sm:$0xff]  ;;  %v4723_v11 = vld [vmem:[%s4367_s30 + $0xb0] sm:$0xff]  ;;  %v523_v19 = vld [vmem:[%s5899_s1 + $0x508] sm:$0xff] }
  0x72   : > { %v3364_v43 = vpack.c.bf16 %v468_v36, %v462_v35  ;;  %v516_v15 = vld [vmem:[%s5899_s1 + $0x4d0] sm:$0xff]  ;;  %v522_v24 = vld [vmem:[%s5899_s1 + $0x500] sm:$0xff]  ;;  %v4756_v27 = vld [vmem:[%s4367_s30 + $0xd8] sm:$0xff]  ;;  %v3382_v28 = vpack.c.bf16 %v529_v20, %v523_v19 }
  0x73   : > { %651 = vmatmul.mubr.f32.vlgmr.msra.gmra.mrb[0].mxu0 %v4483_v40  ;;  %v541_v31 = vld [vmem:[%s5899_s1 + $0x598] sm:$0xff]  ;;  %v356_v32 = vld [vmem:[%s4367_s30 + $0xd0] sm:$0xff]  ;;  %v534_v35 = vld [vmem:[%s5899_s1 + $0x560] sm:$0xff] }
  0x74   : > { %812 = vmatmul.mubr.f32.vlgmr.msra.gmra.mrb[0].mxu1 %v4483_v40  ;;  %3333 = vmatpush1.bf16.msra.mxu0 %v3332_v41  ;;  %v481_v41 = vld [vmem:[%s5899_s1 + $0x3b8] sm:$0xff]  ;;  %v540_v36 = vld [vmem:[%s5899_s1 + $0x590] sm:$0xff] }
  0x75   : > { %656 = vmatprep.mubr.f32.mxu0 %v4492_v44  ;;  %817 = vmatprep.mubr.f32.mxu1 %v4492_v44  ;;  %v552_v51 = vld [vmem:[%s5899_s1 + $0x5f0] sm:$0xff]  ;;  %v361_v52 = vld [vmem:[%s4367_s30 + $0xf8] sm:$0xff] }
  0x76   : > { %3335 = vmatprep.subr.bf16.mxu0 %v3334_v45  ;;  %v474_v45 = vld [vmem:[%s5899_s1 + $0x380] sm:$0xff] }
  0x77   : > { %657 = vmatmul.mubr.f32.gmra.mrb[2].mxu0 %v4503_v49  ;;  %v3368_v55 = vpack.c.bf16 %v480_v46, %v474_v45  ;;  %v358_v45 = vld [vmem:[%s4367_s30 + $0xe0] sm:$0xff]  ;;  %v3388_v46 = vpack.c.bf16 %v540_v36, %v534_v35 }
  0x78   : > { %818 = vmatmul.mubr.f32.gmra.mrb[2].mxu1 %v4503_v49  ;;  %3337 = vmatpush1.bf16.msra.mxu0 %v3336_v50  ;;  %v3366_v50 = vpack.c.bf16 %v481_v41, %v475_v39  ;;  %v547_v41 = vld [vmem:[%s5899_s1 + $0x5c8] sm:$0xff] }
  0x79   : > { %662 = vmatprep.mubr.f32.mxu0 %v4514_v53  ;;  %823 = vmatprep.mubr.f32.mxu1 %v4514_v53 }
  0x7a   : > { %3339 = vmatprep.subr.bf16.mxu0 %v3338_v54  ;;  %v4679_v54 = vld [vmem:[%s4367_s30 + $0x90] sm:$0xff] }
  0x7b   : > { %663 = vmatmul.mubr.f32.gmra.mrb[4].mxu0 %v4525_v57 }
  0x7c   : > { %824 = vmatmul.mubr.f32.gmra.mrb[4].mxu1 %v4525_v57  ;;  %3341 = vmatpush1.bf16.msra.mxu0 %v3340_v58  ;;  %v492_v58 = vld [vmem:[%s5899_s1 + $0x410] sm:$0xff] }
  0x7d   : > { %668 = vmatprep.mubr.f32.mxu0 %v4536_v61  ;;  %829 = vmatprep.mubr.f32.mxu1 %v4536_v61 }
  0x7e   : > { %3343 = vmatprep.subr.bf16.mxu0 %v3342_v62  ;;  %v499_v62 = vld [vmem:[%s5899_s1 + $0x448] sm:$0xff] }
  0x7f   : > { %669 = vmatmul.mubr.f32.gmra.mrb[6].mxu0 %v4547_v1  ;;  %v3374_v7 = vpack.c.bf16 %v505_v63, %v499_v62 }
  0x80   : > { %830 = vmatmul.mubr.f32.gmra.mrb[6].mxu1 %v4547_v1  ;;  %3345 = vmatpush1.bf16.msra.mxu0 %v3344_v2  ;;  %v3372_v2 = vpack.c.bf16 %v492_v58, %v486_v56  ;;  %v360_v56 = vld [vmem:[%s4367_s30 + $0xf0] sm:$0xff] }
  0x81   : > { %674 = vmatprep.mubr.f32.mxu0 %v4558_v5  ;;  %835 = vmatprep.mubr.f32.mxu1 %v4558_v5 }
  0x82   : > { %3347 = vmatprep.subr.bf16.mxu0 %v3346_v6  ;;  %v4712_v6 = vld [vmem:[%s4367_s30 + $0xb8] sm:$0xff] }
  0x83   : > { %675 = vmatmul.mubr.f32.gmra.mrb[8].mxu0 %v4569_v9 }
  0x84   : > { %836 = vmatmul.mubr.f32.gmra.mrb[8].mxu1 %v4569_v9  ;;  %3349 = vmatpush1.bf16.msra.mxu0 %v3348_v10  ;;  %v517_v10 = vld [vmem:[%s5899_s1 + $0x4d8] sm:$0xff] }
  0x85   : > { %680 = vmatprep.mubr.f32.mxu0 %v4580_v13  ;;  %841 = vmatprep.mubr.f32.mxu1 %v4580_v13 }
  0x86   : > { %3351 = vmatprep.subr.bf16.mxu0 %v3350_v14  ;;  %v510_v14 = vld [vmem:[%s5899_s1 + $0x4a0] sm:$0xff] }
  0x87   : > { %681 = vmatmul.mubr.f32.gmra.mrb[10].mxu0 %v4591_v17  ;;  %v3380_v23 = vpack.c.bf16 %v516_v15, %v510_v14 }
  0x88   : > { %842 = vmatmul.mubr.f32.gmra.mrb[10].mxu1 %v4591_v17  ;;  %3353 = vmatpush1.bf16.msra.mxu0 %v3352_v18  ;;  %v3378_v18 = vpack.c.bf16 %v517_v10, %v511_v8 }
  0x89   : > { %686 = vmatprep.mubr.f32.mxu0 %v4602_v21  ;;  %847 = vmatprep.mubr.f32.mxu1 %v4602_v21 }
  0x8a   : > { %3355 = vmatprep.subr.bf16.mxu0 %v3354_v22  ;;  %v4745_v22 = vld [vmem:[%s4367_s30 + $0xc0] sm:$0xff] }
  0x8b   : > { %687 = vmatmul.mubr.f32.gmra.mrb[12].mxu0 %v4613_v25 }
  0x8c   : > { %848 = vmatmul.mubr.f32.gmra.mrb[12].mxu1 %v4613_v25  ;;  %3357 = vmatpush1.bf16.msra.mxu0 %v3356_v26  ;;  %v528_v26 = vld [vmem:[%s5899_s1 + $0x530] sm:$0xff] }
  0x8d   : > { %692 = vmatprep.mubr.f32.mxu0 %v4624_v29  ;;  %853 = vmatprep.mubr.f32.mxu1 %v4624_v29 }
  0x8e   : > { %3359 = vmatprep.subr.bf16.mxu0 %v3358_v30  ;;  %v535_v30 = vld [vmem:[%s5899_s1 + $0x568] sm:$0xff] }
  0x8f   : > { %693 = vmatmul.mubr.f32.gmra.mrb[14].mxu0 %v4635_v33  ;;  %v3386_v39 = vpack.c.bf16 %v541_v31, %v535_v30 }
  0x90   : > { %854 = vmatmul.mubr.f32.gmra.mrb[14].mxu1 %v4635_v33  ;;  %3361 = vmatpush1.bf16.msra.mxu0 %v3360_v34  ;;  %v3384_v34 = vpack.c.bf16 %v528_v26, %v522_v24 }
  0x91   : > { %698 = vmatprep.mubr.f32.mxu0 %v4646_v37  ;;  %859 = vmatprep.mubr.f32.mxu1 %v4646_v37 }
  0x92   : > { %3363 = vmatprep.subr.bf16.mxu0 %v3362_v38  ;;  %v359_v38 = vld [vmem:[%s4367_s30 + $0xe8] sm:$0xff] }
  0x93   : > { %699 = vmatmul.mubr.f32.gmra.mrb[16].mxu0 %v4657_v42 }
  0x94   : > { %860 = vmatmul.mubr.f32.gmra.mrb[16].mxu1 %v4657_v42  ;;  %3365 = vmatpush1.bf16.msra.mxu0 %v3364_v43  ;;  %v553_v43 = vld [vmem:[%s5899_s1 + $0x5f8] sm:$0xff] }
  0x95   : > { %704 = vmatprep.mubr.f32.mxu0 %v4668_v47  ;;  %865 = vmatprep.mubr.f32.mxu1 %v4668_v47 }
  0x96   : > { %3367 = vmatprep.subr.bf16.mxu0 %v3366_v50  ;;  %v546_v50 = vld [vmem:[%s5899_s1 + $0x5c0] sm:$0xff] }
  0x97   : > { %705 = vmatmul.mubr.f32.gmra.mrb[18].mxu0 %v4679_v54  ;;  %v3392_v58 = vpack.c.bf16 %v552_v51, %v546_v50 }
  0x98   : > { %866 = vmatmul.mubr.f32.gmra.mrb[18].mxu1 %v4679_v54  ;;  %3369 = vmatpush1.bf16.msra.mxu0 %v3368_v55  ;;  %v3390_v55 = vpack.c.bf16 %v553_v43, %v547_v41 }
  0x99   : > { %710 = vmatprep.mubr.f32.mxu0 %v4690_v59  ;;  %871 = vmatprep.mubr.f32.mxu1 %v4690_v59 }
  0x9a   : > { %3371 = vmatprep.subr.bf16.mxu0 %v3370_v60 }
  0x9b   : > { %711 = vmatmul.mubr.f32.gmra.mrb[20].mxu0 %v4701_v0 }
  0x9c   : > { %872 = vmatmul.mubr.f32.gmra.mrb[20].mxu1 %v4701_v0  ;;  %3373 = vmatpush1.bf16.msra.mxu0 %v3372_v2 }
  0x9d   : > { %716 = vmatprep.mubr.f32.mxu0 %v4712_v6  ;;  %877 = vmatprep.mubr.f32.mxu1 %v4712_v6 }
  0x9e   : > { %3375 = vmatprep.subr.bf16.mxu0 %v3374_v7 }
  0x9f   : > { %717 = vmatmul.mubr.f32.gmra.mrb[22].mxu0 %v4723_v11 }
  0xa0   : > { %878 = vmatmul.mubr.f32.gmra.mrb[22].mxu1 %v4723_v11  ;;  %3377 = vmatpush1.bf16.msra.mxu0 %v3376_v12 }
  0xa1   : > { %722 = vmatprep.mubr.f32.mxu0 %v4734_v16  ;;  %883 = vmatprep.mubr.f32.mxu1 %v4734_v16 }
  0xa2   : > { %3379 = vmatprep.subr.bf16.mxu0 %v3378_v18 }
  0xa3   : > { %723 = vmatmul.mubr.f32.gmra.mrb[24].mxu0 %v4745_v22 }
  0xa4   : > { %884 = vmatmul.mubr.f32.gmra.mrb[24].mxu1 %v4745_v22  ;;  %3381 = vmatpush1.bf16.msra.mxu0 %v3380_v23 }
  0xa5   : > { %728 = vmatprep.mubr.f32.mxu0 %v4756_v27  ;;  %889 = vmatprep.mubr.f32.mxu1 %v4756_v27 }
  0xa6   : > { %3383 = vmatprep.subr.bf16.mxu0 %v3382_v28 }
  0xa7   : > { %729 = vmatmul.mubr.f32.gmra.mrb[26].mxu0 %v356_v32 }
  0xa8   : > { %890 = vmatmul.mubr.f32.gmra.mrb[26].mxu1 %v356_v32  ;;  %3385 = vmatpush1.bf16.msra.mxu0 %v3384_v34 }
  0xa9   : > { %734 = vmatprep.mubr.f32.mxu0 %v359_v38  ;;  %895 = vmatprep.mubr.f32.mxu1 %v359_v38 }
  0xaa   : > { %3387 = vmatprep.subr.bf16.mxu0 %v3386_v39 }
  0xab   : > { %735 = vmatmul.mubr.f32.gmra.mrb[28].mxu0 %v358_v45 }
  0xac   : > { %896 = vmatmul.mubr.f32.gmra.mrb[28].mxu1 %v358_v45  ;;  %3389 = vmatpush1.bf16.msra.mxu0 %v3388_v46 }
  0xad   : > { %740 = vmatprep.mubr.f32.mxu0 %v361_v52  ;;  %901 = vmatprep.mubr.f32.mxu1 %v361_v52 }
  0xae   : > { %3391 = vmatprep.subr.bf16.mxu0 %v3390_v55 }
  0xaf   : > { %741 = vmatmul.mubr.f32.gmra.mrb[30].mxu0 %v360_v56 }
  0xb0   : > { %902 = vmatmul.mubr.f32.gmra.mrb[30].mxu1 %v360_v56  ;;  %3393 = vmatpush1.bf16.msra.mxu0 %v3392_v58 }
  0xb1   : > { %972 = vmatprep.mubr.f32.mxu0 %v4370_v48  ;;  %v556_v48 = vlaneseq }
  0xb3   : > { %973 = vmatmul.mubr.f32.vlgmr.msra.gmra.mrb[32].mxu0 %v4483_v40  ;;  %v4818_v40 = vshrl.u32 %v556_v48, 7 }
  0xb4   : > { %978 = vmatprep.mubr.f32.mxu0 %v4492_v44 }
  0xb5   : > { %5912 = vst [vmem:[#allocation4_spill] sm:$0xff] %v4818_v40  ;;  %v5905_v44 = vsub.s32 0, %v4818_v40 }
  0xb7   : > { %979 = vmatmul.mubr.f32.gmra.mrb[34].mxu0 %v4503_v49  ;;  %v4824_v49 = vld [vmem:[%s5900_s2] sm:$0x3f] }
  0xb8   : > { %984 = vmatprep.mubr.f32.mxu0 %v4514_v53  ;;  %v4829_v53 = vrot.slane %v4824_v49, %v5905_v44 }
  0xbb   : > { %985 = vmatmul.mubr.f32.gmra.mrb[36].mxu0 %v4525_v57  ;;  %v566_v57 = vsub.s32 2, %v4818_v40 }
  0xbc   : > { %990 = vmatprep.mubr.f32.mxu0 %v4536_v61  ;;  %v570_v61 = vsub.s32 3, %v4818_v40 }
  0xbf   : > { %991 = vmatmul.mubr.f32.gmra.mrb[38].mxu0 %v4547_v1 }
  0xc0   : > { %996 = vmatprep.mubr.f32.mxu0 %v4558_v5 }
  0xc3   : > { %997 = vmatmul.mubr.f32.gmra.mrb[40].mxu0 %v4569_v9 }
  0xc4   : > { %1002 = vmatprep.mubr.f32.mxu0 %v4580_v13 }
  0xc7   : > { %1003 = vmatmul.mubr.f32.gmra.mrb[42].mxu0 %v4591_v17  ;;  %v4837_v17 = vrot.slane %v4824_v49, %v566_v57 }
  0xc8   : > { %1008 = vmatprep.mubr.f32.mxu0 %v4602_v21 }
  0xcb   : > { %1009 = vmatmul.mubr.f32.gmra.mrb[44].mxu0 %v4613_v25  ;;  %v4840_v25 = vrot.slane %v4824_v49, %v570_v61 }
  0xcc   : > { %1014 = vmatprep.mubr.f32.mxu0 %v4624_v29 }
  0xcf   : > { %1015 = vmatmul.mubr.f32.gmra.mrb[46].mxu0 %v4635_v33 }
  0xd0   : > { %1020 = vmatprep.mubr.f32.mxu0 %v4646_v37 }
  0xd3   : > { %1021 = vmatmul.mubr.f32.gmra.mrb[48].mxu0 %v4657_v42 }
  0xd4   : > { %1026 = vmatprep.mubr.f32.mxu0 %v4668_v47 }
  0xd7   : > { %1027 = vmatmul.mubr.f32.gmra.mrb[50].mxu0 %v4679_v54 }
  0xd8   : > { %1032 = vmatprep.mubr.f32.mxu0 %v4690_v59 }
  0xdb   : > { %1033 = vmatmul.mubr.f32.gmra.mrb[52].mxu0 %v4701_v0 }
  0xdc   : > { %1038 = vmatprep.mubr.f32.mxu0 %v4712_v6 }
  0xdf   : > { %1039 = vmatmul.mubr.f32.gmra.mrb[54].mxu0 %v4723_v11 }
  0xe0   : > { %1044 = vmatprep.mubr.f32.mxu0 %v4734_v16 }
  0xe3   : > { %1045 = vmatmul.mubr.f32.gmra.mrb[56].mxu0 %v4745_v22 }
  0xe4   : > { %1050 = vmatprep.mubr.f32.mxu0 %v4756_v27 }
  0xe7   : > { %1051 = vmatmul.mubr.f32.gmra.mrb[58].mxu0 %v356_v32 }
  0xe8   : > { %1056 = vmatprep.mubr.f32.mxu0 %v359_v38 }
  0xeb   : > { %1057 = vmatmul.mubr.f32.gmra.mrb[60].mxu0 %v358_v45 }
  0xec   : > { %1062 = vmatprep.mubr.f32.mxu0 %v361_v52 }
  0xef   : > { %1063 = vmatmul.mubr.f32.gmra.mrb[62].mxu0 %v360_v56 }
 0x146   : > { %v652_v1 = vpop.f32.mrb[0].mxu0 }
 0x147   : > { %v813_v5 = vpop.f32.mrb[0].mxu1  ;;  %v653_v9 = vadd.f32 %v652_v1, %v4829_v53  ;;  %v4834_v13 = vpop.f32.mrb[1].mxu0 }
 0x148   : > { %v815_v21 = vpop.f32.mrb[1].mxu1  ;;  %v814_v47 = vadd.f32 %v813_v5, %v4837_v17 }
 0x149   : > { %3010 = vmatprep.mubr.f32.mxu1 %v653_v9  ;;  %v816_v60 = vadd.f32 %v815_v21, %v4840_v25 }
 0x14a   : > { %v658_v29 = vpop.f32.mrb[2].mxu0 }
 0x14b   : > { %v819_v33 = vpop.f32.mrb[2].mxu1  ;;  %v4843_v37 = vadd.f32 %v658_v29, %v4829_v53  ;;  %v4845_v42 = vpop.f32.mrb[3].mxu0 }
 0x14c   : > { %v820_v54 = vadd.f32 %v819_v33, %v4837_v17  ;;  %v821_v59 = vpop.f32.mrb[3].mxu1 }
 0x14d   : > { %v822_v62 = vadd.f32 %v821_v59, %v4840_v25 }
 0x14e   : > { %v3394_v63 = vpack.c.bf16 %v820_v54, %v814_v47  ;;  %v664_v0 = vpop.f32.mrb[4].mxu0 }
 0x14f   : > { %v4851_v2 = vpack.c.bf16 %v822_v62, %v816_v60  ;;  %v825_v3 = vpop.f32.mrb[4].mxu1  ;;  %v4854_v4 = vadd.f32 %v664_v0, %v4829_v53  ;;  %v4856_v6 = vpop.f32.mrb[5].mxu0 }
 0x150   : > { %v827_v7 = vpop.f32.mrb[5].mxu1  ;;  %3395 = vmatprep.subr.bf16.mxu1 %v3394_v63  ;;  %v826_v15 = vadd.f32 %v825_v3, %v4837_v17 }
 0x151   : > { %v828_v8 = vadd.f32 %v827_v7, %v4840_v25  ;;  %3397 = vmatpush3.bf16.xpose.msra.mxu1 %v3394_v63 }
 0x152   : > { %v670_v10 = vpop.f32.mrb[6].mxu0 }
 0x153   : > { %v831_v11 = vpop.f32.mrb[6].mxu1  ;;  %v4860_v12 = vadd.f32 %v670_v10, %v4829_v53  ;;  %v4862_v14 = vpop.f32.mrb[7].mxu0 }
 0x154   : > { %v832_v16 = vadd.f32 %v831_v11, %v4837_v17  ;;  %v833_v18 = vpop.f32.mrb[7].mxu1 }
 0x155   : > { %v834_v19 = vadd.f32 %v833_v18, %v4840_v25 }
 0x156   : > { %v3398_v20 = vpack.c.bf16 %v832_v16, %v826_v15  ;;  %v676_v22 = vpop.f32.mrb[8].mxu0 }
 0x157   : > { %v4867_v23 = vpack.c.bf16 %v834_v19, %v828_v8  ;;  %v837_v24 = vpop.f32.mrb[8].mxu1  ;;  %v4870_v26 = vadd.f32 %v676_v22, %v4829_v53  ;;  %v4872_v27 = vpop.f32.mrb[9].mxu0 }
 0x158   : > { %v839_v28 = vpop.f32.mrb[9].mxu1  ;;  %3399 = vmatprep.subr.bf16.mxu1 %v3398_v20  ;;  %v838_v36 = vadd.f32 %v837_v24, %v4837_v17 }
 0x159   : > { %v840_v30 = vadd.f32 %v839_v28, %v4840_v25  ;;  %3401 = vmatpush3.bf16.xpose.msra.mxu1 %v3398_v20 }
 0x15a   : > { %v682_v31 = vpop.f32.mrb[10].mxu0 }
 0x15b   : > { %v843_v32 = vpop.f32.mrb[10].mxu1  ;;  %v4876_v34 = vadd.f32 %v682_v31, %v4829_v53  ;;  %v4878_v35 = vpop.f32.mrb[11].mxu0 }
 0x15c   : > { %v844_v38 = vadd.f32 %v843_v32, %v4837_v17  ;;  %v845_v39 = vpop.f32.mrb[11].mxu1 }
 0x15d   : > { %v846_v41 = vadd.f32 %v845_v39, %v4840_v25 }
 0x15e   : > { %v3402_v43 = vpack.c.bf16 %v844_v38, %v838_v36  ;;  %v688_v45 = vpop.f32.mrb[12].mxu0 }
 0x15f   : > { %v4883_v46 = vpack.c.bf16 %v846_v41, %v840_v30  ;;  %v849_v50 = vpop.f32.mrb[12].mxu1  ;;  %v4886_v51 = vadd.f32 %v688_v45, %v4829_v53  ;;  %v4888_v52 = vpop.f32.mrb[13].mxu0 }
 0x160   : > { %v851_v55 = vpop.f32.mrb[13].mxu1  ;;  %3403 = vmatprep.subr.bf16.mxu1 %v3402_v43  ;;  %v850_v1 = vadd.f32 %v849_v50, %v4837_v17 }
 0x161   : > { %v852_v56 = vadd.f32 %v851_v55, %v4840_v25  ;;  %3405 = vmatpush3.bf16.xpose.msra.mxu1 %v3402_v43 }
 0x162   : > { %v694_v58 = vpop.f32.mrb[14].mxu0 }
 0x163   : > { %v855_v48 = vpop.f32.mrb[14].mxu1  ;;  %v4892_v57 = vadd.f32 %v694_v58, %v4829_v53  ;;  %v4894_v61 = vpop.f32.mrb[15].mxu0 }
 0x164   : > { %v856_v5 = vadd.f32 %v855_v48, %v4837_v17  ;;  %v857_v9 = vpop.f32.mrb[15].mxu1 }
 0x165   : > { %v858_v21 = vadd.f32 %v857_v9, %v4840_v25 }
 0x166   : > { %v3406_v29 = vpack.c.bf16 %v856_v5, %v850_v1  ;;  %v700_v33 = vpop.f32.mrb[16].mxu0 }
 0x167   : > { %v4899_v47 = vpack.c.bf16 %v858_v21, %v852_v56  ;;  %v861_v54 = vpop.f32.mrb[16].mxu1  ;;  %v4902_v59 = vadd.f32 %v700_v33, %v4829_v53  ;;  %v4904_v60 = vpop.f32.mrb[17].mxu0 }
 0x168   : > { %v863_v62 = vpop.f32.mrb[17].mxu1  ;;  %3407 = vmatprep.subr.bf16.mxu1 %v3406_v29  ;;  %v862_v10 = vadd.f32 %v861_v54, %v4837_v17 }
 0x169   : > { %v864_v63 = vadd.f32 %v863_v62, %v4840_v25  ;;  %3409 = vmatpush3.bf16.xpose.msra.mxu1 %v3406_v29 }
 0x16a   : > { %v706_v0 = vpop.f32.mrb[18].mxu0 }
 0x16b   : > { %v867_v3 = vpop.f32.mrb[18].mxu1  ;;  %v4908_v7 = vadd.f32 %v706_v0, %v4829_v53  ;;  %v4910_v8 = vpop.f32.mrb[19].mxu0 }
 0x16c   : > { %v868_v11 = vadd.f32 %v867_v3, %v4837_v17  ;;  %v869_v15 = vpop.f32.mrb[19].mxu1 }
 0x16d   : > { %v870_v16 = vadd.f32 %v869_v15, %v4840_v25  ;;  %v5906_v15 = vsub.s32 1, %v4818_v40 }
 0x16e   : > { %v3410_v18 = vpack.c.bf16 %v868_v11, %v862_v10  ;;  %v712_v19 = vpop.f32.mrb[20].mxu0 }
 0x16f   : > { %v4915_v20 = vpack.c.bf16 %v870_v16, %v864_v63  ;;  %v873_v22 = vpop.f32.mrb[20].mxu1  ;;  %v4918_v24 = vadd.f32 %v712_v19, %v4829_v53  ;;  %v4920_v28 = vpop.f32.mrb[21].mxu0 }
 0x170   : > { %v875_v30 = vpop.f32.mrb[21].mxu1  ;;  %3411 = vmatprep.subr.bf16.mxu1 %v3410_v18  ;;  %v874_v41 = vadd.f32 %v873_v22, %v4837_v17 }
 0x171   : > { %v876_v31 = vadd.f32 %v875_v30, %v4840_v25  ;;  %3413 = vmatpush3.bf16.xpose.msra.mxu1 %v3410_v18 }
 0x172   : > { %v718_v32 = vpop.f32.mrb[22].mxu0 }
 0x173   : > { %v879_v36 = vpop.f32.mrb[22].mxu1  ;;  %v4924_v38 = vadd.f32 %v718_v32, %v4829_v53  ;;  %v4926_v39 = vpop.f32.mrb[23].mxu0 }
 0x174   : > { %v880_v43 = vadd.f32 %v879_v36, %v4837_v17  ;;  %v881_v45 = vpop.f32.mrb[23].mxu1  ;;  %v574_v36 = vsub.s32 4, %v4818_v40 }
 0x175   : > { %v882_v50 = vadd.f32 %v881_v45, %v4840_v25  ;;  %v578_v45 = vsub.s32 5, %v4818_v40 }
 0x176   : > { %v3414_v55 = vpack.c.bf16 %v880_v43, %v874_v41  ;;  %v724_v56 = vpop.f32.mrb[24].mxu0  ;;  %v4960_v41 = vrot.slane %v4824_v49, %v5906_v15 }
 0x177   : > { %v4931_v58 = vpack.c.bf16 %v882_v50, %v876_v31  ;;  %v885_v48 = vpop.f32.mrb[24].mxu1  ;;  %v4934_v1 = vadd.f32 %v724_v56, %v4829_v53  ;;  %v4936_v5 = vpop.f32.mrb[25].mxu0 }
 0x178   : > { %v887_v9 = vpop.f32.mrb[25].mxu1  ;;  %3415 = vmatprep.subr.bf16.mxu1 %v3414_v55  ;;  %v886_v63 = vadd.f32 %v885_v48, %v4837_v17 }
 0x179   : > { %v888_v21 = vadd.f32 %v887_v9, %v4840_v25  ;;  %3417 = vmatpush3.bf16.xpose.msra.mxu1 %v3414_v55 }
 0x17a   : > { %v730_v29 = vpop.f32.mrb[26].mxu0 }
 0x17b   : > { %v891_v33 = vpop.f32.mrb[26].mxu1  ;;  %v4940_v54 = vadd.f32 %v730_v29, %v4829_v53  ;;  %v4942_v62 = vpop.f32.mrb[27].mxu0 }
 0x17c   : > { %v892_v0 = vadd.f32 %v891_v33, %v4837_v17  ;;  %v893_v3 = vpop.f32.mrb[27].mxu1 }
 0x17d   : > { %v894_v10 = vadd.f32 %v893_v3, %v4840_v25 }
 0x17e   : > { %v3418_v11 = vpack.c.bf16 %v892_v0, %v886_v63  ;;  %v736_v16 = vpop.f32.mrb[28].mxu0  ;;  %v4973_v63 = vrot.slane %v4824_v49, %v574_v36 }
 0x17f   : > { %v4948_v18 = vpack.c.bf16 %v894_v10, %v888_v21  ;;  %v897_v19 = vpop.f32.mrb[28].mxu1  ;;  %v4951_v22 = vadd.f32 %v736_v16, %v4829_v53  ;;  %v4953_v30 = vpop.f32.mrb[29].mxu0  ;;  %v4976_v10 = vrot.slane %v4824_v49, %v578_v45 }
 0x180   : > { %v899_v31 = vpop.f32.mrb[29].mxu1  ;;  %3419 = vmatprep.subr.bf16.mxu1 %v3418_v11  ;;  %v898_v48 = vadd.f32 %v897_v19, %v4837_v17 }
 0x181   : > { %v900_v32 = vadd.f32 %v899_v31, %v4840_v25  ;;  %3421 = vmatpush3.bf16.xpose.msra.mxu1 %v3418_v11 }
 0x182   : > { %v742_v43 = vpop.f32.mrb[30].mxu0 }
 0x183   : > { %v903_v50 = vpop.f32.mrb[30].mxu1  ;;  %v4964_v55 = vadd.f32 %v742_v43, %v4829_v53  ;;  %v744_v56 = vpop.f32.mrb[31].mxu0 }
 0x184   : > { %v904_v9 = vadd.f32 %v903_v50, %v4837_v17  ;;  %v905_v21 = vpop.f32.mrb[31].mxu1  ;;  %v4969_v29 = vadd.f32 %v744_v56, %v4960_v41 }
 0x185   : > { %v906_v33 = vadd.f32 %v905_v21, %v4840_v25 }
 0x186   : > { %v3422_v0 = vpack.c.bf16 %v904_v9, %v898_v48  ;;  %v974_v3 = vpop.f32.mrb[32].mxu0 }
 0x187   : > { %v4978_v53 = vpack.c.bf16 %v906_v33, %v900_v32  ;;  %v976_v11 = vpop.f32.mrb[33].mxu0  ;;  %v975_v17 = vadd.f32 %v974_v3, %v4973_v63 }
 0x188   : > { %3423 = vmatprep.subr.bf16.mxu1 %v3422_v0  ;;  %v977_v16 = vadd.f32 %v976_v11, %v4976_v10 }
 0x189   : > { %3425 = vmatpush3.bf16.xpose.msra.mxu1 %v3422_v0 }
 0x18a   : > { %v980_v19 = vpop.f32.mrb[34].mxu0 }
 0x18b   : > { %v981_v25 = vadd.f32 %v980_v19, %v4973_v63  ;;  %v982_v31 = vpop.f32.mrb[35].mxu0 }
 0x18c   : > { %v983_v36 = vadd.f32 %v982_v31, %v4976_v10 }
 0x18d   : > { %v3426_v43 = vpack.c.bf16 %v981_v25, %v975_v17 }
 0x18e   : > { %v4984_v50 = vpack.c.bf16 %v983_v36, %v977_v16  ;;  %v986_v49 = vpop.f32.mrb[36].mxu0 }
 0x18f   : > { %v988_v45 = vpop.f32.mrb[37].mxu0  ;;  %3427 = vmatprep.subr.bf16.mxu1 %v3426_v43  ;;  %v987_v32 = vadd.f32 %v986_v49, %v4973_v63 }
 0x190   : > { %3011 = vmatmul.mubr.f32.vlgmr.msra.gmra.mrb[32].mxu1 %v4843_v37  ;;  %v989_v56 = vadd.f32 %v988_v45, %v4976_v10 }
 0x191   : > { %3013 = vmatprep.mubr.f32.mxu1 %v4854_v4  ;;  %3429 = vmatpush3.bf16.msra.mxu1 %v3426_v43 }
 0x192   : > { %v992_v48 = vpop.f32.mrb[38].mxu0 }
 0x193   : > { %v993_v9 = vadd.f32 %v992_v48, %v4973_v63  ;;  %v994_v21 = vpop.f32.mrb[39].mxu0 }
 0x194   : > { %3014 = vmatmul.mubr.f32.gmra.mrb[34].mxu1 %v4860_v12  ;;  %v995_v33 = vadd.f32 %v994_v21, %v4976_v10 }
 0x195   : > { %3016 = vmatprep.mubr.f32.mxu1 %v4870_v26  ;;  %v3430_v0 = vpack.c.bf16 %v993_v9, %v987_v32 }
 0x196   : > { %v4994_v3 = vpack.c.bf16 %v995_v33, %v989_v56  ;;  %v998_v37 = vpop.f32.mrb[40].mxu0 }
 0x197   : > { %v1000_v4 = vpop.f32.mrb[41].mxu0  ;;  %3431 = vmatprep.subr.bf16.mxu1 %v3430_v0  ;;  %v999_v11 = vadd.f32 %v998_v37, %v4973_v63 }
 0x198   : > { %3017 = vmatmul.mubr.f32.gmra.mrb[36].mxu1 %v4876_v34  ;;  %v1001_v17 = vadd.f32 %v1000_v4, %v4976_v10 }
 0x199   : > { %3019 = vmatprep.mubr.f32.mxu1 %v4886_v51  ;;  %3433 = vmatpush3.bf16.msra.mxu1 %v3430_v0 }
 0x19a   : > { %v1004_v12 = vpop.f32.mrb[42].mxu0 }
 0x19b   : > { %v1005_v16 = vadd.f32 %v1004_v12, %v4973_v63  ;;  %v1006_v19 = vpop.f32.mrb[43].mxu0 }
 0x19c   : > { %3020 = vmatmul.mubr.f32.gmra.mrb[38].mxu1 %v4892_v57  ;;  %v1007_v26 = vadd.f32 %v1006_v19, %v4976_v10 }
 0x19d   : > { %3022 = vmatprep.mubr.f32.mxu1 %v4902_v59  ;;  %v3434_v25 = vpack.c.bf16 %v1005_v16, %v999_v11 }
 0x19e   : > { %v5004_v31 = vpack.c.bf16 %v1007_v26, %v1001_v17  ;;  %v1010_v34 = vpop.f32.mrb[44].mxu0 }
 0x19f   : > { %v1012_v51 = vpop.f32.mrb[45].mxu0  ;;  %3435 = vmatprep.subr.bf16.mxu1 %v3434_v25  ;;  %v1011_v36 = vadd.f32 %v1010_v34, %v4973_v63 }
 0x1a0   : > { %3023 = vmatmul.mubr.f32.gmra.mrb[40].mxu1 %v4908_v7  ;;  %v1013_v43 = vadd.f32 %v1012_v51, %v4976_v10 }
 0x1a1   : > { %3025 = vmatprep.mubr.f32.mxu1 %v4918_v24  ;;  %3437 = vmatpush3.bf16.msra.mxu1 %v3434_v25 }
 0x1a2   : > { %v1016_v57 = vpop.f32.mrb[46].mxu0 }
 0x1a3   : > { %v1017_v49 = vadd.f32 %v1016_v57, %v4973_v63  ;;  %v1018_v45 = vpop.f32.mrb[47].mxu0 }
 0x1a4   : > { %3026 = vmatmul.mubr.f32.gmra.mrb[42].mxu1 %v4924_v38  ;;  %v1019_v59 = vadd.f32 %v1018_v45, %v4976_v10 }
 0x1a5   : > { %3028 = vmatprep.mubr.f32.mxu1 %v4934_v1  ;;  %v3438_v32 = vpack.c.bf16 %v1017_v49, %v1011_v36 }
 0x1a6   : > { %v5014_v56 = vpack.c.bf16 %v1019_v59, %v1013_v43  ;;  %v1022_v7 = vpop.f32.mrb[48].mxu0 }
 0x1a7   : > { %v1024_v24 = vpop.f32.mrb[49].mxu0  ;;  %3439 = vmatprep.subr.bf16.mxu1 %v3438_v32  ;;  %v1023_v48 = vadd.f32 %v1022_v7, %v4973_v63 }
 0x1a8   : > { %3029 = vmatmul.mubr.f32.gmra.mrb[44].mxu1 %v4940_v54  ;;  %v1025_v9 = vadd.f32 %v1024_v24, %v4976_v10 }
 0x1a9   : > { %3031 = vmatprep.mubr.f32.mxu1 %v4951_v22  ;;  %3441 = vmatpush3.bf16.msra.mxu1 %v3438_v32 }
 0x1aa   : > { %v1028_v38 = vpop.f32.mrb[50].mxu0 }
 0x1ab   : > { %v1029_v21 = vadd.f32 %v1028_v38, %v4973_v63  ;;  %v1030_v33 = vpop.f32.mrb[51].mxu0 }
 0x1ac   : > { %3032 = vmatmul.mubr.f32.gmra.mrb[46].mxu1 %v4964_v55  ;;  %v1031_v1 = vadd.f32 %v1030_v33, %v4976_v10  ;;  %v1548_v33 = vld [vmem:[%s5901_s3 + $0x8] sm:$0xff] }
 0x1ad   : > { %v3442_v0 = vpack.c.bf16 %v1029_v21, %v1023_v48 }
 0x1ae   : > { %v5023_v37 = vpack.c.bf16 %v1031_v1, %v1025_v9  ;;  %v1034_v4 = vpop.f32.mrb[52].mxu0  ;;  %v1550_v1 = vld [vmem:[%s5901_s3 + $0x18] sm:$0xff] }
 0x1af   : > { %v1036_v54 = vpop.f32.mrb[53].mxu0  ;;  %3443 = vmatprep.subr.bf16.mxu1 %v3442_v0  ;;  %v1035_v22 = vadd.f32 %v1034_v4, %v4973_v63  ;;  %v3458_v4 = vpack.c.bf16 %v1550_v1, %v1548_v33  ;;  %v1563_v33 = vld [vmem:[%s5901_s3 + $0x80] sm:$0xff]  ;;  %v1565_v1 = vld [vmem:[%s5901_s3 + $0x90] sm:$0xff] }
 0x1b0   : > { %3445 = vmatpush3.bf16.msra.mxu1 %v3442_v0  ;;  %v1037_v11 = vadd.f32 %v1036_v54, %v4976_v10  ;;  %v1547_v0 = vld [vmem:[%s5901_s3] sm:$0xff]  ;;  %v1552_v54 = vld [vmem:[%s5901_s3 + $0x28] sm:$0xff] }
 0x1b1   : > { %3459 = vmatprep.subr.bf16.mxu0 %v3458_v4  ;;  %v1570_v4 = vld [vmem:[%s5901_s3 + $0xb8] sm:$0xff] }
 0x1b2   : > { %v1040_v17 = vpop.f32.mrb[54].mxu0 }
 0x1b3   : > { %v1041_v12 = vadd.f32 %v1040_v17, %v4973_v63  ;;  %v1042_v16 = vpop.f32.mrb[55].mxu0 }
 0x1b4   : > { %v1043_v19 = vadd.f32 %v1042_v16, %v4976_v10  ;;  %v1553_v16 = vld [vmem:[%s5901_s3 + $0x30] sm:$0xff] }
 0x1b5   : > { %v3446_v55 = vpack.c.bf16 %v1041_v12, %v1035_v22  ;;  %v1554_v22 = vld [vmem:[%s5901_s3 + $0x38] sm:$0xff]  ;;  %v1551_v12 = vld [vmem:[%s5901_s3 + $0x20] sm:$0xff] }
 0x1b6   : > { %v5029_v26 = vpack.c.bf16 %v1043_v19, %v1037_v11  ;;  %v1046_v25 = vpop.f32.mrb[56].mxu0  ;;  %v3462_v17 = vpack.c.bf16 %v1554_v22, %v1552_v54  ;;  %v1556_v19 = vld [vmem:[%s5901_s3 + $0x48] sm:$0xff]  ;;  %v1567_v22 = vld [vmem:[%s5901_s3 + $0xa0] sm:$0xff] }
 0x1b7   : > { %v1048_v34 = vpop.f32.mrb[57].mxu0  ;;  %3447 = vmatprep.subr.bf16.mxu1 %v3446_v55  ;;  %v1047_v51 = vadd.f32 %v1046_v25, %v4973_v63  ;;  %v3464_v25 = vpack.c.bf16 %v1553_v16, %v1551_v12  ;;  %v1574_v12 = vld [vmem:[%s5901_s3 + $0xd8] sm:$0xff] }
 0x1b8   : > { %3449 = vmatpush3.bf16.msra.mxu1 %v3446_v55  ;;  %v1049_v36 = vadd.f32 %v1048_v34, %v4976_v10  ;;  %v1558_v55 = vld [vmem:[%s5901_s3 + $0x58] sm:$0xff] }
 0x1b9   : > { %v3466_v34 = vpack.c.bf16 %v1558_v55, %v1556_v19  ;;  %v1571_v55 = vld [vmem:[%s5901_s3 + $0xc0] sm:$0xff] }
 0x1ba   : > { %v1052_v43 = vpop.f32.mrb[58].mxu0 }
 0x1bb   : > { %v1053_v57 = vadd.f32 %v1052_v43, %v4973_v63  ;;  %v1054_v49 = vpop.f32.mrb[59].mxu0  ;;  %v1560_v43 = vld [vmem:[%s5901_s3 + $0x68] sm:$0xff] }
 0x1bc   : > { %v1055_v45 = vadd.f32 %v1054_v49, %v4976_v10 }
 0x1bd   : > { %v3450_v59 = vpack.c.bf16 %v1053_v57, %v1047_v51  ;;  %v1555_v51 = vld [vmem:[%s5901_s3 + $0x40] sm:$0xff]  ;;  %v1562_v57 = vld [vmem:[%s5901_s3 + $0x78] sm:$0xff] }
 0x1be   : > { %v5035_v32 = vpack.c.bf16 %v1055_v45, %v1049_v36  ;;  %v1058_v7 = vpop.f32.mrb[60].mxu0  ;;  %v1557_v36 = vld [vmem:[%s5901_s3 + $0x50] sm:$0xff]  ;;  %v3470_v45 = vpack.c.bf16 %v1562_v57, %v1560_v43  ;;  %v1575_v57 = vld [vmem:[%s5901_s3 + $0xe0] sm:$0xff] }
 0x1bf   : > { %v5037_v24 = vpop.f32.mrb[61].mxu0  ;;  %3451 = vmatprep.subr.bf16.mxu1 %v3450_v59  ;;  %v1059_v48 = vadd.f32 %v1058_v7, %v4973_v63  ;;  %v3468_v49 = vpack.c.bf16 %v1557_v36, %v1555_v51  ;;  %v1561_v7 = vld [vmem:[%s5901_s3 + $0x70] sm:$0xff]  ;;  %v1578_v51 = vld [vmem:[%s5901_s3 + $0xf8] sm:$0xff] }
 0x1c0   : > { %5913 = vst [vmem:[#allocation5_spill] sm:$0xff] %v5035_v32  ;;  %3453 = vmatpush3.bf16.msra.mxu1 %v3450_v59  ;;  %v1559_v59 = vld [vmem:[%s5901_s3 + $0x60] sm:$0xff] }
 0x1c2   : > { %v1064_v9 = vpop.f32.mrb[62].mxu0 }
 0x1c3   : > { %v1065_v38 = vadd.f32 %v1064_v9, %v4973_v63  ;;  %v1549_v63 = vld [vmem:[%s5901_s3 + $0x10] sm:$0xff]  ;;  %v1566_v9 = vld [vmem:[%s5901_s3 + $0x98] sm:$0xff] }
 0x1c4   : > { %v3460_v11 = vpack.c.bf16 %v1549_v63, %v1547_v0  ;;  %v1568_v0 = vld [vmem:[%s5901_s3 + $0xa8] sm:$0xff]  ;;  %v3476_v63 = vpack.c.bf16 %v1565_v1, %v1563_v33 }
 0x1c5   : > { %v3454_v21 = vpack.c.bf16 %v1065_v38, %v1059_v48  ;;  %v1564_v48 = vld [vmem:[%s5901_s3 + $0x88] sm:$0xff]  ;;  %v3472_v38 = vpack.c.bf16 %v1561_v7, %v1559_v59  ;;  %v3478_v54 = vpack.c.bf16 %v1570_v4, %v1568_v0  ;;  %v1061_v0 = vadd.f32 %v5037_v24, %v4976_v10 }
 0x1c6   : > { %3461 = vmatpush1.bf16.msra.mxu0 %v3460_v11  ;;  %v1569_v11 = vld [vmem:[%s5901_s3 + $0xb0] sm:$0xff] }
 0x1c7   : > { %3455 = vmatprep.subr.bf16.mxu1 %v3454_v21  ;;  %3463 = vmatprep.subr.bf16.mxu0 %v3462_v17  ;;  %v1572_v17 = vld [vmem:[%s5901_s3 + $0xc8] sm:$0xff]  ;;  %v3480_v16 = vpack.c.bf16 %v1569_v11, %v1567_v22 }
 0x1c8   : > { %3457 = vmatpush3.bf16.msra.mxu1 %v3454_v21  ;;  %v3474_v21 = vpack.c.bf16 %v1566_v9, %v1564_v48  ;;  %v3482_v19 = vpack.c.bf16 %v1574_v12, %v1572_v17 }
 0x1c9   : > { %3491 = vmatprep.subr.bf16.mxu1 %v4851_v2 }
 0x1ca   : > { %3465 = vmatpush1.bf16.msra.mxu0 %v3464_v25  ;;  %v1573_v25 = vld [vmem:[%s5901_s3 + $0xd0] sm:$0xff] }
 0x1cb   : > { %3467 = vmatprep.subr.bf16.mxu0 %v3466_v34  ;;  %v1576_v34 = vld [vmem:[%s5901_s3 + $0xe8] sm:$0xff]  ;;  %v3484_v36 = vpack.c.bf16 %v1573_v25, %v1571_v55 }
 0x1cc   : > { %v3486_v43 = vpack.c.bf16 %v1578_v51, %v1576_v34 }
 0x1ce   : > { %3469 = vmatpush1.bf16.msra.mxu0 %v3468_v49  ;;  %v1577_v49 = vld [vmem:[%s5901_s3 + $0xf0] sm:$0xff] }
 0x1cf   : > { %3471 = vmatprep.subr.bf16.mxu0 %v3470_v45  ;;  %v3488_v45 = vpack.c.bf16 %v1577_v49, %v1575_v57 }
 0x1d2   : > { %3473 = vmatpush1.bf16.msra.mxu0 %v3472_v38 }
 0x1d3   : > { %3475 = vmatprep.subr.bf16.mxu0 %v3474_v21 }
 0x1d6   : > { %3477 = vmatpush1.bf16.msra.mxu0 %v3476_v63  ;;  %v1066_v63 = vpop.f32.mrb[63].mxu0 }
 0x1d7   : > { %3479 = vmatprep.subr.bf16.mxu0 %v3478_v54  ;;  %v1067_v22 = vadd.f32 %v1066_v63, %v4976_v10 }
 0x1d9   : > { %v5144_v11 = vpack.c.bf16 %v1067_v22, %v1061_v0 }
 0x1da   : > { %3481 = vmatpush1.bf16.msra.mxu0 %v3480_v16 }
 0x1db   : > { %3483 = vmatprep.subr.bf16.mxu0 %v3482_v19  ;;  %5914 = vst [vmem:[#allocation6_spill] sm:$0xff] %v5144_v11 }
 0x1de   : > { %3485 = vmatpush1.bf16.msra.mxu0 %v3484_v36 }
 0x1df   : > { %3487 = vmatprep.subr.bf16.mxu0 %v3486_v43 }
 0x1e2   : > { %3489 = vmatpush1.bf16.msra.mxu0 %v3488_v45 }
 0x1e3   : > { %3523 = vmatprep.subr.bf16.mxu0 %v4984_v50 }
 0x263   : > { %v3012_v59 = vpop.f32.mrb[32].mxu1 }
 0x264   : > { %v1179_v7 = vpop.f32.mrb[33].mxu1 }
 0x265   : > { %1258 = vmax.xlane.f32.xlu0 %v1179_v7 }
 0x267   : > { %v3015_v48 = vpop.f32.mrb[34].mxu1 }
 0x268   : > { %v1189_v9 = vpop.f32.mrb[35].mxu1 }
 0x269   : > { %1260 = vmax.xlane.f32.xlu0 %v3012_v59  ;;  %1262 = vmax.xlane.f32.xlu1 %v1189_v9 }
 0x26b   : > { %v3018_v38 = vpop.f32.mrb[36].mxu1 }
 0x26c   : > { %v1199_v21 = vpop.f32.mrb[37].mxu1 }
 0x26d   : > { %1264 = vmax.xlane.f32.xlu1 %v3015_v48  ;;  %1266 = vmax.xlane.f32.xlu0 %v1199_v21 }
 0x26f   : > { %v3021_v33 = vpop.f32.mrb[38].mxu1 }
 0x270   : > { %v1209_v1 = vpop.f32.mrb[39].mxu1 }
 0x271   : > { %1268 = vmax.xlane.f32.xlu1 %v3018_v38  ;;  %1270 = vmax.xlane.f32.xlu0 %v1209_v1 }
 0x273   : > { %v5141_v4 = vpop.f32.mrb[40].mxu1 }
 0x274   : > { %v1219_v54 = vpop.f32.mrb[41].mxu1 }
 0x275   : > { %1272 = vmax.xlane.f32.xlu1 %v3021_v33  ;;  %1274 = vmax.xlane.f32.xlu0 %v1219_v54 }
 0x277   : > { %v5146_v17 = vpop.f32.mrb[42].mxu1 }
 0x278   : > { %v5148_v12 = vpop.f32.mrb[43].mxu1 }
 0x279   : > { %1276 = vmax.xlane.f32.xlu1 %v5141_v4  ;;  %1278 = vmax.xlane.f32.xlu0 %v5148_v12 }
 0x27b   : > { %v5152_v16 = vpop.f32.mrb[44].mxu1 }
 0x27c   : > { %v5154_v24 = vpop.f32.mrb[45].mxu1 }
 0x27d   : > { %1280 = vmax.xlane.f32.xlu1 %v5146_v17  ;;  %1282 = vmax.xlane.f32.xlu0 %v5154_v24 }
 0x27f   : > { %v5158_v10 = vpop.f32.mrb[46].mxu1 }
 0x280   : > { %v5160_v19 = vpop.f32.mrb[47].mxu1 }
 0x281   : > { %1284 = vmax.xlane.f32.xlu1 %v5152_v16  ;;  %1286 = vmax.xlane.f32.xlu0 %v5160_v19 }
 0x285   : > { %1288 = vmax.xlane.f32.xlu1 %v5158_v10 }
 0x2f2   : > { %v1259_v55 = vpop.xlane.xlu0 %1258 }
 0x2f3   : > { %v1290_v25 = vsub.f32 %v1179_v7, %v1259_v55 }
 0x2f5   : > { %v1306_v34 = vmul.f32 1.442695, %v1290_v25 }
 0x2f6   : > { %v1261_v51 = vpop.xlane.xlu0 %1260  ;;  %v1263_v36 = vpop.xlane.xlu1 %1262 }
 0x2f7   : > { %3739 = vpow2.f32 %v1306_v34  ;;  %v1291_v43 = vsub.f32 %v3012_v59, %v1261_v51  ;;  %v1292_v57 = vsub.f32 %v1189_v9, %v1263_v36 }
 0x2f9   : > { %v1308_v49 = vmul.f32 1.442695, %v1291_v43  ;;  %v1310_v45 = vmul.f32 1.442695, %v1292_v57 }
 0x2fa   : > { %v1265_v0 = vpop.xlane.xlu1 %1264  ;;  %v1267_v63 = vpop.xlane.xlu0 %1266 }
 0x2fb   : > { %3741 = vpow2.f32 %v1308_v49  ;;  %v1293_v22 = vsub.f32 %v3015_v48, %v1265_v0  ;;  %v1294_v44 = vsub.f32 %v1199_v21, %v1267_v63 }
 0x2fc   : > { %3743 = vpow2.f32 %v1310_v45 }
 0x2fd   : > { %v1312_v15 = vmul.f32 1.442695, %v1293_v22  ;;  %v1314_v40 = vmul.f32 1.442695, %v1294_v44 }
 0x2fe   : > { %v1269_v11 = vpop.xlane.xlu1 %1268  ;;  %v1271_v32 = vpop.xlane.xlu0 %1270 }
 0x2ff   : > { %3745 = vpow2.f32 %v1312_v15  ;;  %v1295_v7 = vsub.f32 %v3018_v38, %v1269_v11  ;;  %v1296_v55 = vsub.f32 %v1209_v1, %v1271_v32 }
 0x300   : > { %3747 = vpow2.f32 %v1314_v40 }
 0x301   : > { %v3740_v25 = vpop.eup %3739  ;;  %v1316_v34 = vmul.f32 1.442695, %v1295_v7  ;;  %v1318_v59 = vmul.f32 1.442695, %v1296_v55 }
 0x302   : > { %3066 = vmatprep.mubr.f32.mxu1 %v3740_v25  ;;  %v1273_v9 = vpop.xlane.xlu1 %1272  ;;  %v1275_v51 = vpop.xlane.xlu0 %1274  ;;  %1338 = vadd.xlane.f32.xlu0 %v3740_v25 }
 0x303   : > { %3749 = vpow2.f32 %v1316_v34  ;;  %v1297_v36 = vsub.f32 %v3021_v33, %v1273_v9  ;;  %v1298_v48 = vsub.f32 %v1219_v54, %v1275_v51 }
 0x304   : > { %3751 = vpow2.f32 %v1318_v59 }
 0x305   : > { %v3742_v21 = vpop.eup %3741  ;;  %v1320_v43 = vmul.f32 1.442695, %v1297_v36  ;;  %v1322_v44 = vmul.f32 1.442695, %v1298_v48 }
 0x306   : > { %v3744_v57 = vpop.eup %3743  ;;  %3067 = vmatmul.mubr.f32.vlgmr.msra.gmra.mrb[48].mxu1 %v3742_v21  ;;  %v1277_v15 = vpop.xlane.xlu1 %1276  ;;  %1340 = vadd.xlane.f32.xlu1 %v3742_v21 }
 0x307   : > { %v1279_v38 = vpop.xlane.xlu0 %1278  ;;  %3753 = vpow2.f32 %v1320_v43  ;;  %3493 = vmatpush3.bf16.xpose.msra.mxu1 %v4851_v2  ;;  %v1299_v40 = vsub.f32 %v5141_v4, %v1277_v15  ;;  %1342 = vadd.xlane.f32.xlu0 %v3744_v57 }
 0x308   : > { %v1300_v32 = vsub.f32 %v5148_v12, %v1279_v38  ;;  %3755 = vpow2.f32 %v1322_v44  ;;  %3069 = vmatprep.mubr.f32.mxu1 %v3744_v57  ;;  %3495 = vmatprep.subr.bf16.mxu1 %v4867_v23  ;;  %v655_v44 = vadd.f32 %v4834_v13, %v4960_v41  ;;  %v661_v13 = vadd.f32 %v4845_v42, %v4960_v41 }
 0x309   : > { %v3746_v33 = vpop.eup %3745  ;;  %v1324_v1 = vmul.f32 1.442695, %v1299_v40  ;;  %v697_v42 = vadd.f32 %v4894_v61, %v4960_v41  ;;  %v733_v61 = vadd.f32 %v4942_v62, %v4960_v41 }
 0x30a   : > { %v1326_v54 = vmul.f32 1.442695, %v1300_v32  ;;  %v3748_v11 = vpop.eup %3747  ;;  %3070 = vmatmul.mubr.f32.gmra.mrb[50].mxu1 %v3746_v33  ;;  %v1281_v49 = vpop.xlane.xlu1 %1280  ;;  %1344 = vadd.xlane.f32.xlu1 %v3746_v33 }
 0x30b   : > { %v1283_v45 = vpop.xlane.xlu0 %1282  ;;  %3757 = vpow2.f32 %v1324_v1  ;;  %v1301_v2 = vsub.f32 %v5146_v17, %v1281_v49  ;;  %1346 = vadd.xlane.f32.xlu0 %v3748_v11  ;;  %3072 = vmatprep.mubr.f32.mxu1 %v3748_v11 }
 0x30c   : > { %v1302_v4 = vsub.f32 %v5154_v24, %v1283_v45  ;;  %3759 = vpow2.f32 %v1326_v54 }
 0x30d   : > { %v3750_v12 = vpop.eup %3749  ;;  %v1328_v0 = vmul.f32 1.442695, %v1301_v2 }
 0x30e   : > { %v1330_v63 = vmul.f32 1.442695, %v1302_v4  ;;  %v3752_v22 = vpop.eup %3751  ;;  %3073 = vmatmul.mubr.f32.gmra.mrb[52].mxu1 %v3750_v12  ;;  %v1285_v7 = vpop.xlane.xlu1 %1284  ;;  %1348 = vadd.xlane.f32.xlu1 %v3750_v12 }
 0x30f   : > { %v1287_v55 = vpop.xlane.xlu0 %1286  ;;  %3761 = vpow2.f32 %v1328_v0  ;;  %3497 = vmatpush3.bf16.xpose.msra.mxu1 %v4867_v23  ;;  %v1303_v25 = vsub.f32 %v5152_v16, %v1285_v7  ;;  %1350 = vadd.xlane.f32.xlu0 %v3752_v22 }
 0x310   : > { %v1304_v17 = vsub.f32 %v5160_v19, %v1287_v55  ;;  %3763 = vpow2.f32 %v1330_v63  ;;  %3075 = vmatprep.mubr.f32.mxu1 %v3752_v22  ;;  %3499 = vmatprep.subr.bf16.mxu1 %v4883_v46 }
 0x311   : > { %v3754_v24 = vpop.eup %3753  ;;  %v1332_v34 = vmul.f32 1.442695, %v1303_v25 }
 0x312   : > { %v1334_v59 = vmul.f32 1.442695, %v1304_v17  ;;  %v3756_v9 = vpop.eup %3755  ;;  %3076 = vmatmul.mubr.f32.gmra.mrb[54].mxu1 %v3754_v24  ;;  %1352 = vadd.xlane.f32.xlu1 %v3754_v24  ;;  %v1289_v51 = vpop.xlane.xlu1 %1288 }
 0x313   : > { %3765 = vpow2.f32 %v1332_v34  ;;  %v1305_v36 = vsub.f32 %v5158_v10, %v1289_v51  ;;  %1354 = vadd.xlane.f32.xlu0 %v3756_v9  ;;  %3078 = vmatprep.mubr.f32.mxu1 %v3756_v9 }
 0x314   : > { %3767 = vpow2.f32 %v1334_v59 }
 0x315   : > { %v3758_v23 = vpop.eup %3757  ;;  %v1336_v16 = vmul.f32 1.442695, %v1305_v36 }
 0x316   : > { %v3760_v19 = vpop.eup %3759  ;;  %3079 = vmatmul.mubr.f32.gmra.mrb[56].mxu1 %v3758_v23  ;;  %1356 = vadd.xlane.f32.xlu1 %v3758_v23  ;;  %v5915_v23 = vld [vmem:[#allocation5_spill] sm:$0xff] }
 0x317   : > { %3769 = vpow2.f32 %v1336_v16  ;;  %3501 = vmatpush3.bf16.xpose.msra.mxu1 %v4883_v46  ;;  %1358 = vadd.xlane.f32.xlu0 %v3760_v19 }
 0x318   : > { %3081 = vmatprep.mubr.f32.mxu1 %v3760_v19  ;;  %3503 = vmatprep.subr.bf16.mxu1 %v4899_v47 }
 0x319   : > { %v3762_v48 = vpop.eup %3761 }
 0x31a   : > { %v3764_v21 = vpop.eup %3763  ;;  %3082 = vmatmul.mubr.f32.gmra.mrb[58].mxu1 %v3762_v48  ;;  %1360 = vadd.xlane.f32.xlu1 %v3762_v48 }
 0x31b   : > { %1362 = vadd.xlane.f32.xlu0 %v3764_v21  ;;  %3084 = vmatprep.mubr.f32.mxu1 %v3764_v21 }
 0x31d   : > { %v3766_v10 = vpop.eup %3765 }
 0x31e   : > { %v3768_v43 = vpop.eup %3767  ;;  %3085 = vmatmul.mubr.f32.gmra.mrb[60].mxu1 %v3766_v10  ;;  %1364 = vadd.xlane.f32.xlu1 %v3766_v10  ;;  %v5916_v10 = vld [vmem:[#allocation6_spill] sm:$0xff] }
 0x31f   : > { %3505 = vmatpush3.bf16.xpose.msra.mxu1 %v4899_v47  ;;  %1366 = vadd.xlane.f32.xlu0 %v3768_v43  ;;  %v667_v47 = vadd.f32 %v4856_v6, %v4960_v41  ;;  %v703_v6 = vadd.f32 %v4904_v60, %v4960_v41  ;;  %v3923_v60 = vmov 0.0  }
 0x320   : > { %3087 = vmatprep.mubr.f32.mxu1 %v3768_v43  ;;  %3507 = vmatprep.subr.bf16.mxu1 %v4915_v20 }
 0x321   : > { %v3770_v46 = vpop.eup %3769  ;;  %1643 = vmatprep.mubr.f32.mxu0 %v3923_v60 }
 0x322   : > { %1368 = vadd.xlane.f32.xlu1 %v3770_v46  ;;  %3088 = vmatmul.mubr.f32.gmra.mrb[62].mxu1 %v3770_v46 }
 0x323   : > { %3122 = vmatprep.mubr.f32.mxu1 %v655_v44 }
 0x327   : > { %3509 = vmatpush3.bf16.xpose.msra.mxu1 %v4915_v20  ;;  %v673_v20 = vadd.f32 %v4862_v14, %v4960_v41  ;;  %v709_v14 = vadd.f32 %v4910_v8, %v4960_v41  ;;  %v739_v8 = vadd.f32 %v4953_v30, %v4960_v41 }
 0x328   : > { %3511 = vmatprep.subr.bf16.mxu1 %v4931_v58 }
 0x32f   : > { %3513 = vmatpush3.bf16.xpose.msra.mxu1 %v4931_v58  ;;  %v679_v58 = vadd.f32 %v4872_v27, %v4960_v41  ;;  %v715_v27 = vadd.f32 %v4920_v28, %v4960_v41 }
 0x330   : > { %3515 = vmatprep.subr.bf16.mxu1 %v4948_v18 }
 0x337   : > { %3517 = vmatpush3.bf16.xpose.msra.mxu1 %v4948_v18  ;;  %v685_v18 = vadd.f32 %v4878_v35, %v4960_v41  ;;  %v721_v35 = vadd.f32 %v4926_v39, %v4960_v41 }
 0x338   : > { %3519 = vmatprep.subr.bf16.mxu1 %v4978_v53 }
 0x33f   : > { %3521 = vmatpush3.bf16.xpose.msra.mxu1 %v4978_v53  ;;  %v691_v53 = vadd.f32 %v4888_v52, %v4960_v41  ;;  %v727_v52 = vadd.f32 %v4936_v5, %v4960_v41 }
 0x346   : > { %3123 = vmatmul.mubr.f32.vlgmr.msra.gmra.mrb[64].mxu1 %v661_v13 }
 0x347   : > { %3125 = vmatprep.mubr.f32.mxu1 %v667_v47 }
 0x34a   : > { %3126 = vmatmul.mubr.f32.gmra.mrb[66].mxu1 %v673_v20 }
 0x34b   : > { %3128 = vmatprep.mubr.f32.mxu1 %v679_v58 }
 0x34e   : > { %3129 = vmatmul.mubr.f32.gmra.mrb[68].mxu1 %v685_v18 }
 0x34f   : > { %3131 = vmatprep.mubr.f32.mxu1 %v691_v53 }
 0x352   : > { %3132 = vmatmul.mubr.f32.gmra.mrb[70].mxu1 %v697_v42 }
 0x353   : > { %3134 = vmatprep.mubr.f32.mxu1 %v703_v6 }
 0x356   : > { %3135 = vmatmul.mubr.f32.gmra.mrb[72].mxu1 %v709_v14 }
 0x357   : > { %3137 = vmatprep.mubr.f32.mxu1 %v715_v27 }
 0x35a   : > { %3138 = vmatmul.mubr.f32.gmra.mrb[74].mxu1 %v721_v35 }
 0x35b   : > { %3140 = vmatprep.mubr.f32.mxu1 %v727_v52 }
 0x35e   : > { %3141 = vmatmul.mubr.f32.gmra.mrb[76].mxu1 %v733_v61 }
 0x35f   : > { %3143 = vmatprep.mubr.f32.mxu1 %v739_v8 }
 0x362   : > { %3144 = vmatmul.mubr.f32.gmra.mrb[78].mxu1 %v4969_v29 }
 0x38f   : > { %v1339_v28 = vpop.xlane.xlu0 %1338 }
 0x390   : > { %3771 = vrcp.f32 %v1339_v28 }
 0x393   : > { %v1341_v39 = vpop.xlane.xlu1 %1340 }
 0x394   : > { %3773 = vrcp.f32 %v1341_v39  ;;  %v1343_v5 = vpop.xlane.xlu0 %1342 }
 0x395   : > { %3775 = vrcp.f32 %v1343_v5 }
 0x397   : > { %v1345_v57 = vpop.xlane.xlu1 %1344 }
 0x398   : > { %3777 = vrcp.f32 %v1345_v57  ;;  %v1347_v32 = vpop.xlane.xlu0 %1346 }
 0x399   : > { %3779 = vrcp.f32 %v1347_v32 }
 0x39a   : > { %v3772_v38 = vpop.eup %3771 }
 0x39b   : > { %v1349_v1 = vpop.xlane.xlu1 %1348 }
 0x39c   : > { %3781 = vrcp.f32 %v1349_v1 }
 0x39e   : > { %v3774_v30 = vpop.eup %3773 }
 0x39f   : > { %v3776_v11 = vpop.eup %3775 }
 0x3a2   : > { %v3778_v4 = vpop.eup %3777 }
 0x3a3   : > { %v3780_v22 = vpop.eup %3779 }
 0x3a6   : > { %v3782_v17 = vpop.eup %3781 }
 0x3d9   : > { %v3068_v15 = vpop.f32.mrb[48].mxu1 }
 0x3da   : > { %v1452_v62 = vpop.f32.mrb[49].mxu1  ;;  %v1532_v29 = vmul.f32 %v3774_v30, %v3068_v15 }
 0x3db   : > { %v1531_v40 = vmul.f32 %v3772_v38, %v1452_v62 }
 0x3dd   : > { %v3071_v33 = vpop.f32.mrb[50].mxu1  ;;  %1644 = vmatmul.mubr.f32.vlgmr.msra.gmra.mrb[64].mxu0 %v1531_v40 }
 0x3de   : > { %3525 = vmatpush3.bf16.msra.mxu0 %v4984_v50  ;;  %v1462_v41 = vpop.f32.mrb[51].mxu1  ;;  %1649 = vmatprep.mubr.f32.mxu0 %v3923_v60  ;;  %v1351_v50 = vpop.xlane.xlu0 %1350  ;;  %v1534_v0 = vmul.f32 %v3778_v4, %v3071_v33 }
 0x3df   : > { %3527 = vmatprep.subr.bf16.mxu0 %v4994_v3  ;;  %v1533_v45 = vmul.f32 %v3776_v11, %v1462_v41  ;;  %3783 = vrcp.f32 %v1351_v50 }
 0x3e1   : > { %v3074_v54 = vpop.f32.mrb[52].mxu1  ;;  %1650 = vmatmul.mubr.f32.gmra.mrb[66].mxu0 %v1532_v29 }
 0x3e2   : > { %3529 = vmatpush3.bf16.msra.mxu0 %v4994_v3  ;;  %v1472_v49 = vpop.f32.mrb[53].mxu1  ;;  %1655 = vmatprep.mubr.f32.mxu0 %v3923_v60  ;;  %v1353_v3 = vpop.xlane.xlu1 %1352  ;;  %v1536_v34 = vmul.f32 %v3782_v17, %v3074_v54 }
 0x3e3   : > { %3531 = vmatprep.subr.bf16.mxu0 %v5004_v31  ;;  %v1535_v55 = vmul.f32 %v3780_v22, %v1472_v49  ;;  %3785 = vrcp.f32 %v1353_v3 }
 0x3e5   : > { %v3077_v2 = vpop.f32.mrb[54].mxu1  ;;  %1656 = vmatmul.mubr.f32.gmra.mrb[68].mxu0 %v1533_v45 }
 0x3e6   : > { %3533 = vmatpush3.bf16.msra.mxu0 %v5004_v31  ;;  %v1482_v12 = vpop.f32.mrb[55].mxu1  ;;  %1661 = vmatprep.mubr.f32.mxu0 %v3923_v60  ;;  %v1355_v31 = vpop.xlane.xlu0 %1354 }
 0x3e7   : > { %3535 = vmatprep.subr.bf16.mxu0 %v5014_v56  ;;  %3787 = vrcp.f32 %v1355_v31 }
 0x3e9   : > { %v3080_v63 = vpop.f32.mrb[56].mxu1  ;;  %1662 = vmatmul.mubr.f32.gmra.mrb[70].mxu0 %v1534_v0  ;;  %v3784_v9 = vpop.eup %3783 }
 0x3ea   : > { %3537 = vmatpush3.bf16.msra.mxu0 %v5014_v56  ;;  %v1492_v7 = vpop.f32.mrb[57].mxu1  ;;  %1667 = vmatprep.mubr.f32.mxu0 %v3923_v60  ;;  %v1357_v56 = vpop.xlane.xlu1 %1356  ;;  %v1537_v36 = vmul.f32 %v3784_v9, %v1482_v12 }
 0x3eb   : > { %3539 = vmatprep.subr.bf16.mxu0 %v5023_v37  ;;  %3789 = vrcp.f32 %v1357_v56 }
 0x3ed   : > { %v3083_v25 = vpop.f32.mrb[58].mxu1  ;;  %1668 = vmatmul.mubr.f32.gmra.mrb[72].mxu0 %v1535_v55  ;;  %v3786_v19 = vpop.eup %3785 }
 0x3ee   : > { %3541 = vmatpush3.bf16.msra.mxu0 %v5023_v37  ;;  %v1502_v24 = vpop.f32.mrb[59].mxu1  ;;  %1673 = vmatprep.mubr.f32.mxu0 %v3923_v60  ;;  %v1359_v37 = vpop.xlane.xlu0 %1358  ;;  %v1538_v21 = vmul.f32 %v3786_v19, %v3077_v2 }
 0x3ef   : > { %3543 = vmatprep.subr.bf16.mxu0 %v5029_v26  ;;  %3791 = vrcp.f32 %v1359_v37 }
 0x3f1   : > { %v3086_v59 = vpop.f32.mrb[60].mxu1  ;;  %1674 = vmatmul.mubr.f32.gmra.mrb[74].mxu0 %v1536_v34  ;;  %v3788_v43 = vpop.eup %3787 }
 0x3f2   : > { %3545 = vmatpush3.bf16.msra.mxu0 %v5029_v26  ;;  %v1512_v51 = vpop.f32.mrb[61].mxu1  ;;  %1679 = vmatprep.mubr.f32.mxu0 %v3923_v60  ;;  %v1361_v26 = vpop.xlane.xlu1 %1360  ;;  %v1539_v46 = vmul.f32 %v3788_v43, %v1492_v7 }
 0x3f3   : > { %3547 = vmatprep.subr.bf16.mxu0 %v5915_v23  ;;  %3793 = vrcp.f32 %v1361_v26  ;;  %v1363_v44 = vpop.xlane.xlu0 %1362 }
 0x3f4   : > { %3795 = vrcp.f32 %v1363_v44 }
 0x3f5   : > { %v3089_v16 = vpop.f32.mrb[62].mxu1  ;;  %1680 = vmatmul.mubr.f32.gmra.mrb[76].mxu0 %v1537_v36  ;;  %v3790_v13 = vpop.eup %3789 }
 0x3f6   : > { %3549 = vmatpush3.bf16.msra.mxu0 %v5915_v23  ;;  %v1522_v48 = vpop.f32.mrb[63].mxu1  ;;  %1685 = vmatprep.mubr.f32.mxu0 %v3923_v60  ;;  %v1540_v47 = vmul.f32 %v3790_v13, %v3080_v63  ;;  %v1365_v20 = vpop.xlane.xlu1 %1364 }
 0x3f7   : > { %3551 = vmatprep.subr.bf16.mxu0 %v5916_v10  ;;  %3797 = vrcp.f32 %v1365_v20  ;;  %v1367_v53 = vpop.xlane.xlu0 %1366 }
 0x3f8   : > { %3799 = vrcp.f32 %v1367_v53 }
 0x3f9   : > { %1686 = vmatmul.mubr.f32.gmra.mrb[78].mxu0 %v1538_v21  ;;  %v3792_v58 = vpop.eup %3791 }
 0x3fa   : > { %3553 = vmatpush3.bf16.msra.mxu0 %v5916_v10  ;;  %1691 = vmatprep.mubr.f32.mxu0 %v3923_v60  ;;  %v1541_v18 = vmul.f32 %v3792_v58, %v1502_v24  ;;  %v1369_v14 = vpop.xlane.xlu1 %1368 }
 0x3fb   : > { %3801 = vrcp.f32 %v1369_v14 }
 0x3fd   : > { %1692 = vmatmul.mubr.f32.gmra.mrb[80].mxu0 %v1539_v46  ;;  %v3794_v42 = vpop.eup %3793 }
 0x3fe   : > { %1697 = vmatprep.mubr.f32.mxu0 %v3923_v60  ;;  %v1542_v6 = vmul.f32 %v3794_v42, %v3083_v25  ;;  %v3796_v27 = vpop.eup %3795 }
 0x3ff   : > { %v1543_v35 = vmul.f32 %v3796_v27, %v1512_v51 }
 0x401   : > { %1698 = vmatmul.mubr.f32.gmra.mrb[82].mxu0 %v1540_v47  ;;  %v3798_v52 = vpop.eup %3797 }
 0x402   : > { %1703 = vmatprep.mubr.f32.mxu0 %v3923_v60  ;;  %v1544_v61 = vmul.f32 %v3798_v52, %v3086_v59  ;;  %v3800_v8 = vpop.eup %3799 }
 0x403   : > { %v1545_v28 = vmul.f32 %v3800_v8, %v1522_v48 }
 0x405   : > { %1704 = vmatmul.mubr.f32.gmra.mrb[84].mxu0 %v1541_v18  ;;  %v3802_v39 = vpop.eup %3801 }
 0x406   : > { %1709 = vmatprep.mubr.f32.mxu0 %v3923_v60  ;;  %v1546_v5 = vmul.f32 %v3802_v39, %v3089_v16 }
 0x409   : > { %1710 = vmatmul.mubr.f32.gmra.mrb[86].mxu0 %v1542_v6 }
 0x40a   : > { %1715 = vmatprep.mubr.f32.mxu0 %v3923_v60 }
 0x40d   : > { %1716 = vmatmul.mubr.f32.gmra.mrb[88].mxu0 %v1543_v35 }
 0x40e   : > { %1721 = vmatprep.mubr.f32.mxu0 %v3923_v60 }
 0x411   : > { %1722 = vmatmul.mubr.f32.gmra.mrb[90].mxu0 %v1544_v61 }
 0x412   : > { %1727 = vmatprep.mubr.f32.mxu0 %v3923_v60 }
 0x415   : > { %1728 = vmatmul.mubr.f32.gmra.mrb[92].mxu0 %v1545_v28 }
 0x416   : > { %1733 = vmatprep.mubr.f32.mxu0 %v3923_v60 }
 0x419   : > { %v3124_v57 = vpop.f32.mrb[64].mxu1  ;;  %1734 = vmatmul.mubr.f32.gmra.mrb[94].mxu0 %v1546_v5 }
 0x41a   : > { %1919 = vmax.xlane.f32.xlu1 %v3124_v57  ;;  %v1838_v15 = vpop.f32.mrb[65].mxu1 }
 0x41b   : > { %1917 = vmax.xlane.f32.xlu0 %v1838_v15 }
 0x41d   : > { %v3127_v38 = vpop.f32.mrb[66].mxu1 }
 0x41e   : > { %1923 = vmax.xlane.f32.xlu1 %v3127_v38  ;;  %v1848_v62 = vpop.f32.mrb[67].mxu1 }
 0x41f   : > { %1921 = vmax.xlane.f32.xlu0 %v1848_v62 }
 0x421   : > { %v3130_v40 = vpop.f32.mrb[68].mxu1 }
 0x422   : > { %1927 = vmax.xlane.f32.xlu1 %v3130_v40  ;;  %v1858_v32 = vpop.f32.mrb[69].mxu1 }
 0x423   : > { %1925 = vmax.xlane.f32.xlu0 %v1858_v32 }
 0x425   : > { %v3133_v33 = vpop.f32.mrb[70].mxu1 }
 0x426   : > { %1931 = vmax.xlane.f32.xlu1 %v3133_v33  ;;  %v1868_v30 = vpop.f32.mrb[71].mxu1 }
 0x427   : > { %1929 = vmax.xlane.f32.xlu0 %v1868_v30 }
 0x429   : > { %v3136_v41 = vpop.f32.mrb[72].mxu1 }
 0x42a   : > { %1935 = vmax.xlane.f32.xlu1 %v3136_v41  ;;  %v1878_v29 = vpop.f32.mrb[73].mxu1 }
 0x42b   : > { %1933 = vmax.xlane.f32.xlu0 %v1878_v29 }
 0x42d   : > { %v5249_v1 = vpop.f32.mrb[74].mxu1 }
 0x42e   : > { %1939 = vmax.xlane.f32.xlu1 %v5249_v1  ;;  %v5252_v54 = vpop.f32.mrb[75].mxu1 }
 0x42f   : > { %1937 = vmax.xlane.f32.xlu0 %v5252_v54 }
 0x431   : > { %v5255_v11 = vpop.f32.mrb[76].mxu1 }
 0x432   : > { %1943 = vmax.xlane.f32.xlu1 %v5255_v11  ;;  %v5258_v49 = vpop.f32.mrb[77].mxu1 }
 0x433   : > { %1941 = vmax.xlane.f32.xlu0 %v5258_v49 }
 0x435   : > { %v5261_v45 = vpop.f32.mrb[78].mxu1 }
 0x436   : > { %1947 = vmax.xlane.f32.xlu1 %v5261_v45  ;;  %v5264_v50 = vpop.f32.mrb[79].mxu1 }
 0x437   : > { %1945 = vmax.xlane.f32.xlu0 %v5264_v50 }
 0x4a7   : > { %v1920_v2 = vpop.xlane.xlu1 %1919 }
 0x4a8   : > { %v1950_v4 = vsub.f32 %v3124_v57, %v1920_v2  ;;  %v1918_v12 = vpop.xlane.xlu0 %1917 }
 0x4a9   : > { %v1949_v0 = vsub.f32 %v1838_v15, %v1918_v12  ;;  %v2209_v12 = vld [vmem:[%s5901_s3 + $0x118] sm:$0xff] }
 0x4aa   : > { %v1967_v3 = vmul.f32 1.442695, %v1950_v4  ;;  %v2207_v4 = vld [vmem:[%s5901_s3 + $0x108] sm:$0xff] }
 0x4ab   : > { %v1965_v63 = vmul.f32 1.442695, %v1949_v0  ;;  %v1924_v22 = vpop.xlane.xlu1 %1923  ;;  %v2206_v0 = vld [vmem:[%s5901_s3 + $0x100] sm:$0xff] }
 0x4ac   : > { %3803 = vpow2.f32 %v1967_v3  ;;  %v1952_v7 = vsub.f32 %v3127_v38, %v1924_v22  ;;  %v1922_v55 = vpop.xlane.xlu0 %1921  ;;  %v3554_v3 = vpack.c.bf16 %v2209_v12, %v2207_v4  ;;  %v2211_v22 = vld [vmem:[%s5901_s3 + $0x128] sm:$0xff]  ;;  %v2439_v4 = vld [vmem:[%s5903_s5 + $0x40] sm:$0xff]  ;;  %v2441_v12 = vld [vmem:[%s5903_s5 + $0x50] sm:$0xff] }
 0x4ad   : > { %3805 = vpow2.f32 %v1965_v63  ;;  %v1951_v31 = vsub.f32 %v1848_v62, %v1922_v55  ;;  %v2208_v63 = vld [vmem:[%s5901_s3 + $0x110] sm:$0xff] }
 0x4ae   : > { %v1971_v25 = vmul.f32 1.442695, %v1952_v7  ;;  %v2213_v7 = vld [vmem:[%s5901_s3 + $0x138] sm:$0xff]  ;;  %v3556_v55 = vpack.c.bf16 %v2208_v63, %v2206_v0  ;;  %3555 = vmatprep.subr.bf16.mxu0 %v3554_v3  ;;  %v2444_v0 = vld [vmem:[%s5903_s5 + $0x68] sm:$0xff]  ;;  %v3596_v63 = vpack.c.bf16 %v2441_v12, %v2439_v4 }
 0x4af   : > { %v1969_v17 = vmul.f32 1.442695, %v1951_v31  ;;  %v1928_v24 = vpop.xlane.xlu1 %1927  ;;  %v3558_v31 = vpack.c.bf16 %v2213_v7, %v2211_v22  ;;  %v2446_v3 = vld [vmem:[%s5903_s5 + $0x78] sm:$0xff]  ;;  %v2443_v7 = vld [vmem:[%s5903_s5 + $0x60] sm:$0xff] }
 0x4b0   : > { %3807 = vpow2.f32 %v1971_v25  ;;  %v1954_v34 = vsub.f32 %v3130_v40, %v1928_v24  ;;  %v1926_v56 = vpop.xlane.xlu0 %1925  ;;  %v2210_v25 = vld [vmem:[%s5901_s3 + $0x120] sm:$0xff]  ;;  %v2215_v24 = vld [vmem:[%s5901_s3 + $0x148] sm:$0xff]  ;;  %v3598_v22 = vpack.c.bf16 %v2446_v3, %v2444_v0  ;;  %v2486_v4 = vld [vmem:[%s5903_s5 + $0x1b8] sm:$0xff] }
 0x4b1   : > { %3809 = vpow2.f32 %v1969_v17  ;;  %v1953_v59 = vsub.f32 %v1858_v32, %v1926_v56  ;;  %v2212_v17 = vld [vmem:[%s5901_s3 + $0x130] sm:$0xff]  ;;  %v2483_v3 = vld [vmem:[%s5903_s5 + $0x1a0] sm:$0xff] }
 0x4b2   : > { %v1975_v9 = vmul.f32 1.442695, %v1954_v34  ;;  %v2217_v34 = vld [vmem:[%s5901_s3 + $0x158] sm:$0xff]  ;;  %v3560_v56 = vpack.c.bf16 %v2212_v17, %v2210_v25 }
 0x4b3   : > { %v1973_v51 = vmul.f32 1.442695, %v1953_v59  ;;  %v1932_v36 = vpop.xlane.xlu1 %1931  ;;  %v3562_v59 = vpack.c.bf16 %v2217_v34, %v2215_v24  ;;  %v2450_v25 = vld [vmem:[%s5903_s5 + $0x98] sm:$0xff]  ;;  %v2447_v34 = vld [vmem:[%s5903_s5 + $0x80] sm:$0xff] }
 0x4b4   : > { %3811 = vpow2.f32 %v1975_v9  ;;  %v1956_v23 = vsub.f32 %v3133_v33, %v1932_v36  ;;  %v1930_v37 = vpop.xlane.xlu0 %1929  ;;  %v2214_v9 = vld [vmem:[%s5901_s3 + $0x140] sm:$0xff]  ;;  %v2219_v36 = vld [vmem:[%s5901_s3 + $0x168] sm:$0xff] }
 0x4b5   : > { %3813 = vpow2.f32 %v1973_v51  ;;  %v1955_v16 = vsub.f32 %v1868_v30, %v1930_v37  ;;  %v2216_v51 = vld [vmem:[%s5901_s3 + $0x150] sm:$0xff] }
 0x4b6   : > { %v3804_v19 = vpop.eup %3803  ;;  %v1979_v48 = vmul.f32 1.442695, %v1956_v23  ;;  %v2221_v23 = vld [vmem:[%s5901_s3 + $0x178] sm:$0xff]  ;;  %v3564_v37 = vpack.c.bf16 %v2216_v51, %v2214_v9 }
 0x4b7   : > { %v3806_v21 = vpop.eup %3805  ;;  %v1977_v10 = vmul.f32 1.442695, %v1955_v16  ;;  %v1936_v26 = vpop.xlane.xlu1 %1935  ;;  %1999 = vadd.xlane.f32.xlu1 %v3804_v19  ;;  %v3566_v16 = vpack.c.bf16 %v2221_v23, %v2219_v36  ;;  %v2454_v9 = vld [vmem:[%s5903_s5 + $0xb8] sm:$0xff]  ;;  %v2451_v23 = vld [vmem:[%s5903_s5 + $0xa0] sm:$0xff] }
 0x4b8   : > { %3815 = vpow2.f32 %v1979_v48  ;;  %v1958_v43 = vsub.f32 %v3136_v41, %v1936_v26  ;;  %v1934_v46 = vpop.xlane.xlu0 %1933  ;;  %1997 = vadd.xlane.f32.xlu0 %v3806_v21  ;;  %3178 = vmatprep.mubr.f32.mxu0 %v3806_v21  ;;  %v2220_v48 = vld [vmem:[%s5901_s3 + $0x170] sm:$0xff]  ;;  %v2223_v21 = vld [vmem:[%s5901_s3 + $0x188] sm:$0xff] }
 0x4b9   : > { %3817 = vpow2.f32 %v1977_v10  ;;  %v1957_v44 = vsub.f32 %v1878_v29, %v1934_v46  ;;  %3179 = vmatmul.mubr.f32.vlgmr.msra.gmra.mrb[96].mxu0 %v3804_v19  ;;  %v2218_v19 = vld [vmem:[%s5901_s3 + $0x160] sm:$0xff]  ;;  %v2225_v10 = vld [vmem:[%s5901_s3 + $0x198] sm:$0xff] }
 0x4ba   : > { %v3808_v13 = vpop.eup %3807  ;;  %v1983_v47 = vmul.f32 1.442695, %v1958_v43  ;;  %3557 = vmatpush1.bf16.msra.mxu0 %v3556_v55  ;;  %v3568_v26 = vpack.c.bf16 %v2220_v48, %v2218_v19  ;;  %v3570_v43 = vpack.c.bf16 %v2225_v10, %v2223_v21  ;;  %v2222_v46 = vld [vmem:[%s5901_s3 + $0x180] sm:$0xff]  ;;  %v2445_v55 = vld [vmem:[%s5903_s5 + $0x70] sm:$0xff]  ;;  %v2458_v19 = vld [vmem:[%s5903_s5 + $0xd8] sm:$0xff] }
 0x4bb   : > { %v3810_v20 = vpop.eup %3809  ;;  %v1981_v58 = vmul.f32 1.442695, %v1957_v44  ;;  %v1940_v18 = vpop.xlane.xlu1 %1939  ;;  %2003 = vadd.xlane.f32.xlu1 %v3808_v13  ;;  %3559 = vmatprep.subr.bf16.mxu0 %v3558_v31  ;;  %v2224_v44 = vld [vmem:[%s5901_s3 + $0x190] sm:$0xff]  ;;  %v2448_v31 = vld [vmem:[%s5903_s5 + $0x88] sm:$0xff]  ;;  %v3600_v17 = vpack.c.bf16 %v2445_v55, %v2443_v7  ;;  %v2455_v10 = vld [vmem:[%s5903_s5 + $0xc0] sm:$0xff] }
 0x4bc   : > { %3819 = vpow2.f32 %v1983_v47  ;;  %v1960_v53 = vsub.f32 %v5249_v1, %v1940_v18  ;;  %v1938_v42 = vpop.xlane.xlu0 %1937  ;;  %2001 = vadd.xlane.f32.xlu0 %v3810_v20  ;;  %3181 = vmatprep.mubr.f32.mxu0 %v3810_v20  ;;  %v2229_v47 = vld [vmem:[%s5901_s3 + $0x1b8] sm:$0xff]  ;;  %v3572_v20 = vpack.c.bf16 %v2224_v44, %v2222_v46  ;;  %v2226_v18 = vld [vmem:[%s5901_s3 + $0x1a0] sm:$0xff]  ;;  %v3602_v24 = vpack.c.bf16 %v2450_v25, %v2448_v31 }
 0x4bd   : > { %3821 = vpow2.f32 %v1981_v58  ;;  %v1959_v6 = vsub.f32 %v5252_v54, %v1938_v42  ;;  %3182 = vmatmul.mubr.f32.gmra.mrb[98].mxu0 %v3808_v13  ;;  %v2227_v13 = vld [vmem:[%s5901_s3 + $0x1a8] sm:$0xff]  ;;  %v2462_v46 = vld [vmem:[%s5903_s5 + $0xf8] sm:$0xff] }
 0x4be   : > { %v3812_v14 = vpop.eup %3811  ;;  %v1987_v27 = vmul.f32 1.442695, %v1960_v53  ;;  %3561 = vmatpush1.bf16.msra.mxu0 %v3560_v56  ;;  %v3574_v58 = vpack.c.bf16 %v2229_v47, %v2227_v13  ;;  %v2228_v53 = vld [vmem:[%s5901_s3 + $0x1b0] sm:$0xff]  ;;  %v2231_v42 = vld [vmem:[%s5901_s3 + $0x1c8] sm:$0xff]  ;;  %v2459_v47 = vld [vmem:[%s5903_s5 + $0xe0] sm:$0xff] }
 0x4bf   : > { %v3814_v35 = vpop.eup %3813  ;;  %v1985_v52 = vmul.f32 1.442695, %v1959_v6  ;;  %v1944_v61 = vpop.xlane.xlu1 %1943  ;;  %2007 = vadd.xlane.f32.xlu1 %v3812_v14  ;;  %3563 = vmatprep.subr.bf16.mxu0 %v3562_v59  ;;  %v2233_v6 = vld [vmem:[%s5901_s3 + $0x1d8] sm:$0xff]  ;;  %v2449_v56 = vld [vmem:[%s5903_s5 + $0x90] sm:$0xff]  ;;  %v2452_v59 = vld [vmem:[%s5903_s5 + $0xa8] sm:$0xff] }
 0x4c0   : > { %3823 = vpow2.f32 %v1987_v27  ;;  %v1962_v8 = vsub.f32 %v5255_v11, %v1944_v61  ;;  %v1942_v28 = vpop.xlane.xlu0 %1941  ;;  %2005 = vadd.xlane.f32.xlu0 %v3814_v35  ;;  %3184 = vmatprep.mubr.f32.mxu0 %v3814_v35  ;;  %v3578_v27 = vpack.c.bf16 %v2233_v6, %v2231_v42  ;;  %v2230_v35 = vld [vmem:[%s5901_s3 + $0x1c0] sm:$0xff]  ;;  %v3604_v51 = vpack.c.bf16 %v2449_v56, %v2447_v34  ;;  %v2490_v7 = vld [vmem:[%s5903_s5 + $0x1d8] sm:$0xff] }
 0x4c1   : > { %3825 = vpow2.f32 %v1985_v52  ;;  %v1961_v39 = vsub.f32 %v5258_v49, %v1942_v28  ;;  %3185 = vmatmul.mubr.f32.gmra.mrb[100].mxu0 %v3812_v14  ;;  %v3576_v14 = vpack.c.bf16 %v2228_v53, %v2226_v18  ;;  %v2232_v52 = vld [vmem:[%s5901_s3 + $0x1d0] sm:$0xff]  ;;  %v2237_v28 = vld [vmem:[%s5901_s3 + $0x1f8] sm:$0xff]  ;;  %v3606_v36 = vpack.c.bf16 %v2454_v9, %v2452_v59  ;;  %v2463_v6 = vld [vmem:[%s5903_s5 + $0x100] sm:$0xff] }
 0x4c2   : > { %v3816_v5 = vpop.eup %3815  ;;  %v1991_v57 = vmul.f32 1.442695, %v1962_v8  ;;  %3565 = vmatpush1.bf16.msra.mxu0 %v3564_v37  ;;  %v3580_v61 = vpack.c.bf16 %v2232_v52, %v2230_v35  ;;  %v2235_v8 = vld [vmem:[%s5901_s3 + $0x1e8] sm:$0xff]  ;;  %v2453_v37 = vld [vmem:[%s5903_s5 + $0xb0] sm:$0xff]  ;;  %v2466_v18 = vld [vmem:[%s5903_s5 + $0x118] sm:$0xff] }
 0x4c3   : > { %v3818_v15 = vpop.eup %3817  ;;  %v1989_v38 = vmul.f32 1.442695, %v1961_v39  ;;  %2011 = vadd.xlane.f32.xlu1 %v3816_v5  ;;  %v1948_v62 = vpop.xlane.xlu1 %1947  ;;  %3567 = vmatprep.subr.bf16.mxu0 %v3566_v16  ;;  %v3582_v39 = vpack.c.bf16 %v2237_v28, %v2235_v8  ;;  %v2456_v16 = vld [vmem:[%s5903_s5 + $0xc8] sm:$0xff]  ;;  %v3608_v48 = vpack.c.bf16 %v2453_v37, %v2451_v23  ;;  %v2470_v35 = vld [vmem:[%s5903_s5 + $0x138] sm:$0xff]  ;;  %v2467_v8 = vld [vmem:[%s5903_s5 + $0x120] sm:$0xff] }
 0x4c4   : > { %3827 = vpow2.f32 %v1991_v57  ;;  %v1964_v40 = vsub.f32 %v5261_v45, %v1948_v62  ;;  %2009 = vadd.xlane.f32.xlu0 %v3818_v15  ;;  %v1946_v32 = vpop.xlane.xlu0 %1945  ;;  %3187 = vmatprep.mubr.f32.mxu0 %v3818_v15  ;;  %v2236_v57 = vld [vmem:[%s5901_s3 + $0x1f0] sm:$0xff]  ;;  %v2434_v62 = vld [vmem:[%s5903_s5 + $0x18] sm:$0xff]  ;;  %v3610_v21 = vpack.c.bf16 %v2458_v19, %v2456_v16 }
 0x4c5   : > { %3829 = vpow2.f32 %v1989_v38  ;;  %v1963_v33 = vsub.f32 %v5264_v50, %v1946_v32  ;;  %3188 = vmatmul.mubr.f32.gmra.mrb[102].mxu0 %v3816_v5  ;;  %v2234_v5 = vld [vmem:[%s5901_s3 + $0x1e0] sm:$0xff]  ;;  %v2432_v38 = vld [vmem:[%s5903_s5 + $0x8] sm:$0xff]  ;;  %v2469_v28 = vld [vmem:[%s5903_s5 + $0x130] sm:$0xff] }
 0x4c6   : > { %v3820_v30 = vpop.eup %3819  ;;  %v1995_v41 = vmul.f32 1.442695, %v1964_v40  ;;  %3569 = vmatpush1.bf16.msra.mxu0 %v3568_v26  ;;  %v3584_v15 = vpack.c.bf16 %v2236_v57, %v2234_v5  ;;  %v2431_v40 = vld [vmem:[%s5903_s5] sm:$0xff]  ;;  %v3586_v32 = vpack.c.bf16 %v2434_v62, %v2432_v38  ;;  %v2457_v26 = vld [vmem:[%s5903_s5 + $0xd0] sm:$0xff]  ;;  %v2474_v5 = vld [vmem:[%s5903_s5 + $0x158] sm:$0xff]  ;;  %v3624_v57 = vpack.c.bf16 %v2469_v28, %v2467_v8 }
 0x4c7   : > { %v3822_v29 = vpop.eup %3821  ;;  %v1993_v1 = vmul.f32 1.442695, %v1963_v33  ;;  %2015 = vadd.xlane.f32.xlu1 %v3820_v30  ;;  %3571 = vmatprep.subr.bf16.mxu0 %v3570_v43  ;;  %v2433_v33 = vld [vmem:[%s5903_s5 + $0x10] sm:$0xff]  ;;  %v2460_v43 = vld [vmem:[%s5903_s5 + $0xe8] sm:$0xff]  ;;  %v3612_v44 = vpack.c.bf16 %v2457_v26, %v2455_v10  ;;  %v2471_v38 = vld [vmem:[%s5903_s5 + $0x140] sm:$0xff] }
 0x4c8   : > { %3831 = vpow2.f32 %v1995_v41  ;;  %2013 = vadd.xlane.f32.xlu0 %v3822_v29  ;;  %3190 = vmatprep.mubr.f32.mxu0 %v3822_v29  ;;  %v2438_v41 = vld [vmem:[%s5903_s5 + $0x38] sm:$0xff]  ;;  %v3588_v29 = vpack.c.bf16 %v2433_v33, %v2431_v40  ;;  %v3614_v13 = vpack.c.bf16 %v2462_v46, %v2460_v43  ;;  %v2473_v62 = vld [vmem:[%s5903_s5 + $0x150] sm:$0xff]  ;;  %v2476_v40 = vld [vmem:[%s5903_s5 + $0x168] sm:$0xff] }
 0x4c9   : > { %3833 = vpow2.f32 %v1993_v1  ;;  %3191 = vmatmul.mubr.f32.gmra.mrb[104].mxu0 %v3820_v30  ;;  %v2436_v30 = vld [vmem:[%s5903_s5 + $0x28] sm:$0xff]  ;;  %3587 = vmatprep.subr.bf16.mxu1 %v3586_v32  ;;  %v2478_v32 = vld [vmem:[%s5903_s5 + $0x178] sm:$0xff]  ;;  %v3628_v33 = vpack.c.bf16 %v2473_v62, %v2471_v38 }
 0x4ca   : > { %v3824_v54 = vpop.eup %3823  ;;  %3573 = vmatpush1.bf16.msra.mxu0 %v3572_v20  ;;  %v3590_v1 = vpack.c.bf16 %v2438_v41, %v2436_v30  ;;  %3589 = vmatpush1.bf16.msra.mxu1 %v3588_v29  ;;  %v2461_v20 = vld [vmem:[%s5903_s5 + $0xf0] sm:$0xff]  ;;  %v3630_v30 = vpack.c.bf16 %v2478_v32, %v2476_v40  ;;  %v2475_v41 = vld [vmem:[%s5903_s5 + $0x160] sm:$0xff] }
 0x4cb   : > { %v3826_v11 = vpop.eup %3825  ;;  %2019 = vadd.xlane.f32.xlu1 %v3824_v54  ;;  %3575 = vmatprep.subr.bf16.mxu0 %v3574_v58  ;;  %v2464_v58 = vld [vmem:[%s5903_s5 + $0x108] sm:$0xff]  ;;  %v3616_v53 = vpack.c.bf16 %v2461_v20, %v2459_v47  ;;  %v2477_v29 = vld [vmem:[%s5903_s5 + $0x170] sm:$0xff] }
 0x4cc   : > { %2017 = vadd.xlane.f32.xlu0 %v3826_v11  ;;  %3193 = vmatprep.mubr.f32.mxu0 %v3826_v11  ;;  %v2437_v11 = vld [vmem:[%s5903_s5 + $0x30] sm:$0xff]  ;;  %v3618_v42 = vpack.c.bf16 %v2466_v18, %v2464_v58 }
 0x4cd   : > { %3194 = vmatmul.mubr.f32.gmra.mrb[106].mxu0 %v3824_v54  ;;  %v2435_v54 = vld [vmem:[%s5903_s5 + $0x20] sm:$0xff]  ;;  %3591 = vmatprep.subr.bf16.mxu1 %v3590_v1  ;;  %v2480_v1 = vld [vmem:[%s5903_s5 + $0x188] sm:$0xff] }
 0x4ce   : > { %v3828_v49 = vpop.eup %3827  ;;  %3577 = vmatpush1.bf16.msra.mxu0 %v3576_v14  ;;  %v2465_v14 = vld [vmem:[%s5903_s5 + $0x110] sm:$0xff] }
 0x4cf   : > { %v3830_v45 = vpop.eup %3829  ;;  %2023 = vadd.xlane.f32.xlu1 %v3828_v49  ;;  %3579 = vmatprep.subr.bf16.mxu0 %v3578_v27  ;;  %v2468_v27 = vld [vmem:[%s5903_s5 + $0x128] sm:$0xff]  ;;  %v3620_v52 = vpack.c.bf16 %v2465_v14, %v2463_v6 }
 0x4d0   : > { %2021 = vadd.xlane.f32.xlu0 %v3830_v45  ;;  %3196 = vmatprep.mubr.f32.mxu0 %v3830_v45  ;;  %v2442_v45 = vld [vmem:[%s5903_s5 + $0x58] sm:$0xff] }
 0x4d1   : > { %3197 = vmatmul.mubr.f32.gmra.mrb[108].mxu0 %v3828_v49  ;;  %v2440_v49 = vld [vmem:[%s5903_s5 + $0x48] sm:$0xff] }
 0x4d2   : > { %v3832_v50 = vpop.eup %3831  ;;  %3581 = vmatpush1.bf16.msra.mxu0 %v3580_v61  ;;  %v3622_v61 = vpack.c.bf16 %v2470_v35, %v2468_v27 }
 0x4d3   : > { %v3834_v2 = vpop.eup %3833  ;;  %2027 = vadd.xlane.f32.xlu1 %v3832_v50  ;;  %3583 = vmatprep.subr.bf16.mxu0 %v3582_v39  ;;  %v2472_v39 = vld [vmem:[%s5903_s5 + $0x148] sm:$0xff] }
 0x4d4   : > { %2025 = vadd.xlane.f32.xlu0 %v3834_v2  ;;  %3199 = vmatprep.mubr.f32.mxu0 %v3834_v2  ;;  %v3594_v2 = vpack.c.bf16 %v2442_v45, %v2440_v49  ;;  %v2479_v45 = vld [vmem:[%s5903_s5 + $0x180] sm:$0xff] }
 0x4d5   : > { %3200 = vmatmul.mubr.f32.gmra.mrb[110].mxu0 %v3832_v50  ;;  %v3592_v50 = vpack.c.bf16 %v2437_v11, %v2435_v54  ;;  %v2482_v54 = vld [vmem:[%s5903_s5 + $0x198] sm:$0xff]  ;;  %v3632_v11 = vpack.c.bf16 %v2477_v29, %v2475_v41 }
 0x4d6   : > { %2302 = vmatprep.mubr.f32.mxu0 %v3923_v60  ;;  %3585 = vmatpush1.bf16.msra.mxu0 %v3584_v15  ;;  %v3626_v15 = vpack.c.bf16 %v2474_v5, %v2472_v39  ;;  %v3634_v49 = vpack.c.bf16 %v2482_v54, %v2480_v1 }
 0x4d7   : > { %3593 = vmatpush1.bf16.msra.mxu1 %v3592_v50  ;;  %v2481_v50 = vld [vmem:[%s5903_s5 + $0x190] sm:$0xff] }
 0x4d8   : > { %3595 = vmatprep.subr.bf16.mxu1 %v3594_v2  ;;  %v2484_v2 = vld [vmem:[%s5903_s5 + $0x1a8] sm:$0xff]  ;;  %v3636_v12 = vpack.c.bf16 %v2481_v50, %v2479_v45 }
 0x4d9   : > { %v3638_v0 = vpack.c.bf16 %v2486_v4, %v2484_v2 }
 0x4db   : > { %3597 = vmatpush1.bf16.msra.mxu1 %v3596_v63  ;;  %v2485_v63 = vld [vmem:[%s5903_s5 + $0x1b0] sm:$0xff] }
 0x4dc   : > { %3599 = vmatprep.subr.bf16.mxu1 %v3598_v22  ;;  %v2488_v22 = vld [vmem:[%s5903_s5 + $0x1c8] sm:$0xff]  ;;  %v3640_v31 = vpack.c.bf16 %v2485_v63, %v2483_v3 }
 0x4dd   : > { %v3642_v25 = vpack.c.bf16 %v2490_v7, %v2488_v22 }
 0x4df   : > { %3601 = vmatpush1.bf16.msra.mxu1 %v3600_v17  ;;  %v2487_v17 = vld [vmem:[%s5903_s5 + $0x1c0] sm:$0xff] }
 0x4e0   : > { %3603 = vmatprep.subr.bf16.mxu1 %v3602_v24  ;;  %v2489_v24 = vld [vmem:[%s5903_s5 + $0x1d0] sm:$0xff] }
 0x4e1   : > { %v3644_v56 = vpack.c.bf16 %v2489_v24, %v2487_v17 }
 0x4e3   : > { %3605 = vmatpush1.bf16.msra.mxu1 %v3604_v51 }
 0x4e4   : > { %3607 = vmatprep.subr.bf16.mxu1 %v3606_v36 }
 0x4e7   : > { %3609 = vmatpush1.bf16.msra.mxu1 %v3608_v48 }
 0x4e8   : > { %3611 = vmatprep.subr.bf16.mxu1 %v3610_v21 }
 0x4eb   : > { %3613 = vmatpush1.bf16.msra.mxu1 %v3612_v44 }
 0x4ec   : > { %3615 = vmatprep.subr.bf16.mxu1 %v3614_v13 }
 0x4ef   : > { %3617 = vmatpush1.bf16.msra.mxu1 %v3616_v53 }
 0x4f0   : > { %3619 = vmatprep.subr.bf16.mxu1 %v3618_v42 }
 0x4f3   : > { %3621 = vmatpush1.bf16.msra.mxu1 %v3620_v52 }
 0x4f4   : > { %3623 = vmatprep.subr.bf16.mxu1 %v3622_v61 }
 0x4f7   : > { %3625 = vmatpush1.bf16.msra.mxu1 %v3624_v57 }
 0x4f8   : > { %3627 = vmatprep.subr.bf16.mxu1 %v3626_v15 }
 0x4fb   : > { %3629 = vmatpush1.bf16.msra.mxu1 %v3628_v33 }
 0x4fc   : > { %3631 = vmatprep.subr.bf16.mxu1 %v3630_v30 }
 0x4ff   : > { %3633 = vmatpush1.bf16.msra.mxu1 %v3632_v11 }
 0x500   : > { %3635 = vmatprep.subr.bf16.mxu1 %v3634_v49 }
 0x503   : > { %3637 = vmatpush1.bf16.msra.mxu1 %v3636_v12 }
 0x504   : > { %3639 = vmatprep.subr.bf16.mxu1 %v3638_v0 }
 0x507   : > { %3641 = vmatpush1.bf16.msra.mxu1 %v3640_v31 }
 0x508   : > { %3643 = vmatprep.subr.bf16.mxu1 %v3642_v25 }
 0x50b   : > { %3645 = vmatpush1.bf16.msra.mxu1 %v3644_v56  ;;  %v2492_v56 = vld [vmem:[%s5903_s5 + $0x1e8] sm:$0xff] }
 0x544   : > { %v2000_v34 = vpop.xlane.xlu1 %1999 }
 0x545   : > { %v1998_v55 = vpop.xlane.xlu0 %1997 }
 0x546   : > { %3835 = vrcp.f32 %v1998_v55 }
 0x547   : > { %3837 = vrcp.f32 %v2000_v34 }
 0x548   : > { %v2004_v9 = vpop.xlane.xlu1 %2003 }
 0x549   : > { %v2002_v59 = vpop.xlane.xlu0 %2001 }
 0x54a   : > { %3839 = vrcp.f32 %v2002_v59  ;;  %v2494_v59 = vld [vmem:[%s5903_s5 + $0x1f8] sm:$0xff] }
 0x54b   : > { %3841 = vrcp.f32 %v2004_v9  ;;  %v3646_v9 = vpack.c.bf16 %v2494_v59, %v2492_v56 }
 0x54c   : > { %v2008_v26 = vpop.xlane.xlu1 %2007 }
 0x54d   : > { %v2006_v16 = vpop.xlane.xlu0 %2005  ;;  %3647 = vmatprep.subr.bf16.mxu1 %v3646_v9 }
 0x54e   : > { %3843 = vrcp.f32 %v2006_v16 }
 0x54f   : > { %3845 = vrcp.f32 %v2008_v26 }
 0x550   : > { %v3836_v36 = vpop.eup %3835  ;;  %v2012_v42 = vpop.xlane.xlu1 %2011 }
 0x551   : > { %v3838_v48 = vpop.eup %3837  ;;  %v2010_v47 = vpop.xlane.xlu0 %2009 }
 0x552   : > { %3847 = vrcp.f32 %v2010_v47 }
 0x553   : > { %3849 = vrcp.f32 %v2012_v42 }
 0x554   : > { %v3840_v46 = vpop.eup %3839  ;;  %v2016_v5 = vpop.xlane.xlu1 %2015 }
 0x555   : > { %v3842_v58 = vpop.eup %3841  ;;  %v2014_v52 = vpop.xlane.xlu0 %2013 }
 0x556   : > { %3851 = vrcp.f32 %v2014_v52 }
 0x557   : > { %3853 = vrcp.f32 %v2016_v5 }
 0x558   : > { %v3844_v14 = vpop.eup %3843  ;;  %v2020_v29 = vpop.xlane.xlu1 %2019 }
 0x559   : > { %v3846_v8 = vpop.eup %3845  ;;  %v2018_v40 = vpop.xlane.xlu0 %2017 }
 0x55a   : > { %3855 = vrcp.f32 %v2018_v40  ;;  %v3874_v40 = vld [vmem:[%s4367_s30 + $0x30] sm:$0xff] }
 0x55b   : > { %3857 = vrcp.f32 %v2020_v29  ;;  %v3875_v29 = vld [vmem:[%s4367_s30 + $0x48] sm:$0xff] }
 0x55c   : > { %v3848_v15 = vpop.eup %3847  ;;  %v2024_v50 = vpop.xlane.xlu1 %2023 }
 0x55d   : > { %v3850_v33 = vpop.eup %3849  ;;  %v2022_v11 = vpop.xlane.xlu0 %2021 }
 0x55e   : > { %3859 = vrcp.f32 %v2022_v11  ;;  %v3876_v11 = vld [vmem:[%s4367_s30 + $0x40] sm:$0xff] }
 0x55f   : > { %3861 = vrcp.f32 %v2024_v50 }
 0x560   : > { %v3852_v1 = vpop.eup %3851  ;;  %v2028_v63 = vpop.xlane.xlu1 %2027 }
 0x561   : > { %v3854_v49 = vpop.eup %3853  ;;  %v2026_v12 = vpop.xlane.xlu0 %2025 }
 0x562   : > { %3863 = vrcp.f32 %v2026_v12 }
 0x563   : > { %3865 = vrcp.f32 %v2028_v63 }
 0x564   : > { %v3856_v2 = vpop.eup %3855 }
 0x565   : > { %v3858_v0 = vpop.eup %3857 }
 0x568   : > { %v3860_v22 = vpop.eup %3859 }
 0x569   : > { %v3862_v55 = vpop.eup %3861 }
 0x56c   : > { %v3864_v25 = vpop.eup %3863 }
 0x56d   : > { %v3866_v24 = vpop.eup %3865 }
 0x58c   : > { %v3180_v51 = vpop.f32.mrb[96].mxu0 }
 0x58d   : > { %v2111_v23 = vpop.f32.mrb[97].mxu0  ;;  %v2191_v10 = vmul.f32 %v3838_v48, %v3180_v51  ;;  %v2491_v51 = vld [vmem:[%s5903_s5 + $0x1e0] sm:$0xff] }
 0x58e   : > { %v2190_v37 = vmul.f32 %v3836_v36, %v2111_v23  ;;  %v1069_v23 = vld [vmem:[%s5902_s4] sm:$0x3] }
 0x590   : > { %v3183_v19 = vpop.f32.mrb[98].mxu0  ;;  %2303 = vmatmul.mubr.f32.vlgmr.msra.gmra.mrb[64].mxu0 %v2190_v37  ;;  %v5917_v37 = vld [vmem:[#allocation4_spill] sm:$0xff] }
 0x591   : > { %v2121_v21 = vpop.f32.mrb[99].mxu0  ;;  %2308 = vmatprep.mubr.f32.mxu0 %v3923_v60  ;;  %v2193_v53 = vmul.f32 %v3842_v58, %v3183_v19  ;;  %v5918_v16 = vsub.s32 1, %v5917_v37  ;;  %v5919_v48 = vsub.s32 0, %v5917_v37 }
 0x592   : > { %v2192_v13 = vmul.f32 %v3840_v46, %v2121_v21 }
 0x593   : > { %v5582_v19 = vrot.slane %v1069_v23, %v5918_v16  ;;  %v5586_v21 = vrot.slane %v1069_v23, %v5919_v48  ;;  %v3882_v23 = vld [vmem:[%s4367_s30 + $0x70] sm:$0xff] }
 0x594   : > { %v3186_v43 = vpop.f32.mrb[100].mxu0  ;;  %2309 = vmatmul.mubr.f32.gmra.mrb[66].mxu0 %v2191_v10  ;;  %v3867_v10 = vld [vmem:[%s4367_s30 + $0x8] sm:$0xff] }
 0x595   : > { %v2131_v44 = vpop.f32.mrb[101].mxu0  ;;  %2314 = vmatprep.mubr.f32.mxu0 %v3923_v60  ;;  %v2195_v39 = vmul.f32 %v3846_v8, %v3186_v43  ;;  %v1082_v26 = vadd.f32 %v3867_v10, %v5582_v19  ;;  %v3868_v43 = vld [vmem:[%s4367_s30] sm:$0xff]  ;;  %v1095_v37 = vadd.f32 %v3882_v23, %v5586_v21  ;;  %v3894_v23 = vld [vmem:[%s4367_s30 + $0xd0] sm:$0xff] }
 0x596   : > { %v2194_v35 = vmul.f32 %v3844_v14, %v2131_v44  ;;  %v1081_v46 = vadd.f32 %v3868_v43, %v5586_v21  ;;  %v3872_v8 = vld [vmem:[%s4367_s30 + $0x20] sm:$0xff] }
 0x598   : > { %v3189_v20 = vpop.f32.mrb[102].mxu0  ;;  %2315 = vmatmul.mubr.f32.gmra.mrb[68].mxu0 %v2192_v13 }
 0x599   : > { %v2141_v18 = vpop.f32.mrb[103].mxu0  ;;  %2320 = vmatprep.mubr.f32.mxu0 %v3923_v60  ;;  %v2197_v41 = vmul.f32 %v3850_v33, %v3189_v20  ;;  %v3869_v20 = vld [vmem:[%s4367_s30 + $0x18] sm:$0xff] }
 0x59a   : > { %v2196_v62 = vmul.f32 %v3848_v15, %v2141_v18  ;;  %v1084_v58 = vadd.f32 %v3869_v20, %v5582_v19  ;;  %v3873_v15 = vld [vmem:[%s4367_s30 + $0x38] sm:$0xff] }
 0x59c   : > { %v3192_v6 = vpop.f32.mrb[104].mxu0  ;;  %2321 = vmatmul.mubr.f32.gmra.mrb[70].mxu0 %v2193_v53  ;;  %v3870_v53 = vld [vmem:[%s4367_s30 + $0x10] sm:$0xff] }
 0x59d   : > { %v2151_v27 = vpop.f32.mrb[105].mxu0  ;;  %2326 = vmatprep.mubr.f32.mxu0 %v3923_v60  ;;  %v2199_v45 = vmul.f32 %v3854_v49, %v3192_v6  ;;  %v1083_v42 = vadd.f32 %v3870_v53, %v5586_v21  ;;  %v1089_v49 = vadd.f32 %v3876_v11, %v5586_v21 }
 0x59e   : > { %v2198_v54 = vmul.f32 %v3852_v1, %v2151_v27  ;;  %v1090_v1 = vadd.f32 %v3875_v29, %v5582_v19 }
 0x5a0   : > { %v3195_v61 = vpop.f32.mrb[106].mxu0  ;;  %2327 = vmatmul.mubr.f32.gmra.mrb[72].mxu0 %v2194_v35  ;;  %v3871_v35 = vld [vmem:[%s4367_s30 + $0x28] sm:$0xff] }
 0x5a1   : > { %v2161_v28 = vpop.f32.mrb[107].mxu0  ;;  %2332 = vmatprep.mubr.f32.mxu0 %v3923_v60  ;;  %v2201_v3 = vmul.f32 %v3858_v0, %v3195_v61  ;;  %v1086_v52 = vadd.f32 %v3871_v35, %v5582_v19  ;;  %v3886_v35 = vld [vmem:[%s4367_s30 + $0x90] sm:$0xff] }
 0x5a2   : > { %v2200_v4 = vmul.f32 %v3856_v2, %v2161_v28  ;;  %v1085_v28 = vadd.f32 %v3872_v8, %v5586_v21 }
 0x5a4   : > { %v3198_v57 = vpop.f32.mrb[108].mxu0  ;;  %2333 = vmatmul.mubr.f32.gmra.mrb[74].mxu0 %v2195_v39 }
 0x5a5   : > { %v2171_v38 = vpop.f32.mrb[109].mxu0  ;;  %2338 = vmatprep.mubr.f32.mxu0 %v3923_v60  ;;  %v2203_v31 = vmul.f32 %v3862_v55, %v3198_v57 }
 0x5a6   : > { %v2202_v7 = vmul.f32 %v3860_v22, %v2171_v38  ;;  %v1088_v38 = vadd.f32 %v3873_v15, %v5582_v19 }
 0x5a8   : > { %v3201_v32 = vpop.f32.mrb[110].mxu0  ;;  %2339 = vmatmul.mubr.f32.gmra.mrb[76].mxu0 %v2196_v62 }
 0x5a9   : > { %v2181_v30 = vpop.f32.mrb[111].mxu0  ;;  %2344 = vmatprep.mubr.f32.mxu0 %v3923_v60  ;;  %v2205_v34 = vmul.f32 %v3866_v24, %v3201_v32  ;;  %v1087_v32 = vadd.f32 %v3874_v40, %v5586_v21  ;;  %v3880_v24 = vld [vmem:[%s4367_s30 + $0x60] sm:$0xff] }
 0x5aa   : > { %v2204_v17 = vmul.f32 %v3864_v25, %v2181_v30  ;;  %v3888_v40 = vld [vmem:[%s4367_s30 + $0xa0] sm:$0xff] }
 0x5ac   : > { %2345 = vmatmul.mubr.f32.gmra.mrb[78].mxu0 %v2197_v41 }
 0x5ad   : > { %2350 = vmatprep.mubr.f32.mxu0 %v3923_v60 }
 0x5b0   : > { %2351 = vmatmul.mubr.f32.gmra.mrb[80].mxu0 %v2198_v54 }
 0x5b1   : > { %2356 = vmatprep.mubr.f32.mxu0 %v3923_v60 }
 0x5b4   : > { %2357 = vmatmul.mubr.f32.gmra.mrb[82].mxu0 %v2199_v45 }
 0x5b5   : > { %2362 = vmatprep.mubr.f32.mxu0 %v3923_v60 }
 0x5b8   : > { %2363 = vmatmul.mubr.f32.gmra.mrb[84].mxu0 %v2200_v4  ;;  %v3877_v4 = vld [vmem:[%s4367_s30 + $0x58] sm:$0xff] }
 0x5b9   : > { %2368 = vmatprep.mubr.f32.mxu0 %v3923_v60  ;;  %v1092_v12 = vadd.f32 %v3877_v4, %v5582_v19 }
 0x5bc   : > { %2369 = vmatmul.mubr.f32.gmra.mrb[86].mxu0 %v2201_v3  ;;  %v3878_v3 = vld [vmem:[%s4367_s30 + $0x50] sm:$0xff] }
 0x5bd   : > { %2374 = vmatprep.mubr.f32.mxu0 %v3923_v60  ;;  %v1091_v63 = vadd.f32 %v3878_v3, %v5586_v21 }
 0x5c0   : > { %2375 = vmatmul.mubr.f32.gmra.mrb[88].mxu0 %v2202_v7 }
 0x5c1   : > { %2380 = vmatprep.mubr.f32.mxu0 %v3923_v60 }
 0x5c4   : > { %2381 = vmatmul.mubr.f32.gmra.mrb[90].mxu0 %v2203_v31  ;;  %v3879_v31 = vld [vmem:[%s4367_s30 + $0x68] sm:$0xff] }
 0x5c5   : > { %2386 = vmatprep.mubr.f32.mxu0 %v3923_v60  ;;  %v1094_v25 = vadd.f32 %v3879_v31, %v5582_v19  ;;  %v3892_v31 = vld [vmem:[%s4367_s30 + $0xc0] sm:$0xff] }
 0x5c8   : > { %2387 = vmatmul.mubr.f32.gmra.mrb[92].mxu0 %v2204_v17 }
 0x5c9   : > { %2392 = vmatprep.mubr.f32.mxu0 %v3923_v60  ;;  %v2493_v60 = vld [vmem:[%s5903_s5 + $0x1f0] sm:$0xff] }
 0x5ca   : > { %v3648_v36 = vpack.c.bf16 %v2493_v60, %v2491_v51  ;;  %v3881_v51 = vld [vmem:[%s4367_s30 + $0x78] sm:$0xff] }
 0x5cb   : > { %v1096_v60 = vadd.f32 %v3881_v51, %v5582_v19 }
 0x5cc   : > { %2393 = vmatmul.mubr.f32.gmra.mrb[94].mxu0 %v2205_v34  ;;  %3649 = vmatpush1.bf16.msra.mxu1 %v3648_v36  ;;  %v1093_v34 = vadd.f32 %v3880_v24, %v5586_v21 }
 0x663   : > { %v2304_v44 = vpop.f32.mrb[64].mxu0 }
 0x664   : > { %v2306_v13 = vpop.f32.mrb[65].mxu0  ;;  %v5596_v18 = vadd.f32 %v2304_v44, %v1081_v46  ;;  %v3884_v44 = vld [vmem:[%s4367_s30 + $0x80] sm:$0xff] }
 0x665   : > { %v5592_v47 = vadd.f32 %v2306_v13, %v1082_v26  ;;  %v3883_v26 = vld [vmem:[%s4367_s30 + $0x88] sm:$0xff]  ;;  %v1097_v13 = vadd.f32 %v3884_v44, %v5586_v21 }
 0x666   : > { %v1098_v43 = vadd.f32 %v3883_v26, %v5582_v19 }
 0x667   : > { %v2310_v6 = vpop.f32.mrb[66].mxu0  ;;  %2559 = vmatprep.mubr.f32.mxu1 %v5592_v47 }
 0x668   : > { %v2312_v14 = vpop.f32.mrb[67].mxu0  ;;  %2560 = vmatmul.mubr.f32.vlgmr.msra.gmra.mrb[80].mxu1 %v5596_v18  ;;  %v5606_v61 = vadd.f32 %v2310_v6, %v1083_v42  ;;  %v3885_v42 = vld [vmem:[%s4367_s30 + $0x98] sm:$0xff] }
 0x669   : > { %v5602_v27 = vadd.f32 %v2312_v14, %v1084_v58  ;;  %v1100_v6 = vadd.f32 %v3885_v42, %v5582_v19 }
 0x66b   : > { %v2316_v39 = vpop.f32.mrb[68].mxu0  ;;  %2565 = vmatprep.mubr.f32.mxu1 %v5602_v27 }
 0x66c   : > { %v2318_v5 = vpop.f32.mrb[69].mxu0  ;;  %2566 = vmatmul.mubr.f32.gmra.mrb[82].mxu1 %v5606_v61  ;;  %v5616_v62 = vadd.f32 %v2316_v39, %v1085_v28 }
 0x66d   : > { %v5612_v57 = vadd.f32 %v2318_v5, %v1086_v52  ;;  %v1099_v52 = vadd.f32 %v3886_v35, %v5586_v21  ;;  %v3887_v5 = vld [vmem:[%s4367_s30 + $0xa8] sm:$0xff] }
 0x66e   : > { %v1102_v15 = vadd.f32 %v3887_v5, %v5582_v19  ;;  %v3898_v5 = vld [vmem:[%s4367_s30 + $0xf0] sm:$0xff] }
 0x66f   : > { %v2322_v33 = vpop.f32.mrb[70].mxu0  ;;  %2571 = vmatprep.mubr.f32.mxu1 %v5612_v57 }
 0x670   : > { %v2324_v30 = vpop.f32.mrb[71].mxu0  ;;  %2572 = vmatmul.mubr.f32.gmra.mrb[84].mxu1 %v5616_v62  ;;  %v5626_v54 = vadd.f32 %v2322_v33, %v1087_v32  ;;  %v1101_v32 = vadd.f32 %v3888_v40, %v5586_v21 }
 0x671   : > { %v5622_v41 = vadd.f32 %v2324_v30, %v1088_v38 }
 0x673   : > { %v2328_v45 = vpop.f32.mrb[72].mxu0  ;;  %2577 = vmatprep.mubr.f32.mxu1 %v5622_v41 }
 0x674   : > { %v2330_v50 = vpop.f32.mrb[73].mxu0  ;;  %2578 = vmatmul.mubr.f32.gmra.mrb[86].mxu1 %v5626_v54  ;;  %v5636_v0 = vadd.f32 %v2328_v45, %v1089_v49  ;;  %v3890_v45 = vld [vmem:[%s4367_s30 + $0xb0] sm:$0xff] }
 0x675   : > { %v5632_v2 = vadd.f32 %v2330_v50, %v1090_v1  ;;  %v3889_v1 = vld [vmem:[%s4367_s30 + $0xb8] sm:$0xff]  ;;  %v1103_v50 = vadd.f32 %v3890_v45, %v5586_v21 }
 0x676   : > { %v1104_v11 = vadd.f32 %v3889_v1, %v5582_v19 }
 0x677   : > { %v2334_v22 = vpop.f32.mrb[74].mxu0  ;;  %2583 = vmatprep.mubr.f32.mxu1 %v5632_v2 }
 0x678   : > { %v2336_v7 = vpop.f32.mrb[75].mxu0  ;;  %2584 = vmatmul.mubr.f32.gmra.mrb[88].mxu1 %v5636_v0  ;;  %v5646_v17 = vadd.f32 %v2334_v22, %v1091_v63  ;;  %v3891_v63 = vld [vmem:[%s4367_s30 + $0xc8] sm:$0xff] }
 0x679   : > { %v5642_v55 = vadd.f32 %v2336_v7, %v1092_v12  ;;  %v1106_v22 = vadd.f32 %v3891_v63, %v5582_v19 }
 0x67b   : > { %v2340_v56 = vpop.f32.mrb[76].mxu0  ;;  %2589 = vmatprep.mubr.f32.mxu1 %v5642_v55 }
 0x67c   : > { %v2342_v59 = vpop.f32.mrb[77].mxu0  ;;  %2590 = vmatmul.mubr.f32.gmra.mrb[90].mxu1 %v5646_v17  ;;  %v5656_v36 = vadd.f32 %v2340_v56, %v1093_v34 }
 0x67d   : > { %v5652_v9 = vadd.f32 %v2342_v59, %v1094_v25  ;;  %v1105_v25 = vadd.f32 %v3892_v31, %v5586_v21  ;;  %v3893_v59 = vld [vmem:[%s4367_s30 + $0xd8] sm:$0xff] }
 0x67e   : > { %v1108_v51 = vadd.f32 %v3893_v59, %v5582_v19 }
 0x67f   : > { %v2346_v16 = vpop.f32.mrb[78].mxu0  ;;  %2595 = vmatprep.mubr.f32.mxu1 %v5652_v9 }
 0x680   : > { %v2348_v48 = vpop.f32.mrb[79].mxu0  ;;  %2596 = vmatmul.mubr.f32.gmra.mrb[92].mxu1 %v5656_v36  ;;  %v5666_v46 = vadd.f32 %v2346_v16, %v1095_v37  ;;  %v1107_v37 = vadd.f32 %v3894_v23, %v5586_v21 }
 0x681   : > { %v5662_v10 = vadd.f32 %v2348_v48, %v1096_v60 }
 0x683   : > { %v2352_v20 = vpop.f32.mrb[80].mxu0  ;;  %2601 = vmatprep.mubr.f32.mxu1 %v5662_v10 }
 0x684   : > { %v2354_v58 = vpop.f32.mrb[81].mxu0  ;;  %2602 = vmatmul.mubr.f32.gmra.mrb[94].mxu1 %v5666_v46  ;;  %v5676_v14 = vadd.f32 %v2352_v20, %v1097_v13  ;;  %v3896_v20 = vld [vmem:[%s4367_s30 + $0xe0] sm:$0xff] }
 0x685   : > { %v5672_v53 = vadd.f32 %v2354_v58, %v1098_v43  ;;  %v3895_v43 = vld [vmem:[%s4367_s30 + $0xe8] sm:$0xff]  ;;  %v1109_v58 = vadd.f32 %v3896_v20, %v5586_v21 }
 0x686   : > { %v1110_v44 = vadd.f32 %v3895_v43, %v5582_v19 }
 0x687   : > { %v2358_v8 = vpop.f32.mrb[82].mxu0  ;;  %2607 = vmatprep.mubr.f32.mxu1 %v5672_v53 }
 0x688   : > { %v2360_v28 = vpop.f32.mrb[83].mxu0  ;;  %2608 = vmatmul.mubr.f32.gmra.mrb[96].mxu1 %v5676_v14  ;;  %v5686_v38 = vadd.f32 %v2358_v8, %v1099_v52  ;;  %v3897_v52 = vld [vmem:[%s4367_s30 + $0xf8] sm:$0xff]  ;;  %s5751_s30 = scalar_lea.vmem [#allocation3], %s4322_s11  ;;  %s2849_s11 = sshll.u32 (%p3989_p5), %s2833_s24, 4 }
 0x689   : > { %v5682_v39 = vadd.f32 %v2360_v28, %v1100_v6  ;;  %v1112_v8 = vadd.f32 %v3897_v52, %v5582_v19  ;;  %s5825_s29 = scalar_lea.vmem (%p3989_p5), %s5904_s6, %s2849_s11 }
 0x68b   : > { %v2364_v33 = vpop.f32.mrb[84].mxu0  ;;  %2613 = vmatprep.mubr.f32.mxu1 %v5682_v39 }
 0x68c   : > { %v2366_v30 = vpop.f32.mrb[85].mxu0  ;;  %2614 = vmatmul.mubr.f32.gmra.mrb[98].mxu1 %v5686_v38  ;;  %v5696_v49 = vadd.f32 %v2364_v33, %v1101_v32 }
 0x68d   : > { %v5692_v29 = vadd.f32 %v2366_v30, %v1102_v15  ;;  %v1111_v15 = vadd.f32 %v3898_v5, %v5586_v21 }
 0x68f   : > { %v2370_v4 = vpop.f32.mrb[86].mxu0  ;;  %2619 = vmatprep.mubr.f32.mxu1 %v5692_v29 }
 0x690   : > { %v2372_v12 = vpop.f32.mrb[87].mxu0  ;;  %2620 = vmatmul.mubr.f32.gmra.mrb[100].mxu1 %v5696_v49  ;;  %v5706_v7 = vadd.f32 %v2370_v4, %v1103_v50 }
 0x691   : > { %v5702_v3 = vadd.f32 %v2372_v12, %v1104_v11 }
 0x693   : > { %v2376_v24 = vpop.f32.mrb[88].mxu0  ;;  %2625 = vmatprep.mubr.f32.mxu1 %v5702_v3 }
 0x694   : > { %v2378_v34 = vpop.f32.mrb[89].mxu0  ;;  %2626 = vmatmul.mubr.f32.gmra.mrb[102].mxu1 %v5706_v7  ;;  %v5716_v60 = vadd.f32 %v2376_v24, %v1105_v25 }
 0x695   : > { %v5712_v56 = vadd.f32 %v2378_v34, %v1106_v22 }
 0x697   : > { %v2382_v16 = vpop.f32.mrb[90].mxu0  ;;  %2631 = vmatprep.mubr.f32.mxu1 %v5712_v56 }
 0x698   : > { %v2384_v48 = vpop.f32.mrb[91].mxu0  ;;  %2632 = vmatmul.mubr.f32.gmra.mrb[104].mxu1 %v5716_v60  ;;  %v5726_v13 = vadd.f32 %v2382_v16, %v1107_v37 }
 0x699   : > { %v5722_v26 = vadd.f32 %v2384_v48, %v1108_v51 }
 0x69b   : > { %v2388_v42 = vpop.f32.mrb[92].mxu0  ;;  %2637 = vmatprep.mubr.f32.mxu1 %v5722_v26 }
 0x69c   : > { %v2390_v6 = vpop.f32.mrb[93].mxu0  ;;  %2638 = vmatmul.mubr.f32.gmra.mrb[106].mxu1 %v5726_v13  ;;  %v5736_v28 = vadd.f32 %v2388_v42, %v1109_v58 }
 0x69d   : > { %v5732_v35 = vadd.f32 %v2390_v6, %v1110_v44 }
 0x69f   : > { %v2394_v40 = vpop.f32.mrb[94].mxu0  ;;  %2643 = vmatprep.mubr.f32.mxu1 %v5732_v35 }
 0x6a0   : > { %v2396_v32 = vpop.f32.mrb[95].mxu0  ;;  %2644 = vmatmul.mubr.f32.gmra.mrb[108].mxu1 %v5736_v28  ;;  %v5744_v30 = vadd.f32 %v2394_v40, %v1111_v15 }
 0x6a1   : > { %v5742_v33 = vadd.f32 %v2396_v32, %v1112_v8 }
 0x6a3   : > { %2649 = vmatprep.mubr.f32.mxu1 %v5742_v33 }
 0x6a4   : > { %2650 = vmatmul.mubr.f32.gmra.mrb[110].mxu1 %v5744_v30 }
 0x73b   : > { %v2561_v19 = vpop.f32.mrb[80].mxu1 }
 0x73c   : > { %v2562_v1 = vadd.f32 %v5596_v18, %v2561_v19  ;;  %v2563_v11 = vpop.f32.mrb[81].mxu1 }
 0x73d   : > { %v2564_v21 = vadd.f32 %v5592_v47, %v2563_v11 }
 0x73e   : > { %2656 = vst [vmem:[%s5751_s30] sm:$0xff] %v2562_v1 }
 0x73f   : > { %2657 = vst [vmem:[%s5751_s30 + $0x8] sm:$0xff] %v2564_v21  ;;  %v2567_v45 = vpop.f32.mrb[82].mxu1 }
 0x740   : > { %v2568_v50 = vadd.f32 %v5606_v61, %v2567_v45  ;;  %v2569_v4 = vpop.f32.mrb[83].mxu1 }
 0x741   : > { %v2570_v18 = vadd.f32 %v5602_v27, %v2569_v4 }
 0x742   : > { %2658 = vst [vmem:[%s5751_s30 + $0x10] sm:$0xff] %v2568_v50 }
 0x743   : > { %2659 = vst [vmem:[%s5751_s30 + $0x18] sm:$0xff] %v2570_v18  ;;  %v2573_v47 = vpop.f32.mrb[84].mxu1 }
 0x744   : > { %v2574_v12 = vadd.f32 %v5616_v62, %v2573_v47  ;;  %v2575_v63 = vpop.f32.mrb[85].mxu1 }
 0x745   : > { %v2576_v22 = vadd.f32 %v5612_v57, %v2575_v63 }
 0x746   : > { %2660 = vst [vmem:[%s5751_s30 + $0x20] sm:$0xff] %v2574_v12 }
 0x747   : > { %2661 = vst [vmem:[%s5751_s30 + $0x28] sm:$0xff] %v2576_v22  ;;  %v2579_v31 = vpop.f32.mrb[86].mxu1 }
 0x748   : > { %v2580_v61 = vadd.f32 %v5626_v54, %v2579_v31  ;;  %v2581_v25 = vpop.f32.mrb[87].mxu1 }
 0x749   : > { %v2582_v27 = vadd.f32 %v5622_v41, %v2581_v25 }
 0x74a   : > { %2662 = vst [vmem:[%s5751_s30 + $0x30] sm:$0xff] %v2580_v61 }
 0x74b   : > { %2663 = vst [vmem:[%s5751_s30 + $0x38] sm:$0xff] %v2582_v27  ;;  %v2585_v24 = vpop.f32.mrb[88].mxu1 }
 0x74c   : > { %v2586_v62 = vadd.f32 %v5636_v0, %v2585_v24  ;;  %v2587_v34 = vpop.f32.mrb[89].mxu1 }
 0x74d   : > { %v2588_v57 = vadd.f32 %v5632_v2, %v2587_v34 }
 0x74e   : > { %2664 = vst [vmem:[%s5751_s30 + $0x40] sm:$0xff] %v2586_v62  ;;  %v2720_v50 = vld [vmem:[%s5751_s30 + $0x28] sm:$0xff] (%p3989_p5) }
 0x74f   : > { %2665 = vst [vmem:[%s5751_s30 + $0x48] sm:$0xff] %v2588_v57  ;;  %v2591_v59 = vpop.f32.mrb[90].mxu1  ;;  %2721 = vst [vmem:[%s5825_s29 + $0x48] sm:$0xff] (%p3989_p5), %v2720_v50 }
 0x750   : > { %v2592_v54 = vadd.f32 %v5646_v17, %v2591_v59  ;;  %v2593_v51 = vpop.f32.mrb[91].mxu1 }
 0x751   : > { %v2594_v41 = vadd.f32 %v5642_v55, %v2593_v51  ;;  %v2722_v4 = vld [vmem:[%s5751_s30 + $0x30] sm:$0xff] (%p3989_p5) }
 0x752   : > { %2666 = vst [vmem:[%s5751_s30 + $0x50] sm:$0xff] %v2592_v54  ;;  %v2724_v18 = vld [vmem:[%s5751_s30 + $0x38] sm:$0xff] (%p3989_p5)  ;;  %2723 = vst [vmem:[%s5825_s29 + $0x60] sm:$0xff] (%p3989_p5), %v2722_v4 }
 0x753   : > { %2667 = vst [vmem:[%s5751_s30 + $0x58] sm:$0xff] %v2594_v41  ;;  %v2597_v23 = vpop.f32.mrb[92].mxu1  ;;  %2725 = vst [vmem:[%s5825_s29 + $0x68] sm:$0xff] (%p3989_p5), %v2724_v18 }
 0x754   : > { %v2598_v0 = vadd.f32 %v5656_v36, %v2597_v23  ;;  %v2599_v37 = vpop.f32.mrb[93].mxu1 }
 0x755   : > { %v2600_v2 = vadd.f32 %v5652_v9, %v2599_v37  ;;  %v2726_v47 = vld [vmem:[%s5751_s30 + $0x40] sm:$0xff] (%p3989_p5) }
 0x756   : > { %2668 = vst [vmem:[%s5751_s30 + $0x60] sm:$0xff] %v2598_v0  ;;  %2727 = vst [vmem:[%s5825_s29 + $0x80] sm:$0xff] (%p3989_p5), %v2726_v47  ;;  %v2728_v12 = vld [vmem:[%s5751_s30 + $0x48] sm:$0xff] (%p3989_p5) }
 0x757   : > { %2669 = vst [vmem:[%s5751_s30 + $0x68] sm:$0xff] %v2600_v2  ;;  %v2603_v16 = vpop.f32.mrb[94].mxu1  ;;  %2729 = vst [vmem:[%s5825_s29 + $0x88] sm:$0xff] (%p3989_p5), %v2728_v12 }
 0x758   : > { %v2604_v17 = vadd.f32 %v5666_v46, %v2603_v16  ;;  %v2605_v48 = vpop.f32.mrb[95].mxu1 }
 0x759   : > { %v2606_v55 = vadd.f32 %v5662_v10, %v2605_v48  ;;  %v2730_v63 = vld [vmem:[%s5751_s30 + $0x50] sm:$0xff] (%p3989_p5) }
 0x75a   : > { %2670 = vst [vmem:[%s5751_s30 + $0x70] sm:$0xff] %v2604_v17  ;;  %v2732_v22 = vld [vmem:[%s5751_s30 + $0x58] sm:$0xff] (%p3989_p5)  ;;  %2731 = vst [vmem:[%s5825_s29 + $0xa0] sm:$0xff] (%p3989_p5), %v2730_v63 }
 0x75b   : > { %2671 = vst [vmem:[%s5751_s30 + $0x78] sm:$0xff] %v2606_v55  ;;  %v2609_v43 = vpop.f32.mrb[96].mxu1  ;;  %2733 = vst [vmem:[%s5825_s29 + $0xa8] sm:$0xff] (%p3989_p5), %v2732_v22 }
 0x75c   : > { %v2610_v36 = vadd.f32 %v5676_v14, %v2609_v43  ;;  %v2611_v44 = vpop.f32.mrb[97].mxu1 }
 0x75d   : > { %v2612_v9 = vadd.f32 %v5672_v53, %v2611_v44  ;;  %v2734_v31 = vld [vmem:[%s5751_s30 + $0x60] sm:$0xff] (%p3989_p5) }
 0x75e   : > { %2672 = vst [vmem:[%s5751_s30 + $0x80] sm:$0xff] %v2610_v36  ;;  %v2736_v61 = vld [vmem:[%s5751_s30 + $0x68] sm:$0xff] (%p3989_p5)  ;;  %2735 = vst [vmem:[%s5825_s29 + $0xc0] sm:$0xff] (%p3989_p5), %v2734_v31 }
 0x75f   : > { %2673 = vst [vmem:[%s5751_s30 + $0x88] sm:$0xff] %v2612_v9  ;;  %v2615_v20 = vpop.f32.mrb[98].mxu1  ;;  %2737 = vst [vmem:[%s5825_s29 + $0xc8] sm:$0xff] (%p3989_p5), %v2736_v61 }
 0x760   : > { %v2616_v46 = vadd.f32 %v5686_v38, %v2615_v20  ;;  %v2617_v58 = vpop.f32.mrb[99].mxu1 }
 0x761   : > { %v2618_v10 = vadd.f32 %v5682_v39, %v2617_v58  ;;  %v2738_v25 = vld [vmem:[%s5751_s30 + $0x70] sm:$0xff] (%p3989_p5) }
 0x762   : > { %2674 = vst [vmem:[%s5751_s30 + $0x90] sm:$0xff] %v2616_v46  ;;  %2739 = vst [vmem:[%s5825_s29 + $0xe0] sm:$0xff] (%p3989_p5), %v2738_v25  ;;  %v2740_v27 = vld [vmem:[%s5751_s30 + $0x78] sm:$0xff] (%p3989_p5) }
 0x763   : > { %2675 = vst [vmem:[%s5751_s30 + $0x98] sm:$0xff] %v2618_v10  ;;  %v2621_v42 = vpop.f32.mrb[100].mxu1  ;;  %2741 = vst [vmem:[%s5825_s29 + $0xe8] sm:$0xff] (%p3989_p5), %v2740_v27 }
 0x764   : > { %v2622_v14 = vadd.f32 %v5696_v49, %v2621_v42  ;;  %v2623_v6 = vpop.f32.mrb[101].mxu1 }
 0x765   : > { %v2624_v53 = vadd.f32 %v5692_v29, %v2623_v6  ;;  %v2742_v24 = vld [vmem:[%s5751_s30 + $0x80] sm:$0xff] (%p3989_p5) }
 0x766   : > { %2676 = vst [vmem:[%s5751_s30 + $0xa0] sm:$0xff] %v2622_v14  ;;  %v2744_v62 = vld [vmem:[%s5751_s30 + $0x88] sm:$0xff] (%p3989_p5)  ;;  %2743 = vst [vmem:[%s5825_s29 + $0x100] sm:$0xff] (%p3989_p5), %v2742_v24 }
 0x767   : > { %2677 = vst [vmem:[%s5751_s30 + $0xa8] sm:$0xff] %v2624_v53  ;;  %v2627_v52 = vpop.f32.mrb[102].mxu1  ;;  %2745 = vst [vmem:[%s5825_s29 + $0x108] sm:$0xff] (%p3989_p5), %v2744_v62 }
 0x768   : > { %v2628_v38 = vadd.f32 %v5706_v7, %v2627_v52  ;;  %v2629_v8 = vpop.f32.mrb[103].mxu1 }
 0x769   : > { %v2630_v39 = vadd.f32 %v5702_v3, %v2629_v8  ;;  %v2746_v34 = vld [vmem:[%s5751_s30 + $0x90] sm:$0xff] (%p3989_p5) }
 0x76a   : > { %2678 = vst [vmem:[%s5751_s30 + $0xb0] sm:$0xff] %v2628_v38  ;;  %v2748_v57 = vld [vmem:[%s5751_s30 + $0x98] sm:$0xff] (%p3989_p5)  ;;  %2747 = vst [vmem:[%s5825_s29 + $0x120] sm:$0xff] (%p3989_p5), %v2746_v34 }
 0x76b   : > { %2679 = vst [vmem:[%s5751_s30 + $0xb8] sm:$0xff] %v2630_v39  ;;  %v2633_v5 = vpop.f32.mrb[104].mxu1  ;;  %2749 = vst [vmem:[%s5825_s29 + $0x128] sm:$0xff] (%p3989_p5), %v2748_v57 }
 0x76c   : > { %v2634_v49 = vadd.f32 %v5716_v60, %v2633_v5  ;;  %v2635_v15 = vpop.f32.mrb[105].mxu1 }
 0x76d   : > { %v2636_v29 = vadd.f32 %v5712_v56, %v2635_v15  ;;  %v2750_v59 = vld [vmem:[%s5751_s30 + $0xa0] sm:$0xff] (%p3989_p5) }
 0x76e   : > { %2680 = vst [vmem:[%s5751_s30 + $0xc0] sm:$0xff] %v2634_v49  ;;  %2751 = vst [vmem:[%s5825_s29 + $0x140] sm:$0xff] (%p3989_p5), %v2750_v59  ;;  %v2752_v54 = vld [vmem:[%s5751_s30 + $0xa8] sm:$0xff] (%p3989_p5) }
 0x76f   : > { %2681 = vst [vmem:[%s5751_s30 + $0xc8] sm:$0xff] %v2636_v29  ;;  %v2639_v40 = vpop.f32.mrb[106].mxu1  ;;  %2753 = vst [vmem:[%s5825_s29 + $0x148] sm:$0xff] (%p3989_p5), %v2752_v54 }
 0x770   : > { %v2640_v7 = vadd.f32 %v5726_v13, %v2639_v40  ;;  %v2641_v32 = vpop.f32.mrb[107].mxu1 }
 0x771   : > { %v2642_v3 = vadd.f32 %v5722_v26, %v2641_v32  ;;  %v2710_v26 = vld [vmem:[%s5751_s30] sm:$0xff] (%p3989_p5)  ;;  %v2754_v51 = vld [vmem:[%s5751_s30 + $0xb0] sm:$0xff] (%p3989_p5) }
 0x772   : > { %2682 = vst [vmem:[%s5751_s30 + $0xd0] sm:$0xff] %v2640_v7  ;;  %2711 = vst [vmem:[%s5825_s29] sm:$0xff] (%p3989_p5), %v2710_v26  ;;  %v2756_v41 = vld [vmem:[%s5751_s30 + $0xb8] sm:$0xff] (%p3989_p5) }
 0x773   : > { %2683 = vst [vmem:[%s5751_s30 + $0xd8] sm:$0xff] %v2642_v3  ;;  %v2645_v19 = vpop.f32.mrb[108].mxu1  ;;  %2755 = vst [vmem:[%s5825_s29 + $0x160] sm:$0xff] (%p3989_p5), %v2754_v51 }
 0x774   : > { %v2646_v1 = vadd.f32 %v5736_v28, %v2645_v19  ;;  %v2647_v60 = vpop.f32.mrb[109].mxu1  ;;  %v2714_v28 = vld [vmem:[%s5751_s30 + $0x10] sm:$0xff] (%p3989_p5)  ;;  %2757 = vst [vmem:[%s5825_s29 + $0x168] sm:$0xff] (%p3989_p5), %v2756_v41 }
 0x775   : > { %v2648_v11 = vadd.f32 %v5732_v35, %v2647_v60  ;;  %2694 = sbr.rel (!%p3989_p5) target bundleno = 1924 (0x784), region = 71  ;;  %v2712_v35 = vld [vmem:[%s5751_s30 + $0x8] sm:$0xff] (%p3989_p5)  ;;  %2715 = vst [vmem:[%s5825_s29 + $0x20] sm:$0xff] (%p3989_p5), %v2714_v28  ;;  %v2758_v23 = vld [vmem:[%s5751_s30 + $0xc0] sm:$0xff] (%p3989_p5) }
 0x776   : > { %2684 = vst [vmem:[%s5751_s30 + $0xe0] sm:$0xff] %v2646_v1  ;;  %2713 = vst [vmem:[%s5825_s29 + $0x8] sm:$0xff] (%p3989_p5), %v2712_v35  ;;  %v2760_v0 = vld [vmem:[%s5751_s30 + $0xc8] sm:$0xff] (%p3989_p5) }
 0x777   : > { %2685 = vst [vmem:[%s5751_s30 + $0xe8] sm:$0xff] %v2648_v11  ;;  %v2651_v56 = vpop.f32.mrb[110].mxu1  ;;  %2759 = vst [vmem:[%s5825_s29 + $0x180] sm:$0xff] (%p3989_p5), %v2758_v23 }
 0x778   : > { %v2652_v21 = vadd.f32 %v5744_v30, %v2651_v56  ;;  %v2653_v45 = vpop.f32.mrb[111].mxu1  ;;  %v2718_v30 = vld [vmem:[%s5751_s30 + $0x20] sm:$0xff] (%p3989_p5)  ;;  %2761 = vst [vmem:[%s5825_s29 + $0x188] sm:$0xff] (%p3989_p5), %v2760_v0 }
 0x779   : > { %v2654_v13 = vadd.f32 %v5742_v33, %v2653_v45  ;;  %v2716_v33 = vld [vmem:[%s5751_s30 + $0x18] sm:$0xff] (%p3989_p5)  ;;  %2719 = vst [vmem:[%s5825_s29 + $0x40] sm:$0xff] (%p3989_p5), %v2718_v30  ;;  %v2762_v37 = vld [vmem:[%s5751_s30 + $0xd0] sm:$0xff] (%p3989_p5) }
 0x77a   : > { %2686 = vst [vmem:[%s5751_s30 + $0xf0] sm:$0xff] %v2652_v21  ;;  %2717 = vst [vmem:[%s5825_s29 + $0x28] sm:$0xff] (%p3989_p5), %v2716_v33  ;;  %v2764_v2 = vld [vmem:[%s5751_s30 + $0xd8] sm:$0xff] (%p3989_p5) }
 0x77b   : > { %2687 = vst [vmem:[%s5751_s30 + $0xf8] sm:$0xff] %v2654_v13  ;;  %2763 = vst [vmem:[%s5825_s29 + $0x1a0] sm:$0xff] (%p3989_p5), %v2762_v37 }
 0x77c   : > { %2765 = vst [vmem:[%s5825_s29 + $0x1a8] sm:$0xff] %v2764_v2 }
 0x77d   : > { %v2766_v16 = vld [vmem:[%s5751_s30 + $0xe0] sm:$0xff] }
 0x77e   : > { %v2768_v17 = vld [vmem:[%s5751_s30 + $0xe8] sm:$0xff]  ;;  %2767 = vst [vmem:[%s5825_s29 + $0x1c0] sm:$0xff] %v2766_v16 }
 0x77f   : > { %2769 = vst [vmem:[%s5825_s29 + $0x1c8] sm:$0xff] %v2768_v17 }
 0x781   : > { %v2770_v48 = vld [vmem:[%s5751_s30 + $0xf0] sm:$0xff] }
 0x782   : > { %v2772_v55 = vld [vmem:[%s5751_s30 + $0xf8] sm:$0xff]  ;;  %2771 = vst [vmem:[%s5825_s29 + $0x1e0] sm:$0xff] %v2770_v48 }
 0x783   : > { %2773 = vst [vmem:[%s5825_s29 + $0x1e8] sm:$0xff] %v2772_v55 }
 0x784 PF: > { %p13_p10 = scmp.ge.s32.totalorder %s3976_s25, 4   ;;  %s5920_s21 = smov %s3917_s22 }
 0x785   : > { %s5921_s22 = smov %s3987_s28  ;;  %s5922_s23 = smov %s3976_s25 }
 0x786   :  { %15 = sbr.rel (!%p13_p10) target bundleno = 2 (0x2), region = 125 }

</bundles_post_ra>
